<compile_context>
chip_gen: v7x
topology: tpu7x:2x2x1
jax: 0.10.0
libtpu: 0.0.40
codegen_flags: <defaults>
</compile_context>

<pallas_src>
import functools

import numpy as np
import jax
import jax.numpy as jnp
from jax import lax
from jax.experimental import pallas as pl
from jax.experimental.pallas import tpu as pltpu

ALPHA_MGD = 2e-5
LAMBDA_MGD = 0.65

_OUT_SUB, _OUT_LANE = 8, 128   # lane-dense per-block partial-sum tile


# ----------------------------------------------------------------------------
# Static conv-tap metadata (built host-side with numpy; no in-kernel int div).
# ----------------------------------------------------------------------------
def _conv3x3_taps(hh, ww):
    """Per-tap (flat shift, 0/1 boundary mask) for a 3x3 SAME conv on a
    row-major flattened (H*W,) image axis."""
    yy, xx = np.meshgrid(np.arange(hh), np.arange(ww), indexing="ij")
    shifts, masks = [], []
    for dy in range(3):
        for dx in range(3):
            oy, ox = dy - 1, dx - 1
            ok = ((yy + oy >= 0) & (yy + oy < hh) &
                  (xx + ox >= 0) & (xx + ox < ww))
            shifts.append(oy * ww + ox)
            masks.append(ok.reshape(-1))
    return shifts, np.stack(masks, axis=0).astype(np.float32)   # (9, H*W)


# ----------------------------------------------------------------------------
# Kernel
# ----------------------------------------------------------------------------
def _mgd_stage_kernel(s_ref, m_ref, t_ref, edge_ref, w1_ref, b1_ref,
                      w2_ref, b2_ref, out_ref, *, shifts):
    # s_ref : (NB, Cs, HW) f32 student   m_ref: (NB, 1, HW) f32 binary mask
    # t_ref : (NB, Ct, HW) f32 teacher   edge_ref: (9, HW) f32 boundary masks
    # w1_ref: (Ct, 9*Cs)   w2_ref: (Ct, 9*Ct)   b*_ref: (Ct, 1)   all f32
    # out_ref: (1, 8, 128) f32 per-block partial SSE (broadcast scalar)
    nb, cs, hw = s_ref.shape
    ct = t_ref.shape[1]

    # masked_fea = preds_S * mat   (f32 end-to-end; VPU conv path, v5e-safe)
    x = s_ref[...] * m_ref[...]                                  # (NB,Cs,HW)

    # Boundary masks, hoisted once and shared by both convs.
    edge = edge_ref[...]                                         # (9, HW)
    edge_rows = [edge[t][None, None, :] for t in range(9)]       # (1,1,HW) each

    def conv3x3(inp, w_ref, b_ref, cin):
        # 3x3 SAME conv as 9 shifted-view FMA accumulations on the VPU
        # (channels on sublanes, HW on lanes).  No (H+2,W+2) padded copies,
        # no 9*C im2col buffer.
        w = w_ref[...]                                           # (Ct, 9*Cin)
        acc = jnp.broadcast_to(b_ref[...][None], (nb, ct, hw))   # bias init
        for t, s in enumerate(shifts):
            if s == 0:
                xs = inp                                         # center tap
            else:
                # shifted view of the flattened image axis; wrapped / out-of-
                # image positions are zeroed by the static edge mask.
                xs = jnp.roll(inp, -s, axis=2) * edge_rows[t]    # (NB,Cin,HW)
            for ci in range(cin):
                k = t * cin + ci
                w_col = w[:, k:k + 1][None]                      # (1, Ct, 1)
                acc = acc + w_col * xs[:, ci:ci + 1, :]          # (NB,Ct,HW)
        return acc

    h1 = jnp.maximum(conv3x3(x, w1_ref, b1_ref, cs), 0.0)        # conv1 + ReLU
    gen = conv3x3(h1, w2_ref, b2_ref, ct)                        # conv2

    # MSELoss(reduction='sum') partial for this batch block.
    diff = gen - t_ref[...]
    sse = jnp.sum(diff * diff)

    # Lane-dense unmasked store of the per-block partial sum.
    out_ref[...] = jnp.full(out_ref.shape, sse, dtype=out_ref.dtype)


# ----------------------------------------------------------------------------
# VMEM-aware block sizing
# ----------------------------------------------------------------------------
def _pad8(c):
    return -(-int(c) // 8) * 8


def _pad128(c):
    return -(-int(c) // 128) * 128


def _vmem_capacity_bytes():
    try:
        return int(getattr(pltpu.get_tpu_info(), "vmem_capacity_bytes",
                           64 << 20))
    except Exception:
        return 64 << 20     # v7x physical VMEM; safe lower bound


def _pick_block_n(n, hw, cs, ct, budget_bytes):
    """Largest divisor of N whose PADDED, double-buffered per-step working set
    fits the budget, capped so the batch grid has >=2 steps (v7x megacore)."""
    hw_p = _pad128(hw)
    in_bytes = 4 * hw_p * (_pad8(cs) + _pad8(1) + _pad8(ct))     # S, mask, T
    tmp_bytes = 4 * hw_p * (2 * _pad8(cs) + 4 * _pad8(ct))       # x, xs, h1, xs2, acc, diff
    per_elem = 2 * in_bytes + tmp_bytes                          # x2 input double-buffering
    fixed = 2 << 20                                              # weights/edge/out + headroom
    nb = int(max(1, min(n, (budget_bytes - fixed) // max(per_elem, 1))))
    if n >= 2:
        nb = max(1, min(nb, n // 2))                             # >=2 grid steps
    while n % nb:
        nb -= 1
    return nb


# ----------------------------------------------------------------------------
# Wrapper (single distillation stage)
# ----------------------------------------------------------------------------
def mgd_dis_loss(preds_s, preds_t, mat, w1, b1, w2, b2, block_n=None):
    """sum((conv2(relu(conv1(preds_S * mat))) - preds_T)^2) / N.

    preds_s: (N, Cs, H, W) f32   preds_t: (N, Ct, H, W) f32   (NCHW, like torch)
    mat    : (N, 1,  H, W) f32   w1: (3,3,Cs,Ct) HWIO  b1: (Ct,)
                                 w2: (3,3,Ct,Ct) HWIO  b2: (Ct,)
    """
    n, cs, hh, ww = preds_s.shape
    ct = preds_t.shape[1]
    hw = hh * ww

    vmem_cap = _vmem_capacity_bytes()
    budget = vmem_cap // 3           # ~21 MiB on v7x (64 MiB), ~42 MiB on v5e/v6e
    if block_n is None:
        block_n = _pick_block_n(n, hw, cs, ct, budget)
    if n % block_n:
        raise ValueError(f"block_n={block_n} must divide N={n}")
    num_blocks = n // block_n

    # Lane-dense kernel layout: channels on sublanes, flattened H*W on lanes.
    s2 = preds_s.reshape(n, cs, hw)
    t2 = preds_t.reshape(n, ct, hw)
    m2 = mat.reshape(n, 1, hw)

    # Weight column k = (3*dy+dx)*Cin + ci holds w[dy,dx,ci,:] (Ct values on
    # sublanes), so each tap/channel FMA reads one static (Ct, 1) column.
    w1k = jnp.transpose(w1.reshape(9 * cs, ct)).astype(jnp.float32)   # (Ct, 9*Cs)
    w2k = jnp.transpose(w2.reshape(9 * ct, ct)).astype(jnp.float32)   # (Ct, 9*Ct)
    b1k = b1.reshape(ct, 1).astype(jnp.float32)
    b2k = b2.reshape(ct, 1).astype(jnp.float32)

    shifts, edge_np = _conv3x3_taps(hh, ww)
    edge = jnp.asarray(edge_np)                                       # (9, HW)

    kernel = functools.partial(_mgd_stage_kernel, shifts=tuple(shifts))

    flops = int(2 * n * hw * 9 * (cs * ct + ct * ct) + 4 * n * hw * ct)
    bytes_accessed = int(4 * (n * hw * (cs + 1 + ct) + 9 * hw
                              + ct * (9 * cs + 9 * ct + 2)
                              + num_blocks * _OUT_SUB * _OUT_LANE))

    partials = pl.pallas_call(
        kernel,
        out_shape=jax.ShapeDtypeStruct((num_blocks, _OUT_SUB, _OUT_LANE),
                                       jnp.float32),
        grid=(num_blocks,),
        in_specs=[
            pl.BlockSpec((block_n, cs, hw), lambda i: (i, 0, 0)),
            pl.BlockSpec((block_n, 1, hw), lambda i: (i, 0, 0)),
            pl.BlockSpec((block_n, ct, hw), lambda i: (i, 0, 0)),
            pl.BlockSpec((9, hw), lambda i: (0, 0)),
            pl.BlockSpec((ct, 9 * cs), lambda i: (0, 0)),
            pl.BlockSpec((ct, 1), lambda i: (0, 0)),
            pl.BlockSpec((ct, 9 * ct), lambda i: (0, 0)),
            pl.BlockSpec((ct, 1), lambda i: (0, 0)),
        ],
        out_specs=pl.BlockSpec((1, _OUT_SUB, _OUT_LANE), lambda i: (i, 0, 0)),
        compiler_params=pltpu.CompilerParams(
            dimension_semantics=("parallel",),
            vmem_limit_bytes=int(vmem_cap * 3 // 4)),
        cost_estimate=pl.CostEstimate(flops=flops, transcendentals=0,
                                      bytes_accessed=bytes_accessed),
    )(s2, m2, t2, edge, w1k, b1k, w2k, b2k)
    return jnp.sum(partials[:, 0, 0]) / n


def make_masks(key, shapes, lambda_mgd=LAMBDA_MGD):
    """torch.rand((N,1,H,W)); where(u > 1-lambda, 0, 1).
    TODO(synk): torch's RNG stream is not bit-reproducible in JAX; masks are
    generated deterministically with jax.random instead."""
    mats = []
    for (n, h, w) in shapes:
        key, sub = jax.random.split(key)
        u = jax.random.uniform(sub, (n, 1, h, w), dtype=jnp.float32)
        mats.append(jnp.where(u > 1.0 - lambda_mgd, 0.0, 1.0))
    return mats


def mgd_loss_forward(y_s, y_t, params, mats, alpha_mgd=ALPHA_MGD, layer=None):
    """Equivalent of MGDLoss.forward (sum over stages)."""
    assert len(y_s) == len(y_t)
    losses = []
    for idx, (s, t) in enumerate(zip(y_s, y_t)):
        mat = mats[idx]
        if layer == 'outlayer':
            idx = -1
        w1, b1, w2, b2 = params[idx]
        losses.append(mgd_dis_loss(s, t, mat, w1, b1, w2, b2) * alpha_mgd)
    return sum(losses)


# ----------------------------------------------------------------------------
# Pure-JAX reference for validation
# ----------------------------------------------------------------------------
def _ref_dis_loss(s, t, mat, w1, b1, w2, b2):
    masked = s * mat
    h = lax.conv_general_dilated(
        masked, w1, (1, 1), 'SAME',
        dimension_numbers=('NCHW', 'HWIO', 'NCHW'),
        precision=lax.Precision.HIGHEST)
    h = jnp.maximum(h + b1[None, :, None, None], 0.0)
    g = lax.conv_general_dilated(
        h, w2, (1, 1), 'SAME',
        dimension_numbers=('NCHW', 'HWIO', 'NCHW'),
        precision=lax.Precision.HIGHEST)
    g = g + b2[None, :, None, None]
    return jnp.sum((g - t) ** 2) / s.shape[0]


if __name__ == "__main__":
    key = jax.random.PRNGKey(0)
    channels_s = [4, 6]
    channels_t = [8, 8]
    N, H, W = 2, 8, 8

    # Synthetic per-stage weights: Conv2d(cs, ct, 3, p=1) -> ReLU ->
    # Conv2d(ct, ct, 3, p=1).  (No checkpoint load; HWIO layout.)
    params = []
    k = key
    for cs, ct in zip(channels_s, channels_t):
        k, k1, k2, k3, k4 = jax.random.split(k, 5)
        params.append((
            jax.random.normal(k1, (3, 3, cs, ct), jnp.float32) * 0.1,
            jax.random.normal(k2, (ct,), jnp.float32) * 0.1,
            jax.random.normal(k3, (3, 3, ct, ct), jnp.float32) * 0.1,
            jax.random.normal(k4, (ct,), jnp.float32) * 0.1,
        ))

    # Inputs in NCHW, exactly like the torch module.
    k, ks1, kt1, ks2, kt2, km = jax.random.split(k, 6)
    y_s = [jax.random.normal(ks1, (N, channels_s[0], H, W), jnp.float32),
           jax.random.normal(ks2, (N, channels_s[1], H, W), jnp.float32)]
    y_t = [jax.random.normal(kt1, (N, channels_t[0], H, W), jnp.float32),
           jax.random.normal(kt2, (N, channels_t[1], H, W), jnp.float32)]

    mats = make_masks(km, [(N, H, W), (N, H, W)])

    loss = mgd_loss_forward(y_s, y_t, params, mats)
    loss = jax.block_until_ready(loss)

    # Validation against a pure-JAX f32 reference with the same masks/weights
    # (kernel is f32 end-to-end, so the tolerance is tight).
    ref = sum(_ref_dis_loss(s, t, m, *p) * ALPHA_MGD
              for s, t, m, p in zip(y_s, y_t, mats, params))
    ref = jax.block_until_ready(ref)
    if not jnp.allclose(loss, ref, rtol=2e-3, atol=1e-8):
        raise AssertionError(f"mismatch: pallas={loss} ref={ref}")

    print("KERNEL_OK")
</pallas_src>

<mosaic_0001>
module attributes {stable_mosaic.version = 11 : i64} {
  func.func @_mgd_stage_kernel(%arg0: i32, %arg1: memref<1x4x64xf32, #tpu.memory_space<vmem>>, %arg2: memref<1x1x64xf32, #tpu.memory_space<vmem>>, %arg3: memref<1x8x64xf32, #tpu.memory_space<vmem>>, %arg4: memref<9x64xf32, #tpu.memory_space<vmem>>, %arg5: memref<8x36xf32, #tpu.memory_space<vmem>>, %arg6: memref<8x1xf32, #tpu.memory_space<vmem>>, %arg7: memref<8x72xf32, #tpu.memory_space<vmem>>, %arg8: memref<8x1xf32, #tpu.memory_space<vmem>>, %arg9: memref<1x8x128xf32, #tpu.memory_space<vmem>>) attributes {dimension_semantics = [#tpu.dimension_semantics<parallel>], iteration_bounds = array<i64: 2>, scalar_prefetch = 0 : i64, scratch_operands = 0 : i64, tpu.core_type = #tpu.core_type<tc>, window_params = [{transform_indices = @transform_0, window_bounds = array<i64: 1, 4, 64>}, {transform_indices = @transform_1, window_bounds = array<i64: 1, 1, 64>}, {transform_indices = @transform_2, window_bounds = array<i64: 1, 8, 64>}, {pipeline_mode = #tpu.pipeline_mode<synchronous>, transform_indices = @transform_3, window_bounds = array<i64: 9, 64>}, {pipeline_mode = #tpu.pipeline_mode<synchronous>, transform_indices = @transform_4, window_bounds = array<i64: 8, 36>}, {pipeline_mode = #tpu.pipeline_mode<synchronous>, transform_indices = @transform_5, window_bounds = array<i64: 8, 1>}, {pipeline_mode = #tpu.pipeline_mode<synchronous>, transform_indices = @transform_6, window_bounds = array<i64: 8, 72>}, {pipeline_mode = #tpu.pipeline_mode<synchronous>, transform_indices = @transform_7, window_bounds = array<i64: 8, 1>}, {transform_indices = @transform_8, window_bounds = array<i64: 1, 8, 128>}]} {
    %c0 = arith.constant 0 : index
    %c0_0 = arith.constant 0 : index
    %c0_1 = arith.constant 0 : index
    %0 = vector.load %arg1[%c0, %c0_0, %c0_1] : memref<1x4x64xf32, #tpu.memory_space<vmem>>, vector<1x4x64xf32>
    %c0_2 = arith.constant 0 : index
    %c0_3 = arith.constant 0 : index
    %c0_4 = arith.constant 0 : index
    %1 = vector.load %arg2[%c0_2, %c0_3, %c0_4] : memref<1x1x64xf32, #tpu.memory_space<vmem>>, vector<1x1x64xf32>
    %2 = vector.broadcast %1 : vector<1x1x64xf32> to vector<1x4x64xf32>
    %3 = arith.mulf %0, %2 : vector<1x4x64xf32>
    %c0_5 = arith.constant 0 : index
    %c0_6 = arith.constant 0 : index
    %4 = vector.load %arg4[%c0_5, %c0_6] : memref<9x64xf32, #tpu.memory_space<vmem>>, vector<9x64xf32>
    %5 = vector.extract_strided_slice %4 {offsets = [0, 0], sizes = [1, 64], strides = [1, 1]} : vector<9x64xf32> to vector<1x64xf32>
    %6 = vector.shape_cast %5 : vector<1x64xf32> to vector<64xf32>
    %7 = vector.shape_cast %6 : vector<64xf32> to vector<1x1x64xf32>
    %8 = vector.extract_strided_slice %4 {offsets = [1, 0], sizes = [1, 64], strides = [1, 1]} : vector<9x64xf32> to vector<1x64xf32>
    %9 = vector.shape_cast %8 : vector<1x64xf32> to vector<64xf32>
    %10 = vector.shape_cast %9 : vector<64xf32> to vector<1x1x64xf32>
    %11 = vector.extract_strided_slice %4 {offsets = [2, 0], sizes = [1, 64], strides = [1, 1]} : vector<9x64xf32> to vector<1x64xf32>
    %12 = vector.shape_cast %11 : vector<1x64xf32> to vector<64xf32>
    %13 = vector.shape_cast %12 : vector<64xf32> to vector<1x1x64xf32>
    %14 = vector.extract_strided_slice %4 {offsets = [3, 0], sizes = [1, 64], strides = [1, 1]} : vector<9x64xf32> to vector<1x64xf32>
    %15 = vector.shape_cast %14 : vector<1x64xf32> to vector<64xf32>
    %16 = vector.shape_cast %15 : vector<64xf32> to vector<1x1x64xf32>
    %17 = vector.extract_strided_slice %4 {offsets = [5, 0], sizes = [1, 64], strides = [1, 1]} : vector<9x64xf32> to vector<1x64xf32>
    %18 = vector.shape_cast %17 : vector<1x64xf32> to vector<64xf32>
    %19 = vector.shape_cast %18 : vector<64xf32> to vector<1x1x64xf32>
    %20 = vector.extract_strided_slice %4 {offsets = [6, 0], sizes = [1, 64], strides = [1, 1]} : vector<9x64xf32> to vector<1x64xf32>
    %21 = vector.shape_cast %20 : vector<1x64xf32> to vector<64xf32>
    %22 = vector.shape_cast %21 : vector<64xf32> to vector<1x1x64xf32>
    %23 = vector.extract_strided_slice %4 {offsets = [7, 0], sizes = [1, 64], strides = [1, 1]} : vector<9x64xf32> to vector<1x64xf32>
    %24 = vector.shape_cast %23 : vector<1x64xf32> to vector<64xf32>
    %25 = vector.shape_cast %24 : vector<64xf32> to vector<1x1x64xf32>
    %26 = vector.extract_strided_slice %4 {offsets = [8, 0], sizes = [1, 64], strides = [1, 1]} : vector<9x64xf32> to vector<1x64xf32>
    %27 = vector.shape_cast %26 : vector<1x64xf32> to vector<64xf32>
    %28 = vector.shape_cast %27 : vector<64xf32> to vector<1x1x64xf32>
    %c0_7 = arith.constant 0 : index
    %c0_8 = arith.constant 0 : index
    %29 = vector.load %arg5[%c0_7, %c0_8] : memref<8x36xf32, #tpu.memory_space<vmem>>, vector<8x36xf32>
    %c0_9 = arith.constant 0 : index
    %c0_10 = arith.constant 0 : index
    %30 = vector.load %arg6[%c0_9, %c0_10] : memref<8x1xf32, #tpu.memory_space<vmem>>, vector<8x1xf32>
    %31 = vector.shape_cast %30 : vector<8x1xf32> to vector<1x8x1xf32>
    %32 = vector.shape_cast %31 : vector<1x8x1xf32> to vector<1x8x1xf32>
    %33 = vector.broadcast %32 : vector<1x8x1xf32> to vector<1x8x64xf32>
    %34 = vector.extract_strided_slice %3 {offsets = [0, 0, 55], sizes = [1, 4, 9], strides = [1, 1, 1]} : vector<1x4x64xf32> to vector<1x4x9xf32>
    %35 = vector.extract_strided_slice %3 {offsets = [0, 0, 0], sizes = [1, 4, 55], strides = [1, 1, 1]} : vector<1x4x64xf32> to vector<1x4x55xf32>
    %36 = tpu.concatenate %34, %35 in 2 : vector<1x4x9xf32>, vector<1x4x55xf32> -> vector<1x4x64xf32>
    %37 = vector.broadcast %7 : vector<1x1x64xf32> to vector<1x4x64xf32>
    %38 = arith.mulf %36, %37 : vector<1x4x64xf32>
    %39 = vector.extract_strided_slice %29 {offsets = [0, 0], sizes = [8, 1], strides = [1, 1]} : vector<8x36xf32> to vector<8x1xf32>
    %40 = vector.shape_cast %39 : vector<8x1xf32> to vector<1x8x1xf32>
    %41 = vector.extract_strided_slice %38 {offsets = [0, 0, 0], sizes = [1, 1, 64], strides = [1, 1, 1]} : vector<1x4x64xf32> to vector<1x1x64xf32>
    %42 = vector.broadcast %40 : vector<1x8x1xf32> to vector<1x8x64xf32>
    %43 = vector.broadcast %41 : vector<1x1x64xf32> to vector<1x8x64xf32>
    %44 = arith.mulf %42, %43 : vector<1x8x64xf32>
    %45 = arith.addf %33, %44 : vector<1x8x64xf32>
    %46 = vector.extract_strided_slice %29 {offsets = [0, 1], sizes = [8, 1], strides = [1, 1]} : vector<8x36xf32> to vector<8x1xf32>
    %47 = vector.shape_cast %46 : vector<8x1xf32> to vector<1x8x1xf32>
    %48 = vector.extract_strided_slice %38 {offsets = [0, 1, 0], sizes = [1, 1, 64], strides = [1, 1, 1]} : vector<1x4x64xf32> to vector<1x1x64xf32>
    %49 = vector.broadcast %47 : vector<1x8x1xf32> to vector<1x8x64xf32>
    %50 = vector.broadcast %48 : vector<1x1x64xf32> to vector<1x8x64xf32>
    %51 = arith.mulf %49, %50 : vector<1x8x64xf32>
    %52 = arith.addf %45, %51 : vector<1x8x64xf32>
    %53 = vector.extract_strided_slice %29 {offsets = [0, 2], sizes = [8, 1], strides = [1, 1]} : vector<8x36xf32> to vector<8x1xf32>
    %54 = vector.shape_cast %53 : vector<8x1xf32> to vector<1x8x1xf32>
    %55 = vector.extract_strided_slice %38 {offsets = [0, 2, 0], sizes = [1, 1, 64], strides = [1, 1, 1]} : vector<1x4x64xf32> to vector<1x1x64xf32>
    %56 = vector.broadcast %54 : vector<1x8x1xf32> to vector<1x8x64xf32>
    %57 = vector.broadcast %55 : vector<1x1x64xf32> to vector<1x8x64xf32>
    %58 = arith.mulf %56, %57 : vector<1x8x64xf32>
    %59 = arith.addf %52, %58 : vector<1x8x64xf32>
    %60 = vector.extract_strided_slice %29 {offsets = [0, 3], sizes = [8, 1], strides = [1, 1]} : vector<8x36xf32> to vector<8x1xf32>
    %61 = vector.shape_cast %60 : vector<8x1xf32> to vector<1x8x1xf32>
    %62 = vector.extract_strided_slice %38 {offsets = [0, 3, 0], sizes = [1, 1, 64], strides = [1, 1, 1]} : vector<1x4x64xf32> to vector<1x1x64xf32>
    %63 = vector.broadcast %61 : vector<1x8x1xf32> to vector<1x8x64xf32>
    %64 = vector.broadcast %62 : vector<1x1x64xf32> to vector<1x8x64xf32>
    %65 = arith.mulf %63, %64 : vector<1x8x64xf32>
    %66 = arith.addf %59, %65 : vector<1x8x64xf32>
    %67 = vector.extract_strided_slice %3 {offsets = [0, 0, 56], sizes = [1, 4, 8], strides = [1, 1, 1]} : vector<1x4x64xf32> to vector<1x4x8xf32>
    %68 = vector.extract_strided_slice %3 {offsets = [0, 0, 0], sizes = [1, 4, 56], strides = [1, 1, 1]} : vector<1x4x64xf32> to vector<1x4x56xf32>
    %69 = tpu.concatenate %67, %68 in 2 : vector<1x4x8xf32>, vector<1x4x56xf32> -> vector<1x4x64xf32>
    %70 = vector.broadcast %10 : vector<1x1x64xf32> to vector<1x4x64xf32>
    %71 = arith.mulf %69, %70 : vector<1x4x64xf32>
    %72 = vector.extract_strided_slice %29 {offsets = [0, 4], sizes = [8, 1], strides = [1, 1]} : vector<8x36xf32> to vector<8x1xf32>
    %73 = vector.shape_cast %72 : vector<8x1xf32> to vector<1x8x1xf32>
    %74 = vector.extract_strided_slice %71 {offsets = [0, 0, 0], sizes = [1, 1, 64], strides = [1, 1, 1]} : vector<1x4x64xf32> to vector<1x1x64xf32>
    %75 = vector.broadcast %73 : vector<1x8x1xf32> to vector<1x8x64xf32>
    %76 = vector.broadcast %74 : vector<1x1x64xf32> to vector<1x8x64xf32>
    %77 = arith.mulf %75, %76 : vector<1x8x64xf32>
    %78 = arith.addf %66, %77 : vector<1x8x64xf32>
    %79 = vector.extract_strided_slice %29 {offsets = [0, 5], sizes = [8, 1], strides = [1, 1]} : vector<8x36xf32> to vector<8x1xf32>
    %80 = vector.shape_cast %79 : vector<8x1xf32> to vector<1x8x1xf32>
    %81 = vector.extract_strided_slice %71 {offsets = [0, 1, 0], sizes = [1, 1, 64], strides = [1, 1, 1]} : vector<1x4x64xf32> to vector<1x1x64xf32>
    %82 = vector.broadcast %80 : vector<1x8x1xf32> to vector<1x8x64xf32>
    %83 = vector.broadcast %81 : vector<1x1x64xf32> to vector<1x8x64xf32>
    %84 = arith.mulf %82, %83 : vector<1x8x64xf32>
    %85 = arith.addf %78, %84 : vector<1x8x64xf32>
    %86 = vector.extract_strided_slice %29 {offsets = [0, 6], sizes = [8, 1], strides = [1, 1]} : vector<8x36xf32> to vector<8x1xf32>
    %87 = vector.shape_cast %86 : vector<8x1xf32> to vector<1x8x1xf32>
    %88 = vector.extract_strided_slice %71 {offsets = [0, 2, 0], sizes = [1, 1, 64], strides = [1, 1, 1]} : vector<1x4x64xf32> to vector<1x1x64xf32>
    %89 = vector.broadcast %87 : vector<1x8x1xf32> to vector<1x8x64xf32>
    %90 = vector.broadcast %88 : vector<1x1x64xf32> to vector<1x8x64xf32>
    %91 = arith.mulf %89, %90 : vector<1x8x64xf32>
    %92 = arith.addf %85, %91 : vector<1x8x64xf32>
    %93 = vector.extract_strided_slice %29 {offsets = [0, 7], sizes = [8, 1], strides = [1, 1]} : vector<8x36xf32> to vector<8x1xf32>
    %94 = vector.shape_cast %93 : vector<8x1xf32> to vector<1x8x1xf32>
    %95 = vector.extract_strided_slice %71 {offsets = [0, 3, 0], sizes = [1, 1, 64], strides = [1, 1, 1]} : vector<1x4x64xf32> to vector<1x1x64xf32>
    %96 = vector.broadcast %94 : vector<1x8x1xf32> to vector<1x8x64xf32>
    %97 = vector.broadcast %95 : vector<1x1x64xf32> to vector<1x8x64xf32>
    %98 = arith.mulf %96, %97 : vector<1x8x64xf32>
    %99 = arith.addf %92, %98 : vector<1x8x64xf32>
    %100 = vector.extract_strided_slice %3 {offsets = [0, 0, 57], sizes = [1, 4, 7], strides = [1, 1, 1]} : vector<1x4x64xf32> to vector<1x4x7xf32>
    %101 = vector.extract_strided_slice %3 {offsets = [0, 0, 0], sizes = [1, 4, 57], strides = [1, 1, 1]} : vector<1x4x64xf32> to vector<1x4x57xf32>
    %102 = tpu.concatenate %100, %101 in 2 : vector<1x4x7xf32>, vector<1x4x57xf32> -> vector<1x4x64xf32>
    %103 = vector.broadcast %13 : vector<1x1x64xf32> to vector<1x4x64xf32>
    %104 = arith.mulf %102, %103 : vector<1x4x64xf32>
    %105 = vector.extract_strided_slice %29 {offsets = [0, 8], sizes = [8, 1], strides = [1, 1]} : vector<8x36xf32> to vector<8x1xf32>
    %106 = vector.shape_cast %105 : vector<8x1xf32> to vector<1x8x1xf32>
    %107 = vector.extract_strided_slice %104 {offsets = [0, 0, 0], sizes = [1, 1, 64], strides = [1, 1, 1]} : vector<1x4x64xf32> to vector<1x1x64xf32>
    %108 = vector.broadcast %106 : vector<1x8x1xf32> to vector<1x8x64xf32>
    %109 = vector.broadcast %107 : vector<1x1x64xf32> to vector<1x8x64xf32>
    %110 = arith.mulf %108, %109 : vector<1x8x64xf32>
    %111 = arith.addf %99, %110 : vector<1x8x64xf32>
    %112 = vector.extract_strided_slice %29 {offsets = [0, 9], sizes = [8, 1], strides = [1, 1]} : vector<8x36xf32> to vector<8x1xf32>
    %113 = vector.shape_cast %112 : vector<8x1xf32> to vector<1x8x1xf32>
    %114 = vector.extract_strided_slice %104 {offsets = [0, 1, 0], sizes = [1, 1, 64], strides = [1, 1, 1]} : vector<1x4x64xf32> to vector<1x1x64xf32>
    %115 = vector.broadcast %113 : vector<1x8x1xf32> to vector<1x8x64xf32>
    %116 = vector.broadcast %114 : vector<1x1x64xf32> to vector<1x8x64xf32>
    %117 = arith.mulf %115, %116 : vector<1x8x64xf32>
    %118 = arith.addf %111, %117 : vector<1x8x64xf32>
    %119 = vector.extract_strided_slice %29 {offsets = [0, 10], sizes = [8, 1], strides = [1, 1]} : vector<8x36xf32> to vector<8x1xf32>
    %120 = vector.shape_cast %119 : vector<8x1xf32> to vector<1x8x1xf32>
    %121 = vector.extract_strided_slice %104 {offsets = [0, 2, 0], sizes = [1, 1, 64], strides = [1, 1, 1]} : vector<1x4x64xf32> to vector<1x1x64xf32>
    %122 = vector.broadcast %120 : vector<1x8x1xf32> to vector<1x8x64xf32>
    %123 = vector.broadcast %121 : vector<1x1x64xf32> to vector<1x8x64xf32>
    %124 = arith.mulf %122, %123 : vector<1x8x64xf32>
    %125 = arith.addf %118, %124 : vector<1x8x64xf32>
    %126 = vector.extract_strided_slice %29 {offsets = [0, 11], sizes = [8, 1], strides = [1, 1]} : vector<8x36xf32> to vector<8x1xf32>
    %127 = vector.shape_cast %126 : vector<8x1xf32> to vector<1x8x1xf32>
    %128 = vector.extract_strided_slice %104 {offsets = [0, 3, 0], sizes = [1, 1, 64], strides = [1, 1, 1]} : vector<1x4x64xf32> to vector<1x1x64xf32>
    %129 = vector.broadcast %127 : vector<1x8x1xf32> to vector<1x8x64xf32>
    %130 = vector.broadcast %128 : vector<1x1x64xf32> to vector<1x8x64xf32>
    %131 = arith.mulf %129, %130 : vector<1x8x64xf32>
    %132 = arith.addf %125, %131 : vector<1x8x64xf32>
    %133 = vector.extract_strided_slice %3 {offsets = [0, 0, 63], sizes = [1, 4, 1], strides = [1, 1, 1]} : vector<1x4x64xf32> to vector<1x4x1xf32>
    %134 = vector.extract_strided_slice %3 {offsets = [0, 0, 0], sizes = [1, 4, 63], strides = [1, 1, 1]} : vector<1x4x64xf32> to vector<1x4x63xf32>
    %135 = tpu.concatenate %133, %134 in 2 : vector<1x4x1xf32>, vector<1x4x63xf32> -> vector<1x4x64xf32>
    %136 = vector.broadcast %16 : vector<1x1x64xf32> to vector<1x4x64xf32>
    %137 = arith.mulf %135, %136 : vector<1x4x64xf32>
    %138 = vector.extract_strided_slice %29 {offsets = [0, 12], sizes = [8, 1], strides = [1, 1]} : vector<8x36xf32> to vector<8x1xf32>
    %139 = vector.shape_cast %138 : vector<8x1xf32> to vector<1x8x1xf32>
    %140 = vector.extract_strided_slice %137 {offsets = [0, 0, 0], sizes = [1, 1, 64], strides = [1, 1, 1]} : vector<1x4x64xf32> to vector<1x1x64xf32>
    %141 = vector.broadcast %139 : vector<1x8x1xf32> to vector<1x8x64xf32>
    %142 = vector.broadcast %140 : vector<1x1x64xf32> to vector<1x8x64xf32>
    %143 = arith.mulf %141, %142 : vector<1x8x64xf32>
    %144 = arith.addf %132, %143 : vector<1x8x64xf32>
    %145 = vector.extract_strided_slice %29 {offsets = [0, 13], sizes = [8, 1], strides = [1, 1]} : vector<8x36xf32> to vector<8x1xf32>
    %146 = vector.shape_cast %145 : vector<8x1xf32> to vector<1x8x1xf32>
    %147 = vector.extract_strided_slice %137 {offsets = [0, 1, 0], sizes = [1, 1, 64], strides = [1, 1, 1]} : vector<1x4x64xf32> to vector<1x1x64xf32>
    %148 = vector.broadcast %146 : vector<1x8x1xf32> to vector<1x8x64xf32>
    %149 = vector.broadcast %147 : vector<1x1x64xf32> to vector<1x8x64xf32>
    %150 = arith.mulf %148, %149 : vector<1x8x64xf32>
    %151 = arith.addf %144, %150 : vector<1x8x64xf32>
    %152 = vector.extract_strided_slice %29 {offsets = [0, 14], sizes = [8, 1], strides = [1, 1]} : vector<8x36xf32> to vector<8x1xf32>
    %153 = vector.shape_cast %152 : vector<8x1xf32> to vector<1x8x1xf32>
    %154 = vector.extract_strided_slice %137 {offsets = [0, 2, 0], sizes = [1, 1, 64], strides = [1, 1, 1]} : vector<1x4x64xf32> to vector<1x1x64xf32>
    %155 = vector.broadcast %153 : vector<1x8x1xf32> to vector<1x8x64xf32>
    %156 = vector.broadcast %154 : vector<1x1x64xf32> to vector<1x8x64xf32>
    %157 = arith.mulf %155, %156 : vector<1x8x64xf32>
    %158 = arith.addf %151, %157 : vector<1x8x64xf32>
    %159 = vector.extract_strided_slice %29 {offsets = [0, 15], sizes = [8, 1], strides = [1, 1]} : vector<8x36xf32> to vector<8x1xf32>
    %160 = vector.shape_cast %159 : vector<8x1xf32> to vector<1x8x1xf32>
    %161 = vector.extract_strided_slice %137 {offsets = [0, 3, 0], sizes = [1, 1, 64], strides = [1, 1, 1]} : vector<1x4x64xf32> to vector<1x1x64xf32>
    %162 = vector.broadcast %160 : vector<1x8x1xf32> to vector<1x8x64xf32>
    %163 = vector.broadcast %161 : vector<1x1x64xf32> to vector<1x8x64xf32>
    %164 = arith.mulf %162, %163 : vector<1x8x64xf32>
    %165 = arith.addf %158, %164 : vector<1x8x64xf32>
    %166 = vector.extract_strided_slice %29 {offsets = [0, 16], sizes = [8, 1], strides = [1, 1]} : vector<8x36xf32> to vector<8x1xf32>
    %167 = vector.shape_cast %166 : vector<8x1xf32> to vector<1x8x1xf32>
    %168 = vector.extract_strided_slice %3 {offsets = [0, 0, 0], sizes = [1, 1, 64], strides = [1, 1, 1]} : vector<1x4x64xf32> to vector<1x1x64xf32>
    %169 = vector.broadcast %167 : vector<1x8x1xf32> to vector<1x8x64xf32>
    %170 = vector.broadcast %168 : vector<1x1x64xf32> to vector<1x8x64xf32>
    %171 = arith.mulf %169, %170 : vector<1x8x64xf32>
    %172 = arith.addf %165, %171 : vector<1x8x64xf32>
    %173 = vector.extract_strided_slice %29 {offsets = [0, 17], sizes = [8, 1], strides = [1, 1]} : vector<8x36xf32> to vector<8x1xf32>
    %174 = vector.shape_cast %173 : vector<8x1xf32> to vector<1x8x1xf32>
    %175 = vector.extract_strided_slice %3 {offsets = [0, 1, 0], sizes = [1, 1, 64], strides = [1, 1, 1]} : vector<1x4x64xf32> to vector<1x1x64xf32>
    %176 = vector.broadcast %174 : vector<1x8x1xf32> to vector<1x8x64xf32>
    %177 = vector.broadcast %175 : vector<1x1x64xf32> to vector<1x8x64xf32>
    %178 = arith.mulf %176, %177 : vector<1x8x64xf32>
    %179 = arith.addf %172, %178 : vector<1x8x64xf32>
    %180 = vector.extract_strided_slice %29 {offsets = [0, 18], sizes = [8, 1], strides = [1, 1]} : vector<8x36xf32> to vector<8x1xf32>
    %181 = vector.shape_cast %180 : vector<8x1xf32> to vector<1x8x1xf32>
    %182 = vector.extract_strided_slice %3 {offsets = [0, 2, 0], sizes = [1, 1, 64], strides = [1, 1, 1]} : vector<1x4x64xf32> to vector<1x1x64xf32>
    %183 = vector.broadcast %181 : vector<1x8x1xf32> to vector<1x8x64xf32>
    %184 = vector.broadcast %182 : vector<1x1x64xf32> to vector<1x8x64xf32>
    %185 = arith.mulf %183, %184 : vector<1x8x64xf32>
    %186 = arith.addf %179, %185 : vector<1x8x64xf32>
    %187 = vector.extract_strided_slice %29 {offsets = [0, 19], sizes = [8, 1], strides = [1, 1]} : vector<8x36xf32> to vector<8x1xf32>
    %188 = vector.shape_cast %187 : vector<8x1xf32> to vector<1x8x1xf32>
    %189 = vector.extract_strided_slice %3 {offsets = [0, 3, 0], sizes = [1, 1, 64], strides = [1, 1, 1]} : vector<1x4x64xf32> to vector<1x1x64xf32>
    %190 = vector.broadcast %188 : vector<1x8x1xf32> to vector<1x8x64xf32>
    %191 = vector.broadcast %189 : vector<1x1x64xf32> to vector<1x8x64xf32>
    %192 = arith.mulf %190, %191 : vector<1x8x64xf32>
    %193 = arith.addf %186, %192 : vector<1x8x64xf32>
    %194 = vector.extract_strided_slice %3 {offsets = [0, 0, 1], sizes = [1, 4, 63], strides = [1, 1, 1]} : vector<1x4x64xf32> to vector<1x4x63xf32>
    %195 = vector.extract_strided_slice %3 {offsets = [0, 0, 0], sizes = [1, 4, 1], strides = [1, 1, 1]} : vector<1x4x64xf32> to vector<1x4x1xf32>
    %196 = tpu.concatenate %194, %195 in 2 : vector<1x4x63xf32>, vector<1x4x1xf32> -> vector<1x4x64xf32>
    %197 = vector.broadcast %19 : vector<1x1x64xf32> to vector<1x4x64xf32>
    %198 = arith.mulf %196, %197 : vector<1x4x64xf32>
    %199 = vector.extract_strided_slice %29 {offsets = [0, 20], sizes = [8, 1], strides = [1, 1]} : vector<8x36xf32> to vector<8x1xf32>
    %200 = vector.shape_cast %199 : vector<8x1xf32> to vector<1x8x1xf32>
    %201 = vector.extract_strided_slice %198 {offsets = [0, 0, 0], sizes = [1, 1, 64], strides = [1, 1, 1]} : vector<1x4x64xf32> to vector<1x1x64xf32>
    %202 = vector.broadcast %200 : vector<1x8x1xf32> to vector<1x8x64xf32>
    %203 = vector.broadcast %201 : vector<1x1x64xf32> to vector<1x8x64xf32>
    %204 = arith.mulf %202, %203 : vector<1x8x64xf32>
    %205 = arith.addf %193, %204 : vector<1x8x64xf32>
    %206 = vector.extract_strided_slice %29 {offsets = [0, 21], sizes = [8, 1], strides = [1, 1]} : vector<8x36xf32> to vector<8x1xf32>
    %207 = vector.shape_cast %206 : vector<8x1xf32> to vector<1x8x1xf32>
    %208 = vector.extract_strided_slice %198 {offsets = [0, 1, 0], sizes = [1, 1, 64], strides = [1, 1, 1]} : vector<1x4x64xf32> to vector<1x1x64xf32>
    %209 = vector.broadcast %207 : vector<1x8x1xf32> to vector<1x8x64xf32>
    %210 = vector.broadcast %208 : vector<1x1x64xf32> to vector<1x8x64xf32>
    %211 = arith.mulf %209, %210 : vector<1x8x64xf32>
    %212 = arith.addf %205, %211 : vector<1x8x64xf32>
    %213 = vector.extract_strided_slice %29 {offsets = [0, 22], sizes = [8, 1], strides = [1, 1]} : vector<8x36xf32> to vector<8x1xf32>
    %214 = vector.shape_cast %213 : vector<8x1xf32> to vector<1x8x1xf32>
    %215 = vector.extract_strided_slice %198 {offsets = [0, 2, 0], sizes = [1, 1, 64], strides = [1, 1, 1]} : vector<1x4x64xf32> to vector<1x1x64xf32>
    %216 = vector.broadcast %214 : vector<1x8x1xf32> to vector<1x8x64xf32>
    %217 = vector.broadcast %215 : vector<1x1x64xf32> to vector<1x8x64xf32>
    %218 = arith.mulf %216, %217 : vector<1x8x64xf32>
    %219 = arith.addf %212, %218 : vector<1x8x64xf32>
    %220 = vector.extract_strided_slice %29 {offsets = [0, 23], sizes = [8, 1], strides = [1, 1]} : vector<8x36xf32> to vector<8x1xf32>
    %221 = vector.shape_cast %220 : vector<8x1xf32> to vector<1x8x1xf32>
    %222 = vector.extract_strided_slice %198 {offsets = [0, 3, 0], sizes = [1, 1, 64], strides = [1, 1, 1]} : vector<1x4x64xf32> to vector<1x1x64xf32>
    %223 = vector.broadcast %221 : vector<1x8x1xf32> to vector<1x8x64xf32>
    %224 = vector.broadcast %222 : vector<1x1x64xf32> to vector<1x8x64xf32>
    %225 = arith.mulf %223, %224 : vector<1x8x64xf32>
    %226 = arith.addf %219, %225 : vector<1x8x64xf32>
    %227 = vector.extract_strided_slice %3 {offsets = [0, 0, 7], sizes = [1, 4, 57], strides = [1, 1, 1]} : vector<1x4x64xf32> to vector<1x4x57xf32>
    %228 = vector.extract_strided_slice %3 {offsets = [0, 0, 0], sizes = [1, 4, 7], strides = [1, 1, 1]} : vector<1x4x64xf32> to vector<1x4x7xf32>
    %229 = tpu.concatenate %227, %228 in 2 : vector<1x4x57xf32>, vector<1x4x7xf32> -> vector<1x4x64xf32>
    %230 = vector.broadcast %22 : vector<1x1x64xf32> to vector<1x4x64xf32>
    %231 = arith.mulf %229, %230 : vector<1x4x64xf32>
    %232 = vector.extract_strided_slice %29 {offsets = [0, 24], sizes = [8, 1], strides = [1, 1]} : vector<8x36xf32> to vector<8x1xf32>
    %233 = vector.shape_cast %232 : vector<8x1xf32> to vector<1x8x1xf32>
    %234 = vector.extract_strided_slice %231 {offsets = [0, 0, 0], sizes = [1, 1, 64], strides = [1, 1, 1]} : vector<1x4x64xf32> to vector<1x1x64xf32>
    %235 = vector.broadcast %233 : vector<1x8x1xf32> to vector<1x8x64xf32>
    %236 = vector.broadcast %234 : vector<1x1x64xf32> to vector<1x8x64xf32>
    %237 = arith.mulf %235, %236 : vector<1x8x64xf32>
    %238 = arith.addf %226, %237 : vector<1x8x64xf32>
    %239 = vector.extract_strided_slice %29 {offsets = [0, 25], sizes = [8, 1], strides = [1, 1]} : vector<8x36xf32> to vector<8x1xf32>
    %240 = vector.shape_cast %239 : vector<8x1xf32> to vector<1x8x1xf32>
    %241 = vector.extract_strided_slice %231 {offsets = [0, 1, 0], sizes = [1, 1, 64], strides = [1, 1, 1]} : vector<1x4x64xf32> to vector<1x1x64xf32>
    %242 = vector.broadcast %240 : vector<1x8x1xf32> to vector<1x8x64xf32>
    %243 = vector.broadcast %241 : vector<1x1x64xf32> to vector<1x8x64xf32>
    %244 = arith.mulf %242, %243 : vector<1x8x64xf32>
    %245 = arith.addf %238, %244 : vector<1x8x64xf32>
    %246 = vector.extract_strided_slice %29 {offsets = [0, 26], sizes = [8, 1], strides = [1, 1]} : vector<8x36xf32> to vector<8x1xf32>
    %247 = vector.shape_cast %246 : vector<8x1xf32> to vector<1x8x1xf32>
    %248 = vector.extract_strided_slice %231 {offsets = [0, 2, 0], sizes = [1, 1, 64], strides = [1, 1, 1]} : vector<1x4x64xf32> to vector<1x1x64xf32>
    %249 = vector.broadcast %247 : vector<1x8x1xf32> to vector<1x8x64xf32>
    %250 = vector.broadcast %248 : vector<1x1x64xf32> to vector<1x8x64xf32>
    %251 = arith.mulf %249, %250 : vector<1x8x64xf32>
    %252 = arith.addf %245, %251 : vector<1x8x64xf32>
    %253 = vector.extract_strided_slice %29 {offsets = [0, 27], sizes = [8, 1], strides = [1, 1]} : vector<8x36xf32> to vector<8x1xf32>
    %254 = vector.shape_cast %253 : vector<8x1xf32> to vector<1x8x1xf32>
    %255 = vector.extract_strided_slice %231 {offsets = [0, 3, 0], sizes = [1, 1, 64], strides = [1, 1, 1]} : vector<1x4x64xf32> to vector<1x1x64xf32>
    %256 = vector.broadcast %254 : vector<1x8x1xf32> to vector<1x8x64xf32>
    %257 = vector.broadcast %255 : vector<1x1x64xf32> to vector<1x8x64xf32>
    %258 = arith.mulf %256, %257 : vector<1x8x64xf32>
    %259 = arith.addf %252, %258 : vector<1x8x64xf32>
    %260 = vector.extract_strided_slice %3 {offsets = [0, 0, 8], sizes = [1, 4, 56], strides = [1, 1, 1]} : vector<1x4x64xf32> to vector<1x4x56xf32>
    %261 = vector.extract_strided_slice %3 {offsets = [0, 0, 0], sizes = [1, 4, 8], strides = [1, 1, 1]} : vector<1x4x64xf32> to vector<1x4x8xf32>
    %262 = tpu.concatenate %260, %261 in 2 : vector<1x4x56xf32>, vector<1x4x8xf32> -> vector<1x4x64xf32>
    %263 = vector.broadcast %25 : vector<1x1x64xf32> to vector<1x4x64xf32>
    %264 = arith.mulf %262, %263 : vector<1x4x64xf32>
    %265 = vector.extract_strided_slice %29 {offsets = [0, 28], sizes = [8, 1], strides = [1, 1]} : vector<8x36xf32> to vector<8x1xf32>
    %266 = vector.shape_cast %265 : vector<8x1xf32> to vector<1x8x1xf32>
    %267 = vector.extract_strided_slice %264 {offsets = [0, 0, 0], sizes = [1, 1, 64], strides = [1, 1, 1]} : vector<1x4x64xf32> to vector<1x1x64xf32>
    %268 = vector.broadcast %266 : vector<1x8x1xf32> to vector<1x8x64xf32>
    %269 = vector.broadcast %267 : vector<1x1x64xf32> to vector<1x8x64xf32>
    %270 = arith.mulf %268, %269 : vector<1x8x64xf32>
    %271 = arith.addf %259, %270 : vector<1x8x64xf32>
    %272 = vector.extract_strided_slice %29 {offsets = [0, 29], sizes = [8, 1], strides = [1, 1]} : vector<8x36xf32> to vector<8x1xf32>
    %273 = vector.shape_cast %272 : vector<8x1xf32> to vector<1x8x1xf32>
    %274 = vector.extract_strided_slice %264 {offsets = [0, 1, 0], sizes = [1, 1, 64], strides = [1, 1, 1]} : vector<1x4x64xf32> to vector<1x1x64xf32>
    %275 = vector.broadcast %273 : vector<1x8x1xf32> to vector<1x8x64xf32>
    %276 = vector.broadcast %274 : vector<1x1x64xf32> to vector<1x8x64xf32>
    %277 = arith.mulf %275, %276 : vector<1x8x64xf32>
    %278 = arith.addf %271, %277 : vector<1x8x64xf32>
    %279 = vector.extract_strided_slice %29 {offsets = [0, 30], sizes = [8, 1], strides = [1, 1]} : vector<8x36xf32> to vector<8x1xf32>
    %280 = vector.shape_cast %279 : vector<8x1xf32> to vector<1x8x1xf32>
    %281 = vector.extract_strided_slice %264 {offsets = [0, 2, 0], sizes = [1, 1, 64], strides = [1, 1, 1]} : vector<1x4x64xf32> to vector<1x1x64xf32>
    %282 = vector.broadcast %280 : vector<1x8x1xf32> to vector<1x8x64xf32>
    %283 = vector.broadcast %281 : vector<1x1x64xf32> to vector<1x8x64xf32>
    %284 = arith.mulf %282, %283 : vector<1x8x64xf32>
    %285 = arith.addf %278, %284 : vector<1x8x64xf32>
    %286 = vector.extract_strided_slice %29 {offsets = [0, 31], sizes = [8, 1], strides = [1, 1]} : vector<8x36xf32> to vector<8x1xf32>
    %287 = vector.shape_cast %286 : vector<8x1xf32> to vector<1x8x1xf32>
    %288 = vector.extract_strided_slice %264 {offsets = [0, 3, 0], sizes = [1, 1, 64], strides = [1, 1, 1]} : vector<1x4x64xf32> to vector<1x1x64xf32>
    %289 = vector.broadcast %287 : vector<1x8x1xf32> to vector<1x8x64xf32>
    %290 = vector.broadcast %288 : vector<1x1x64xf32> to vector<1x8x64xf32>
    %291 = arith.mulf %289, %290 : vector<1x8x64xf32>
    %292 = arith.addf %285, %291 : vector<1x8x64xf32>
    %293 = vector.extract_strided_slice %3 {offsets = [0, 0, 9], sizes = [1, 4, 55], strides = [1, 1, 1]} : vector<1x4x64xf32> to vector<1x4x55xf32>
    %294 = vector.extract_strided_slice %3 {offsets = [0, 0, 0], sizes = [1, 4, 9], strides = [1, 1, 1]} : vector<1x4x64xf32> to vector<1x4x9xf32>
    %295 = tpu.concatenate %293, %294 in 2 : vector<1x4x55xf32>, vector<1x4x9xf32> -> vector<1x4x64xf32>
    %296 = vector.broadcast %28 : vector<1x1x64xf32> to vector<1x4x64xf32>
    %297 = arith.mulf %295, %296 : vector<1x4x64xf32>
    %298 = vector.extract_strided_slice %29 {offsets = [0, 32], sizes = [8, 1], strides = [1, 1]} : vector<8x36xf32> to vector<8x1xf32>
    %299 = vector.shape_cast %298 : vector<8x1xf32> to vector<1x8x1xf32>
    %300 = vector.extract_strided_slice %297 {offsets = [0, 0, 0], sizes = [1, 1, 64], strides = [1, 1, 1]} : vector<1x4x64xf32> to vector<1x1x64xf32>
    %301 = vector.broadcast %299 : vector<1x8x1xf32> to vector<1x8x64xf32>
    %302 = vector.broadcast %300 : vector<1x1x64xf32> to vector<1x8x64xf32>
    %303 = arith.mulf %301, %302 : vector<1x8x64xf32>
    %304 = arith.addf %292, %303 : vector<1x8x64xf32>
    %305 = vector.extract_strided_slice %29 {offsets = [0, 33], sizes = [8, 1], strides = [1, 1]} : vector<8x36xf32> to vector<8x1xf32>
    %306 = vector.shape_cast %305 : vector<8x1xf32> to vector<1x8x1xf32>
    %307 = vector.extract_strided_slice %297 {offsets = [0, 1, 0], sizes = [1, 1, 64], strides = [1, 1, 1]} : vector<1x4x64xf32> to vector<1x1x64xf32>
    %308 = vector.broadcast %306 : vector<1x8x1xf32> to vector<1x8x64xf32>
    %309 = vector.broadcast %307 : vector<1x1x64xf32> to vector<1x8x64xf32>
    %310 = arith.mulf %308, %309 : vector<1x8x64xf32>
    %311 = arith.addf %304, %310 : vector<1x8x64xf32>
    %312 = vector.extract_strided_slice %29 {offsets = [0, 34], sizes = [8, 1], strides = [1, 1]} : vector<8x36xf32> to vector<8x1xf32>
    %313 = vector.shape_cast %312 : vector<8x1xf32> to vector<1x8x1xf32>
    %314 = vector.extract_strided_slice %297 {offsets = [0, 2, 0], sizes = [1, 1, 64], strides = [1, 1, 1]} : vector<1x4x64xf32> to vector<1x1x64xf32>
    %315 = vector.broadcast %313 : vector<1x8x1xf32> to vector<1x8x64xf32>
    %316 = vector.broadcast %314 : vector<1x1x64xf32> to vector<1x8x64xf32>
    %317 = arith.mulf %315, %316 : vector<1x8x64xf32>
    %318 = arith.addf %311, %317 : vector<1x8x64xf32>
    %319 = vector.extract_strided_slice %29 {offsets = [0, 35], sizes = [8, 1], strides = [1, 1]} : vector<8x36xf32> to vector<8x1xf32>
    %320 = vector.shape_cast %319 : vector<8x1xf32> to vector<1x8x1xf32>
    %321 = vector.extract_strided_slice %297 {offsets = [0, 3, 0], sizes = [1, 1, 64], strides = [1, 1, 1]} : vector<1x4x64xf32> to vector<1x1x64xf32>
    %322 = vector.broadcast %320 : vector<1x8x1xf32> to vector<1x8x64xf32>
    %323 = vector.broadcast %321 : vector<1x1x64xf32> to vector<1x8x64xf32>
    %324 = arith.mulf %322, %323 : vector<1x8x64xf32>
    %325 = arith.addf %318, %324 : vector<1x8x64xf32>
    %cst = arith.constant 0.000000e+00 : f32
    %326 = vector.broadcast %cst : f32 to vector<1x8x64xf32>
    %327 = arith.maximumf %325, %326 : vector<1x8x64xf32>
    %c0_11 = arith.constant 0 : index
    %c0_12 = arith.constant 0 : index
    %328 = vector.load %arg7[%c0_11, %c0_12] : memref<8x72xf32, #tpu.memory_space<vmem>>, vector<8x72xf32>
    %c0_13 = arith.constant 0 : index
    %c0_14 = arith.constant 0 : index
    %329 = vector.load %arg8[%c0_13, %c0_14] : memref<8x1xf32, #tpu.memory_space<vmem>>, vector<8x1xf32>
    %330 = vector.shape_cast %329 : vector<8x1xf32> to vector<1x8x1xf32>
    %331 = vector.shape_cast %330 : vector<1x8x1xf32> to vector<1x8x1xf32>
    %332 = vector.broadcast %331 : vector<1x8x1xf32> to vector<1x8x64xf32>
    %333 = vector.extract_strided_slice %327 {offsets = [0, 0, 55], sizes = [1, 8, 9], strides = [1, 1, 1]} : vector<1x8x64xf32> to vector<1x8x9xf32>
    %334 = vector.extract_strided_slice %327 {offsets = [0, 0, 0], sizes = [1, 8, 55], strides = [1, 1, 1]} : vector<1x8x64xf32> to vector<1x8x55xf32>
    %335 = tpu.concatenate %333, %334 in 2 : vector<1x8x9xf32>, vector<1x8x55xf32> -> vector<1x8x64xf32>
    %336 = vector.broadcast %7 : vector<1x1x64xf32> to vector<1x8x64xf32>
    %337 = arith.mulf %335, %336 : vector<1x8x64xf32>
    %338 = vector.extract_strided_slice %328 {offsets = [0, 0], sizes = [8, 1], strides = [1, 1]} : vector<8x72xf32> to vector<8x1xf32>
    %339 = vector.shape_cast %338 : vector<8x1xf32> to vector<1x8x1xf32>
    %340 = vector.extract_strided_slice %337 {offsets = [0, 0, 0], sizes = [1, 1, 64], strides = [1, 1, 1]} : vector<1x8x64xf32> to vector<1x1x64xf32>
    %341 = vector.broadcast %339 : vector<1x8x1xf32> to vector<1x8x64xf32>
    %342 = vector.broadcast %340 : vector<1x1x64xf32> to vector<1x8x64xf32>
    %343 = arith.mulf %341, %342 : vector<1x8x64xf32>
    %344 = arith.addf %332, %343 : vector<1x8x64xf32>
    %345 = vector.extract_strided_slice %328 {offsets = [0, 1], sizes = [8, 1], strides = [1, 1]} : vector<8x72xf32> to vector<8x1xf32>
    %346 = vector.shape_cast %345 : vector<8x1xf32> to vector<1x8x1xf32>
    %347 = vector.extract_strided_slice %337 {offsets = [0, 1, 0], sizes = [1, 1, 64], strides = [1, 1, 1]} : vector<1x8x64xf32> to vector<1x1x64xf32>
    %348 = vector.broadcast %346 : vector<1x8x1xf32> to vector<1x8x64xf32>
    %349 = vector.broadcast %347 : vector<1x1x64xf32> to vector<1x8x64xf32>
    %350 = arith.mulf %348, %349 : vector<1x8x64xf32>
    %351 = arith.addf %344, %350 : vector<1x8x64xf32>
    %352 = vector.extract_strided_slice %328 {offsets = [0, 2], sizes = [8, 1], strides = [1, 1]} : vector<8x72xf32> to vector<8x1xf32>
    %353 = vector.shape_cast %352 : vector<8x1xf32> to vector<1x8x1xf32>
    %354 = vector.extract_strided_slice %337 {offsets = [0, 2, 0], sizes = [1, 1, 64], strides = [1, 1, 1]} : vector<1x8x64xf32> to vector<1x1x64xf32>
    %355 = vector.broadcast %353 : vector<1x8x1xf32> to vector<1x8x64xf32>
    %356 = vector.broadcast %354 : vector<1x1x64xf32> to vector<1x8x64xf32>
    %357 = arith.mulf %355, %356 : vector<1x8x64xf32>
    %358 = arith.addf %351, %357 : vector<1x8x64xf32>
    %359 = vector.extract_strided_slice %328 {offsets = [0, 3], sizes = [8, 1], strides = [1, 1]} : vector<8x72xf32> to vector<8x1xf32>
    %360 = vector.shape_cast %359 : vector<8x1xf32> to vector<1x8x1xf32>
    %361 = vector.extract_strided_slice %337 {offsets = [0, 3, 0], sizes = [1, 1, 64], strides = [1, 1, 1]} : vector<1x8x64xf32> to vector<1x1x64xf32>
    %362 = vector.broadcast %360 : vector<1x8x1xf32> to vector<1x8x64xf32>
    %363 = vector.broadcast %361 : vector<1x1x64xf32> to vector<1x8x64xf32>
    %364 = arith.mulf %362, %363 : vector<1x8x64xf32>
    %365 = arith.addf %358, %364 : vector<1x8x64xf32>
    %366 = vector.extract_strided_slice %328 {offsets = [0, 4], sizes = [8, 1], strides = [1, 1]} : vector<8x72xf32> to vector<8x1xf32>
    %367 = vector.shape_cast %366 : vector<8x1xf32> to vector<1x8x1xf32>
    %368 = vector.extract_strided_slice %337 {offsets = [0, 4, 0], sizes = [1, 1, 64], strides = [1, 1, 1]} : vector<1x8x64xf32> to vector<1x1x64xf32>
    %369 = vector.broadcast %367 : vector<1x8x1xf32> to vector<1x8x64xf32>
    %370 = vector.broadcast %368 : vector<1x1x64xf32> to vector<1x8x64xf32>
    %371 = arith.mulf %369, %370 : vector<1x8x64xf32>
    %372 = arith.addf %365, %371 : vector<1x8x64xf32>
    %373 = vector.extract_strided_slice %328 {offsets = [0, 5], sizes = [8, 1], strides = [1, 1]} : vector<8x72xf32> to vector<8x1xf32>
    %374 = vector.shape_cast %373 : vector<8x1xf32> to vector<1x8x1xf32>
    %375 = vector.extract_strided_slice %337 {offsets = [0, 5, 0], sizes = [1, 1, 64], strides = [1, 1, 1]} : vector<1x8x64xf32> to vector<1x1x64xf32>
    %376 = vector.broadcast %374 : vector<1x8x1xf32> to vector<1x8x64xf32>
    %377 = vector.broadcast %375 : vector<1x1x64xf32> to vector<1x8x64xf32>
    %378 = arith.mulf %376, %377 : vector<1x8x64xf32>
    %379 = arith.addf %372, %378 : vector<1x8x64xf32>
    %380 = vector.extract_strided_slice %328 {offsets = [0, 6], sizes = [8, 1], strides = [1, 1]} : vector<8x72xf32> to vector<8x1xf32>
    %381 = vector.shape_cast %380 : vector<8x1xf32> to vector<1x8x1xf32>
    %382 = vector.extract_strided_slice %337 {offsets = [0, 6, 0], sizes = [1, 1, 64], strides = [1, 1, 1]} : vector<1x8x64xf32> to vector<1x1x64xf32>
    %383 = vector.broadcast %381 : vector<1x8x1xf32> to vector<1x8x64xf32>
    %384 = vector.broadcast %382 : vector<1x1x64xf32> to vector<1x8x64xf32>
    %385 = arith.mulf %383, %384 : vector<1x8x64xf32>
    %386 = arith.addf %379, %385 : vector<1x8x64xf32>
    %387 = vector.extract_strided_slice %328 {offsets = [0, 7], sizes = [8, 1], strides = [1, 1]} : vector<8x72xf32> to vector<8x1xf32>
    %388 = vector.shape_cast %387 : vector<8x1xf32> to vector<1x8x1xf32>
    %389 = vector.extract_strided_slice %337 {offsets = [0, 7, 0], sizes = [1, 1, 64], strides = [1, 1, 1]} : vector<1x8x64xf32> to vector<1x1x64xf32>
    %390 = vector.broadcast %388 : vector<1x8x1xf32> to vector<1x8x64xf32>
    %391 = vector.broadcast %389 : vector<1x1x64xf32> to vector<1x8x64xf32>
    %392 = arith.mulf %390, %391 : vector<1x8x64xf32>
    %393 = arith.addf %386, %392 : vector<1x8x64xf32>
    %394 = vector.extract_strided_slice %327 {offsets = [0, 0, 56], sizes = [1, 8, 8], strides = [1, 1, 1]} : vector<1x8x64xf32> to vector<1x8x8xf32>
    %395 = vector.extract_strided_slice %327 {offsets = [0, 0, 0], sizes = [1, 8, 56], strides = [1, 1, 1]} : vector<1x8x64xf32> to vector<1x8x56xf32>
    %396 = tpu.concatenate %394, %395 in 2 : vector<1x8x8xf32>, vector<1x8x56xf32> -> vector<1x8x64xf32>
    %397 = vector.broadcast %10 : vector<1x1x64xf32> to vector<1x8x64xf32>
    %398 = arith.mulf %396, %397 : vector<1x8x64xf32>
    %399 = vector.extract_strided_slice %328 {offsets = [0, 8], sizes = [8, 1], strides = [1, 1]} : vector<8x72xf32> to vector<8x1xf32>
    %400 = vector.shape_cast %399 : vector<8x1xf32> to vector<1x8x1xf32>
    %401 = vector.extract_strided_slice %398 {offsets = [0, 0, 0], sizes = [1, 1, 64], strides = [1, 1, 1]} : vector<1x8x64xf32> to vector<1x1x64xf32>
    %402 = vector.broadcast %400 : vector<1x8x1xf32> to vector<1x8x64xf32>
    %403 = vector.broadcast %401 : vector<1x1x64xf32> to vector<1x8x64xf32>
    %404 = arith.mulf %402, %403 : vector<1x8x64xf32>
    %405 = arith.addf %393, %404 : vector<1x8x64xf32>
    %406 = vector.extract_strided_slice %328 {offsets = [0, 9], sizes = [8, 1], strides = [1, 1]} : vector<8x72xf32> to vector<8x1xf32>
    %407 = vector.shape_cast %406 : vector<8x1xf32> to vector<1x8x1xf32>
    %408 = vector.extract_strided_slice %398 {offsets = [0, 1, 0], sizes = [1, 1, 64], strides = [1, 1, 1]} : vector<1x8x64xf32> to vector<1x1x64xf32>
    %409 = vector.broadcast %407 : vector<1x8x1xf32> to vector<1x8x64xf32>
    %410 = vector.broadcast %408 : vector<1x1x64xf32> to vector<1x8x64xf32>
    %411 = arith.mulf %409, %410 : vector<1x8x64xf32>
    %412 = arith.addf %405, %411 : vector<1x8x64xf32>
    %413 = vector.extract_strided_slice %328 {offsets = [0, 10], sizes = [8, 1], strides = [1, 1]} : vector<8x72xf32> to vector<8x1xf32>
    %414 = vector.shape_cast %413 : vector<8x1xf32> to vector<1x8x1xf32>
    %415 = vector.extract_strided_slice %398 {offsets = [0, 2, 0], sizes = [1, 1, 64], strides = [1, 1, 1]} : vector<1x8x64xf32> to vector<1x1x64xf32>
    %416 = vector.broadcast %414 : vector<1x8x1xf32> to vector<1x8x64xf32>
    %417 = vector.broadcast %415 : vector<1x1x64xf32> to vector<1x8x64xf32>
    %418 = arith.mulf %416, %417 : vector<1x8x64xf32>
    %419 = arith.addf %412, %418 : vector<1x8x64xf32>
    %420 = vector.extract_strided_slice %328 {offsets = [0, 11], sizes = [8, 1], strides = [1, 1]} : vector<8x72xf32> to vector<8x1xf32>
    %421 = vector.shape_cast %420 : vector<8x1xf32> to vector<1x8x1xf32>
    %422 = vector.extract_strided_slice %398 {offsets = [0, 3, 0], sizes = [1, 1, 64], strides = [1, 1, 1]} : vector<1x8x64xf32> to vector<1x1x64xf32>
    %423 = vector.broadcast %421 : vector<1x8x1xf32> to vector<1x8x64xf32>
    %424 = vector.broadcast %422 : vector<1x1x64xf32> to vector<1x8x64xf32>
    %425 = arith.mulf %423, %424 : vector<1x8x64xf32>
    %426 = arith.addf %419, %425 : vector<1x8x64xf32>
    %427 = vector.extract_strided_slice %328 {offsets = [0, 12], sizes = [8, 1], strides = [1, 1]} : vector<8x72xf32> to vector<8x1xf32>
    %428 = vector.shape_cast %427 : vector<8x1xf32> to vector<1x8x1xf32>
    %429 = vector.extract_strided_slice %398 {offsets = [0, 4, 0], sizes = [1, 1, 64], strides = [1, 1, 1]} : vector<1x8x64xf32> to vector<1x1x64xf32>
    %430 = vector.broadcast %428 : vector<1x8x1xf32> to vector<1x8x64xf32>
    %431 = vector.broadcast %429 : vector<1x1x64xf32> to vector<1x8x64xf32>
    %432 = arith.mulf %430, %431 : vector<1x8x64xf32>
    %433 = arith.addf %426, %432 : vector<1x8x64xf32>
    %434 = vector.extract_strided_slice %328 {offsets = [0, 13], sizes = [8, 1], strides = [1, 1]} : vector<8x72xf32> to vector<8x1xf32>
    %435 = vector.shape_cast %434 : vector<8x1xf32> to vector<1x8x1xf32>
    %436 = vector.extract_strided_slice %398 {offsets = [0, 5, 0], sizes = [1, 1, 64], strides = [1, 1, 1]} : vector<1x8x64xf32> to vector<1x1x64xf32>
    %437 = vector.broadcast %435 : vector<1x8x1xf32> to vector<1x8x64xf32>
    %438 = vector.broadcast %436 : vector<1x1x64xf32> to vector<1x8x64xf32>
    %439 = arith.mulf %437, %438 : vector<1x8x64xf32>
    %440 = arith.addf %433, %439 : vector<1x8x64xf32>
    %441 = vector.extract_strided_slice %328 {offsets = [0, 14], sizes = [8, 1], strides = [1, 1]} : vector<8x72xf32> to vector<8x1xf32>
    %442 = vector.shape_cast %441 : vector<8x1xf32> to vector<1x8x1xf32>
    %443 = vector.extract_strided_slice %398 {offsets = [0, 6, 0], sizes = [1, 1, 64], strides = [1, 1, 1]} : vector<1x8x64xf32> to vector<1x1x64xf32>
    %444 = vector.broadcast %442 : vector<1x8x1xf32> to vector<1x8x64xf32>
    %445 = vector.broadcast %443 : vector<1x1x64xf32> to vector<1x8x64xf32>
    %446 = arith.mulf %444, %445 : vector<1x8x64xf32>
    %447 = arith.addf %440, %446 : vector<1x8x64xf32>
    %448 = vector.extract_strided_slice %328 {offsets = [0, 15], sizes = [8, 1], strides = [1, 1]} : vector<8x72xf32> to vector<8x1xf32>
    %449 = vector.shape_cast %448 : vector<8x1xf32> to vector<1x8x1xf32>
    %450 = vector.extract_strided_slice %398 {offsets = [0, 7, 0], sizes = [1, 1, 64], strides = [1, 1, 1]} : vector<1x8x64xf32> to vector<1x1x64xf32>
    %451 = vector.broadcast %449 : vector<1x8x1xf32> to vector<1x8x64xf32>
    %452 = vector.broadcast %450 : vector<1x1x64xf32> to vector<1x8x64xf32>
    %453 = arith.mulf %451, %452 : vector<1x8x64xf32>
    %454 = arith.addf %447, %453 : vector<1x8x64xf32>
    %455 = vector.extract_strided_slice %327 {offsets = [0, 0, 57], sizes = [1, 8, 7], strides = [1, 1, 1]} : vector<1x8x64xf32> to vector<1x8x7xf32>
    %456 = vector.extract_strided_slice %327 {offsets = [0, 0, 0], sizes = [1, 8, 57], strides = [1, 1, 1]} : vector<1x8x64xf32> to vector<1x8x57xf32>
    %457 = tpu.concatenate %455, %456 in 2 : vector<1x8x7xf32>, vector<1x8x57xf32> -> vector<1x8x64xf32>
    %458 = vector.broadcast %13 : vector<1x1x64xf32> to vector<1x8x64xf32>
    %459 = arith.mulf %457, %458 : vector<1x8x64xf32>
    %460 = vector.extract_strided_slice %328 {offsets = [0, 16], sizes = [8, 1], strides = [1, 1]} : vector<8x72xf32> to vector<8x1xf32>
    %461 = vector.shape_cast %460 : vector<8x1xf32> to vector<1x8x1xf32>
    %462 = vector.extract_strided_slice %459 {offsets = [0, 0, 0], sizes = [1, 1, 64], strides = [1, 1, 1]} : vector<1x8x64xf32> to vector<1x1x64xf32>
    %463 = vector.broadcast %461 : vector<1x8x1xf32> to vector<1x8x64xf32>
    %464 = vector.broadcast %462 : vector<1x1x64xf32> to vector<1x8x64xf32>
    %465 = arith.mulf %463, %464 : vector<1x8x64xf32>
    %466 = arith.addf %454, %465 : vector<1x8x64xf32>
    %467 = vector.extract_strided_slice %328 {offsets = [0, 17], sizes = [8, 1], strides = [1, 1]} : vector<8x72xf32> to vector<8x1xf32>
    %468 = vector.shape_cast %467 : vector<8x1xf32> to vector<1x8x1xf32>
    %469 = vector.extract_strided_slice %459 {offsets = [0, 1, 0], sizes = [1, 1, 64], strides = [1, 1, 1]} : vector<1x8x64xf32> to vector<1x1x64xf32>
    %470 = vector.broadcast %468 : vector<1x8x1xf32> to vector<1x8x64xf32>
    %471 = vector.broadcast %469 : vector<1x1x64xf32> to vector<1x8x64xf32>
    %472 = arith.mulf %470, %471 : vector<1x8x64xf32>
    %473 = arith.addf %466, %472 : vector<1x8x64xf32>
    %474 = vector.extract_strided_slice %328 {offsets = [0, 18], sizes = [8, 1], strides = [1, 1]} : vector<8x72xf32> to vector<8x1xf32>
    %475 = vector.shape_cast %474 : vector<8x1xf32> to vector<1x8x1xf32>
    %476 = vector.extract_strided_slice %459 {offsets = [0, 2, 0], sizes = [1, 1, 64], strides = [1, 1, 1]} : vector<1x8x64xf32> to vector<1x1x64xf32>
    %477 = vector.broadcast %475 : vector<1x8x1xf32> to vector<1x8x64xf32>
    %478 = vector.broadcast %476 : vector<1x1x64xf32> to vector<1x8x64xf32>
    %479 = arith.mulf %477, %478 : vector<1x8x64xf32>
    %480 = arith.addf %473, %479 : vector<1x8x64xf32>
    %481 = vector.extract_strided_slice %328 {offsets = [0, 19], sizes = [8, 1], strides = [1, 1]} : vector<8x72xf32> to vector<8x1xf32>
    %482 = vector.shape_cast %481 : vector<8x1xf32> to vector<1x8x1xf32>
    %483 = vector.extract_strided_slice %459 {offsets = [0, 3, 0], sizes = [1, 1, 64], strides = [1, 1, 1]} : vector<1x8x64xf32> to vector<1x1x64xf32>
    %484 = vector.broadcast %482 : vector<1x8x1xf32> to vector<1x8x64xf32>
    %485 = vector.broadcast %483 : vector<1x1x64xf32> to vector<1x8x64xf32>
    %486 = arith.mulf %484, %485 : vector<1x8x64xf32>
    %487 = arith.addf %480, %486 : vector<1x8x64xf32>
    %488 = vector.extract_strided_slice %328 {offsets = [0, 20], sizes = [8, 1], strides = [1, 1]} : vector<8x72xf32> to vector<8x1xf32>
    %489 = vector.shape_cast %488 : vector<8x1xf32> to vector<1x8x1xf32>
    %490 = vector.extract_strided_slice %459 {offsets = [0, 4, 0], sizes = [1, 1, 64], strides = [1, 1, 1]} : vector<1x8x64xf32> to vector<1x1x64xf32>
    %491 = vector.broadcast %489 : vector<1x8x1xf32> to vector<1x8x64xf32>
    %492 = vector.broadcast %490 : vector<1x1x64xf32> to vector<1x8x64xf32>
    %493 = arith.mulf %491, %492 : vector<1x8x64xf32>
    %494 = arith.addf %487, %493 : vector<1x8x64xf32>
    %495 = vector.extract_strided_slice %328 {offsets = [0, 21], sizes = [8, 1], strides = [1, 1]} : vector<8x72xf32> to vector<8x1xf32>
    %496 = vector.shape_cast %495 : vector<8x1xf32> to vector<1x8x1xf32>
    %497 = vector.extract_strided_slice %459 {offsets = [0, 5, 0], sizes = [1, 1, 64], strides = [1, 1, 1]} : vector<1x8x64xf32> to vector<1x1x64xf32>
    %498 = vector.broadcast %496 : vector<1x8x1xf32> to vector<1x8x64xf32>
    %499 = vector.broadcast %497 : vector<1x1x64xf32> to vector<1x8x64xf32>
    %500 = arith.mulf %498, %499 : vector<1x8x64xf32>
    %501 = arith.addf %494, %500 : vector<1x8x64xf32>
    %502 = vector.extract_strided_slice %328 {offsets = [0, 22], sizes = [8, 1], strides = [1, 1]} : vector<8x72xf32> to vector<8x1xf32>
    %503 = vector.shape_cast %502 : vector<8x1xf32> to vector<1x8x1xf32>
    %504 = vector.extract_strided_slice %459 {offsets = [0, 6, 0], sizes = [1, 1, 64], strides = [1, 1, 1]} : vector<1x8x64xf32> to vector<1x1x64xf32>
    %505 = vector.broadcast %503 : vector<1x8x1xf32> to vector<1x8x64xf32>
    %506 = vector.broadcast %504 : vector<1x1x64xf32> to vector<1x8x64xf32>
    %507 = arith.mulf %505, %506 : vector<1x8x64xf32>
    %508 = arith.addf %501, %507 : vector<1x8x64xf32>
    %509 = vector.extract_strided_slice %328 {offsets = [0, 23], sizes = [8, 1], strides = [1, 1]} : vector<8x72xf32> to vector<8x1xf32>
    %510 = vector.shape_cast %509 : vector<8x1xf32> to vector<1x8x1xf32>
    %511 = vector.extract_strided_slice %459 {offsets = [0, 7, 0], sizes = [1, 1, 64], strides = [1, 1, 1]} : vector<1x8x64xf32> to vector<1x1x64xf32>
    %512 = vector.broadcast %510 : vector<1x8x1xf32> to vector<1x8x64xf32>
    %513 = vector.broadcast %511 : vector<1x1x64xf32> to vector<1x8x64xf32>
    %514 = arith.mulf %512, %513 : vector<1x8x64xf32>
    %515 = arith.addf %508, %514 : vector<1x8x64xf32>
    %516 = vector.extract_strided_slice %327 {offsets = [0, 0, 63], sizes = [1, 8, 1], strides = [1, 1, 1]} : vector<1x8x64xf32> to vector<1x8x1xf32>
    %517 = vector.extract_strided_slice %327 {offsets = [0, 0, 0], sizes = [1, 8, 63], strides = [1, 1, 1]} : vector<1x8x64xf32> to vector<1x8x63xf32>
    %518 = tpu.concatenate %516, %517 in 2 : vector<1x8x1xf32>, vector<1x8x63xf32> -> vector<1x8x64xf32>
    %519 = vector.broadcast %16 : vector<1x1x64xf32> to vector<1x8x64xf32>
    %520 = arith.mulf %518, %519 : vector<1x8x64xf32>
    %521 = vector.extract_strided_slice %328 {offsets = [0, 24], sizes = [8, 1], strides = [1, 1]} : vector<8x72xf32> to vector<8x1xf32>
    %522 = vector.shape_cast %521 : vector<8x1xf32> to vector<1x8x1xf32>
    %523 = vector.extract_strided_slice %520 {offsets = [0, 0, 0], sizes = [1, 1, 64], strides = [1, 1, 1]} : vector<1x8x64xf32> to vector<1x1x64xf32>
    %524 = vector.broadcast %522 : vector<1x8x1xf32> to vector<1x8x64xf32>
    %525 = vector.broadcast %523 : vector<1x1x64xf32> to vector<1x8x64xf32>
    %526 = arith.mulf %524, %525 : vector<1x8x64xf32>
    %527 = arith.addf %515, %526 : vector<1x8x64xf32>
    %528 = vector.extract_strided_slice %328 {offsets = [0, 25], sizes = [8, 1], strides = [1, 1]} : vector<8x72xf32> to vector<8x1xf32>
    %529 = vector.shape_cast %528 : vector<8x1xf32> to vector<1x8x1xf32>
    %530 = vector.extract_strided_slice %520 {offsets = [0, 1, 0], sizes = [1, 1, 64], strides = [1, 1, 1]} : vector<1x8x64xf32> to vector<1x1x64xf32>
    %531 = vector.broadcast %529 : vector<1x8x1xf32> to vector<1x8x64xf32>
    %532 = vector.broadcast %530 : vector<1x1x64xf32> to vector<1x8x64xf32>
    %533 = arith.mulf %531, %532 : vector<1x8x64xf32>
    %534 = arith.addf %527, %533 : vector<1x8x64xf32>
    %535 = vector.extract_strided_slice %328 {offsets = [0, 26], sizes = [8, 1], strides = [1, 1]} : vector<8x72xf32> to vector<8x1xf32>
    %536 = vector.shape_cast %535 : vector<8x1xf32> to vector<1x8x1xf32>
    %537 = vector.extract_strided_slice %520 {offsets = [0, 2, 0], sizes = [1, 1, 64], strides = [1, 1, 1]} : vector<1x8x64xf32> to vector<1x1x64xf32>
    %538 = vector.broadcast %536 : vector<1x8x1xf32> to vector<1x8x64xf32>
    %539 = vector.broadcast %537 : vector<1x1x64xf32> to vector<1x8x64xf32>
    %540 = arith.mulf %538, %539 : vector<1x8x64xf32>
    %541 = arith.addf %534, %540 : vector<1x8x64xf32>
    %542 = vector.extract_strided_slice %328 {offsets = [0, 27], sizes = [8, 1], strides = [1, 1]} : vector<8x72xf32> to vector<8x1xf32>
    %543 = vector.shape_cast %542 : vector<8x1xf32> to vector<1x8x1xf32>
    %544 = vector.extract_strided_slice %520 {offsets = [0, 3, 0], sizes = [1, 1, 64], strides = [1, 1, 1]} : vector<1x8x64xf32> to vector<1x1x64xf32>
    %545 = vector.broadcast %543 : vector<1x8x1xf32> to vector<1x8x64xf32>
    %546 = vector.broadcast %544 : vector<1x1x64xf32> to vector<1x8x64xf32>
    %547 = arith.mulf %545, %546 : vector<1x8x64xf32>
    %548 = arith.addf %541, %547 : vector<1x8x64xf32>
    %549 = vector.extract_strided_slice %328 {offsets = [0, 28], sizes = [8, 1], strides = [1, 1]} : vector<8x72xf32> to vector<8x1xf32>
    %550 = vector.shape_cast %549 : vector<8x1xf32> to vector<1x8x1xf32>
    %551 = vector.extract_strided_slice %520 {offsets = [0, 4, 0], sizes = [1, 1, 64], strides = [1, 1, 1]} : vector<1x8x64xf32> to vector<1x1x64xf32>
    %552 = vector.broadcast %550 : vector<1x8x1xf32> to vector<1x8x64xf32>
    %553 = vector.broadcast %551 : vector<1x1x64xf32> to vector<1x8x64xf32>
    %554 = arith.mulf %552, %553 : vector<1x8x64xf32>
    %555 = arith.addf %548, %554 : vector<1x8x64xf32>
    %556 = vector.extract_strided_slice %328 {offsets = [0, 29], sizes = [8, 1], strides = [1, 1]} : vector<8x72xf32> to vector<8x1xf32>
    %557 = vector.shape_cast %556 : vector<8x1xf32> to vector<1x8x1xf32>
    %558 = vector.extract_strided_slice %520 {offsets = [0, 5, 0], sizes = [1, 1, 64], strides = [1, 1, 1]} : vector<1x8x64xf32> to vector<1x1x64xf32>
    %559 = vector.broadcast %557 : vector<1x8x1xf32> to vector<1x8x64xf32>
    %560 = vector.broadcast %558 : vector<1x1x64xf32> to vector<1x8x64xf32>
    %561 = arith.mulf %559, %560 : vector<1x8x64xf32>
    %562 = arith.addf %555, %561 : vector<1x8x64xf32>
    %563 = vector.extract_strided_slice %328 {offsets = [0, 30], sizes = [8, 1], strides = [1, 1]} : vector<8x72xf32> to vector<8x1xf32>
    %564 = vector.shape_cast %563 : vector<8x1xf32> to vector<1x8x1xf32>
    %565 = vector.extract_strided_slice %520 {offsets = [0, 6, 0], sizes = [1, 1, 64], strides = [1, 1, 1]} : vector<1x8x64xf32> to vector<1x1x64xf32>
    %566 = vector.broadcast %564 : vector<1x8x1xf32> to vector<1x8x64xf32>
    %567 = vector.broadcast %565 : vector<1x1x64xf32> to vector<1x8x64xf32>
    %568 = arith.mulf %566, %567 : vector<1x8x64xf32>
    %569 = arith.addf %562, %568 : vector<1x8x64xf32>
    %570 = vector.extract_strided_slice %328 {offsets = [0, 31], sizes = [8, 1], strides = [1, 1]} : vector<8x72xf32> to vector<8x1xf32>
    %571 = vector.shape_cast %570 : vector<8x1xf32> to vector<1x8x1xf32>
    %572 = vector.extract_strided_slice %520 {offsets = [0, 7, 0], sizes = [1, 1, 64], strides = [1, 1, 1]} : vector<1x8x64xf32> to vector<1x1x64xf32>
    %573 = vector.broadcast %571 : vector<1x8x1xf32> to vector<1x8x64xf32>
    %574 = vector.broadcast %572 : vector<1x1x64xf32> to vector<1x8x64xf32>
    %575 = arith.mulf %573, %574 : vector<1x8x64xf32>
    %576 = arith.addf %569, %575 : vector<1x8x64xf32>
    %577 = vector.extract_strided_slice %328 {offsets = [0, 32], sizes = [8, 1], strides = [1, 1]} : vector<8x72xf32> to vector<8x1xf32>
    %578 = vector.shape_cast %577 : vector<8x1xf32> to vector<1x8x1xf32>
    %579 = vector.extract_strided_slice %327 {offsets = [0, 0, 0], sizes = [1, 1, 64], strides = [1, 1, 1]} : vector<1x8x64xf32> to vector<1x1x64xf32>
    %580 = vector.broadcast %578 : vector<1x8x1xf32> to vector<1x8x64xf32>
    %581 = vector.broadcast %579 : vector<1x1x64xf32> to vector<1x8x64xf32>
    %582 = arith.mulf %580, %581 : vector<1x8x64xf32>
    %583 = arith.addf %576, %582 : vector<1x8x64xf32>
    %584 = vector.extract_strided_slice %328 {offsets = [0, 33], sizes = [8, 1], strides = [1, 1]} : vector<8x72xf32> to vector<8x1xf32>
    %585 = vector.shape_cast %584 : vector<8x1xf32> to vector<1x8x1xf32>
    %586 = vector.extract_strided_slice %327 {offsets = [0, 1, 0], sizes = [1, 1, 64], strides = [1, 1, 1]} : vector<1x8x64xf32> to vector<1x1x64xf32>
    %587 = vector.broadcast %585 : vector<1x8x1xf32> to vector<1x8x64xf32>
    %588 = vector.broadcast %586 : vector<1x1x64xf32> to vector<1x8x64xf32>
    %589 = arith.mulf %587, %588 : vector<1x8x64xf32>
    %590 = arith.addf %583, %589 : vector<1x8x64xf32>
    %591 = vector.extract_strided_slice %328 {offsets = [0, 34], sizes = [8, 1], strides = [1, 1]} : vector<8x72xf32> to vector<8x1xf32>
    %592 = vector.shape_cast %591 : vector<8x1xf32> to vector<1x8x1xf32>
    %593 = vector.extract_strided_slice %327 {offsets = [0, 2, 0], sizes = [1, 1, 64], strides = [1, 1, 1]} : vector<1x8x64xf32> to vector<1x1x64xf32>
    %594 = vector.broadcast %592 : vector<1x8x1xf32> to vector<1x8x64xf32>
    %595 = vector.broadcast %593 : vector<1x1x64xf32> to vector<1x8x64xf32>
    %596 = arith.mulf %594, %595 : vector<1x8x64xf32>
    %597 = arith.addf %590, %596 : vector<1x8x64xf32>
    %598 = vector.extract_strided_slice %328 {offsets = [0, 35], sizes = [8, 1], strides = [1, 1]} : vector<8x72xf32> to vector<8x1xf32>
    %599 = vector.shape_cast %598 : vector<8x1xf32> to vector<1x8x1xf32>
    %600 = vector.extract_strided_slice %327 {offsets = [0, 3, 0], sizes = [1, 1, 64], strides = [1, 1, 1]} : vector<1x8x64xf32> to vector<1x1x64xf32>
    %601 = vector.broadcast %599 : vector<1x8x1xf32> to vector<1x8x64xf32>
    %602 = vector.broadcast %600 : vector<1x1x64xf32> to vector<1x8x64xf32>
    %603 = arith.mulf %601, %602 : vector<1x8x64xf32>
    %604 = arith.addf %597, %603 : vector<1x8x64xf32>
    %605 = vector.extract_strided_slice %328 {offsets = [0, 36], sizes = [8, 1], strides = [1, 1]} : vector<8x72xf32> to vector<8x1xf32>
    %606 = vector.shape_cast %605 : vector<8x1xf32> to vector<1x8x1xf32>
    %607 = vector.extract_strided_slice %327 {offsets = [0, 4, 0], sizes = [1, 1, 64], strides = [1, 1, 1]} : vector<1x8x64xf32> to vector<1x1x64xf32>
    %608 = vector.broadcast %606 : vector<1x8x1xf32> to vector<1x8x64xf32>
    %609 = vector.broadcast %607 : vector<1x1x64xf32> to vector<1x8x64xf32>
    %610 = arith.mulf %608, %609 : vector<1x8x64xf32>
    %611 = arith.addf %604, %610 : vector<1x8x64xf32>
    %612 = vector.extract_strided_slice %328 {offsets = [0, 37], sizes = [8, 1], strides = [1, 1]} : vector<8x72xf32> to vector<8x1xf32>
    %613 = vector.shape_cast %612 : vector<8x1xf32> to vector<1x8x1xf32>
    %614 = vector.extract_strided_slice %327 {offsets = [0, 5, 0], sizes = [1, 1, 64], strides = [1, 1, 1]} : vector<1x8x64xf32> to vector<1x1x64xf32>
    %615 = vector.broadcast %613 : vector<1x8x1xf32> to vector<1x8x64xf32>
    %616 = vector.broadcast %614 : vector<1x1x64xf32> to vector<1x8x64xf32>
    %617 = arith.mulf %615, %616 : vector<1x8x64xf32>
    %618 = arith.addf %611, %617 : vector<1x8x64xf32>
    %619 = vector.extract_strided_slice %328 {offsets = [0, 38], sizes = [8, 1], strides = [1, 1]} : vector<8x72xf32> to vector<8x1xf32>
    %620 = vector.shape_cast %619 : vector<8x1xf32> to vector<1x8x1xf32>
    %621 = vector.extract_strided_slice %327 {offsets = [0, 6, 0], sizes = [1, 1, 64], strides = [1, 1, 1]} : vector<1x8x64xf32> to vector<1x1x64xf32>
    %622 = vector.broadcast %620 : vector<1x8x1xf32> to vector<1x8x64xf32>
    %623 = vector.broadcast %621 : vector<1x1x64xf32> to vector<1x8x64xf32>
    %624 = arith.mulf %622, %623 : vector<1x8x64xf32>
    %625 = arith.addf %618, %624 : vector<1x8x64xf32>
    %626 = vector.extract_strided_slice %328 {offsets = [0, 39], sizes = [8, 1], strides = [1, 1]} : vector<8x72xf32> to vector<8x1xf32>
    %627 = vector.shape_cast %626 : vector<8x1xf32> to vector<1x8x1xf32>
    %628 = vector.extract_strided_slice %327 {offsets = [0, 7, 0], sizes = [1, 1, 64], strides = [1, 1, 1]} : vector<1x8x64xf32> to vector<1x1x64xf32>
    %629 = vector.broadcast %627 : vector<1x8x1xf32> to vector<1x8x64xf32>
    %630 = vector.broadcast %628 : vector<1x1x64xf32> to vector<1x8x64xf32>
    %631 = arith.mulf %629, %630 : vector<1x8x64xf32>
    %632 = arith.addf %625, %631 : vector<1x8x64xf32>
    %633 = vector.extract_strided_slice %327 {offsets = [0, 0, 1], sizes = [1, 8, 63], strides = [1, 1, 1]} : vector<1x8x64xf32> to vector<1x8x63xf32>
    %634 = vector.extract_strided_slice %327 {offsets = [0, 0, 0], sizes = [1, 8, 1], strides = [1, 1, 1]} : vector<1x8x64xf32> to vector<1x8x1xf32>
    %635 = tpu.concatenate %633, %634 in 2 : vector<1x8x63xf32>, vector<1x8x1xf32> -> vector<1x8x64xf32>
    %636 = vector.broadcast %19 : vector<1x1x64xf32> to vector<1x8x64xf32>
    %637 = arith.mulf %635, %636 : vector<1x8x64xf32>
    %638 = vector.extract_strided_slice %328 {offsets = [0, 40], sizes = [8, 1], strides = [1, 1]} : vector<8x72xf32> to vector<8x1xf32>
    %639 = vector.shape_cast %638 : vector<8x1xf32> to vector<1x8x1xf32>
    %640 = vector.extract_strided_slice %637 {offsets = [0, 0, 0], sizes = [1, 1, 64], strides = [1, 1, 1]} : vector<1x8x64xf32> to vector<1x1x64xf32>
    %641 = vector.broadcast %639 : vector<1x8x1xf32> to vector<1x8x64xf32>
    %642 = vector.broadcast %640 : vector<1x1x64xf32> to vector<1x8x64xf32>
    %643 = arith.mulf %641, %642 : vector<1x8x64xf32>
    %644 = arith.addf %632, %643 : vector<1x8x64xf32>
    %645 = vector.extract_strided_slice %328 {offsets = [0, 41], sizes = [8, 1], strides = [1, 1]} : vector<8x72xf32> to vector<8x1xf32>
    %646 = vector.shape_cast %645 : vector<8x1xf32> to vector<1x8x1xf32>
    %647 = vector.extract_strided_slice %637 {offsets = [0, 1, 0], sizes = [1, 1, 64], strides = [1, 1, 1]} : vector<1x8x64xf32> to vector<1x1x64xf32>
    %648 = vector.broadcast %646 : vector<1x8x1xf32> to vector<1x8x64xf32>
    %649 = vector.broadcast %647 : vector<1x1x64xf32> to vector<1x8x64xf32>
    %650 = arith.mulf %648, %649 : vector<1x8x64xf32>
    %651 = arith.addf %644, %650 : vector<1x8x64xf32>
    %652 = vector.extract_strided_slice %328 {offsets = [0, 42], sizes = [8, 1], strides = [1, 1]} : vector<8x72xf32> to vector<8x1xf32>
    %653 = vector.shape_cast %652 : vector<8x1xf32> to vector<1x8x1xf32>
    %654 = vector.extract_strided_slice %637 {offsets = [0, 2, 0], sizes = [1, 1, 64], strides = [1, 1, 1]} : vector<1x8x64xf32> to vector<1x1x64xf32>
    %655 = vector.broadcast %653 : vector<1x8x1xf32> to vector<1x8x64xf32>
    %656 = vector.broadcast %654 : vector<1x1x64xf32> to vector<1x8x64xf32>
    %657 = arith.mulf %655, %656 : vector<1x8x64xf32>
    %658 = arith.addf %651, %657 : vector<1x8x64xf32>
    %659 = vector.extract_strided_slice %328 {offsets = [0, 43], sizes = [8, 1], strides = [1, 1]} : vector<8x72xf32> to vector<8x1xf32>
    %660 = vector.shape_cast %659 : vector<8x1xf32> to vector<1x8x1xf32>
    %661 = vector.extract_strided_slice %637 {offsets = [0, 3, 0], sizes = [1, 1, 64], strides = [1, 1, 1]} : vector<1x8x64xf32> to vector<1x1x64xf32>
    %662 = vector.broadcast %660 : vector<1x8x1xf32> to vector<1x8x64xf32>
    %663 = vector.broadcast %661 : vector<1x1x64xf32> to vector<1x8x64xf32>
    %664 = arith.mulf %662, %663 : vector<1x8x64xf32>
    %665 = arith.addf %658, %664 : vector<1x8x64xf32>
    %666 = vector.extract_strided_slice %328 {offsets = [0, 44], sizes = [8, 1], strides = [1, 1]} : vector<8x72xf32> to vector<8x1xf32>
    %667 = vector.shape_cast %666 : vector<8x1xf32> to vector<1x8x1xf32>
    %668 = vector.extract_strided_slice %637 {offsets = [0, 4, 0], sizes = [1, 1, 64], strides = [1, 1, 1]} : vector<1x8x64xf32> to vector<1x1x64xf32>
    %669 = vector.broadcast %667 : vector<1x8x1xf32> to vector<1x8x64xf32>
    %670 = vector.broadcast %668 : vector<1x1x64xf32> to vector<1x8x64xf32>
    %671 = arith.mulf %669, %670 : vector<1x8x64xf32>
    %672 = arith.addf %665, %671 : vector<1x8x64xf32>
    %673 = vector.extract_strided_slice %328 {offsets = [0, 45], sizes = [8, 1], strides = [1, 1]} : vector<8x72xf32> to vector<8x1xf32>
    %674 = vector.shape_cast %673 : vector<8x1xf32> to vector<1x8x1xf32>
    %675 = vector.extract_strided_slice %637 {offsets = [0, 5, 0], sizes = [1, 1, 64], strides = [1, 1, 1]} : vector<1x8x64xf32> to vector<1x1x64xf32>
    %676 = vector.broadcast %674 : vector<1x8x1xf32> to vector<1x8x64xf32>
    %677 = vector.broadcast %675 : vector<1x1x64xf32> to vector<1x8x64xf32>
    %678 = arith.mulf %676, %677 : vector<1x8x64xf32>
    %679 = arith.addf %672, %678 : vector<1x8x64xf32>
    %680 = vector.extract_strided_slice %328 {offsets = [0, 46], sizes = [8, 1], strides = [1, 1]} : vector<8x72xf32> to vector<8x1xf32>
    %681 = vector.shape_cast %680 : vector<8x1xf32> to vector<1x8x1xf32>
    %682 = vector.extract_strided_slice %637 {offsets = [0, 6, 0], sizes = [1, 1, 64], strides = [1, 1, 1]} : vector<1x8x64xf32> to vector<1x1x64xf32>
    %683 = vector.broadcast %681 : vector<1x8x1xf32> to vector<1x8x64xf32>
    %684 = vector.broadcast %682 : vector<1x1x64xf32> to vector<1x8x64xf32>
    %685 = arith.mulf %683, %684 : vector<1x8x64xf32>
    %686 = arith.addf %679, %685 : vector<1x8x64xf32>
    %687 = vector.extract_strided_slice %328 {offsets = [0, 47], sizes = [8, 1], strides = [1, 1]} : vector<8x72xf32> to vector<8x1xf32>
    %688 = vector.shape_cast %687 : vector<8x1xf32> to vector<1x8x1xf32>
    %689 = vector.extract_strided_slice %637 {offsets = [0, 7, 0], sizes = [1, 1, 64], strides = [1, 1, 1]} : vector<1x8x64xf32> to vector<1x1x64xf32>
    %690 = vector.broadcast %688 : vector<1x8x1xf32> to vector<1x8x64xf32>
    %691 = vector.broadcast %689 : vector<1x1x64xf32> to vector<1x8x64xf32>
    %692 = arith.mulf %690, %691 : vector<1x8x64xf32>
    %693 = arith.addf %686, %692 : vector<1x8x64xf32>
    %694 = vector.extract_strided_slice %327 {offsets = [0, 0, 7], sizes = [1, 8, 57], strides = [1, 1, 1]} : vector<1x8x64xf32> to vector<1x8x57xf32>
    %695 = vector.extract_strided_slice %327 {offsets = [0, 0, 0], sizes = [1, 8, 7], strides = [1, 1, 1]} : vector<1x8x64xf32> to vector<1x8x7xf32>
    %696 = tpu.concatenate %694, %695 in 2 : vector<1x8x57xf32>, vector<1x8x7xf32> -> vector<1x8x64xf32>
    %697 = vector.broadcast %22 : vector<1x1x64xf32> to vector<1x8x64xf32>
    %698 = arith.mulf %696, %697 : vector<1x8x64xf32>
    %699 = vector.extract_strided_slice %328 {offsets = [0, 48], sizes = [8, 1], strides = [1, 1]} : vector<8x72xf32> to vector<8x1xf32>
    %700 = vector.shape_cast %699 : vector<8x1xf32> to vector<1x8x1xf32>
    %701 = vector.extract_strided_slice %698 {offsets = [0, 0, 0], sizes = [1, 1, 64], strides = [1, 1, 1]} : vector<1x8x64xf32> to vector<1x1x64xf32>
    %702 = vector.broadcast %700 : vector<1x8x1xf32> to vector<1x8x64xf32>
    %703 = vector.broadcast %701 : vector<1x1x64xf32> to vector<1x8x64xf32>
    %704 = arith.mulf %702, %703 : vector<1x8x64xf32>
    %705 = arith.addf %693, %704 : vector<1x8x64xf32>
    %706 = vector.extract_strided_slice %328 {offsets = [0, 49], sizes = [8, 1], strides = [1, 1]} : vector<8x72xf32> to vector<8x1xf32>
    %707 = vector.shape_cast %706 : vector<8x1xf32> to vector<1x8x1xf32>
    %708 = vector.extract_strided_slice %698 {offsets = [0, 1, 0], sizes = [1, 1, 64], strides = [1, 1, 1]} : vector<1x8x64xf32> to vector<1x1x64xf32>
    %709 = vector.broadcast %707 : vector<1x8x1xf32> to vector<1x8x64xf32>
    %710 = vector.broadcast %708 : vector<1x1x64xf32> to vector<1x8x64xf32>
    %711 = arith.mulf %709, %710 : vector<1x8x64xf32>
    %712 = arith.addf %705, %711 : vector<1x8x64xf32>
    %713 = vector.extract_strided_slice %328 {offsets = [0, 50], sizes = [8, 1], strides = [1, 1]} : vector<8x72xf32> to vector<8x1xf32>
    %714 = vector.shape_cast %713 : vector<8x1xf32> to vector<1x8x1xf32>
    %715 = vector.extract_strided_slice %698 {offsets = [0, 2, 0], sizes = [1, 1, 64], strides = [1, 1, 1]} : vector<1x8x64xf32> to vector<1x1x64xf32>
    %716 = vector.broadcast %714 : vector<1x8x1xf32> to vector<1x8x64xf32>
    %717 = vector.broadcast %715 : vector<1x1x64xf32> to vector<1x8x64xf32>
    %718 = arith.mulf %716, %717 : vector<1x8x64xf32>
    %719 = arith.addf %712, %718 : vector<1x8x64xf32>
    %720 = vector.extract_strided_slice %328 {offsets = [0, 51], sizes = [8, 1], strides = [1, 1]} : vector<8x72xf32> to vector<8x1xf32>
    %721 = vector.shape_cast %720 : vector<8x1xf32> to vector<1x8x1xf32>
    %722 = vector.extract_strided_slice %698 {offsets = [0, 3, 0], sizes = [1, 1, 64], strides = [1, 1, 1]} : vector<1x8x64xf32> to vector<1x1x64xf32>
    %723 = vector.broadcast %721 : vector<1x8x1xf32> to vector<1x8x64xf32>
    %724 = vector.broadcast %722 : vector<1x1x64xf32> to vector<1x8x64xf32>
    %725 = arith.mulf %723, %724 : vector<1x8x64xf32>
    %726 = arith.addf %719, %725 : vector<1x8x64xf32>
    %727 = vector.extract_strided_slice %328 {offsets = [0, 52], sizes = [8, 1], strides = [1, 1]} : vector<8x72xf32> to vector<8x1xf32>
    %728 = vector.shape_cast %727 : vector<8x1xf32> to vector<1x8x1xf32>
    %729 = vector.extract_strided_slice %698 {offsets = [0, 4, 0], sizes = [1, 1, 64], strides = [1, 1, 1]} : vector<1x8x64xf32> to vector<1x1x64xf32>
    %730 = vector.broadcast %728 : vector<1x8x1xf32> to vector<1x8x64xf32>
    %731 = vector.broadcast %729 : vector<1x1x64xf32> to vector<1x8x64xf32>
    %732 = arith.mulf %730, %731 : vector<1x8x64xf32>
    %733 = arith.addf %726, %732 : vector<1x8x64xf32>
    %734 = vector.extract_strided_slice %328 {offsets = [0, 53], sizes = [8, 1], strides = [1, 1]} : vector<8x72xf32> to vector<8x1xf32>
    %735 = vector.shape_cast %734 : vector<8x1xf32> to vector<1x8x1xf32>
    %736 = vector.extract_strided_slice %698 {offsets = [0, 5, 0], sizes = [1, 1, 64], strides = [1, 1, 1]} : vector<1x8x64xf32> to vector<1x1x64xf32>
    %737 = vector.broadcast %735 : vector<1x8x1xf32> to vector<1x8x64xf32>
    %738 = vector.broadcast %736 : vector<1x1x64xf32> to vector<1x8x64xf32>
    %739 = arith.mulf %737, %738 : vector<1x8x64xf32>
    %740 = arith.addf %733, %739 : vector<1x8x64xf32>
    %741 = vector.extract_strided_slice %328 {offsets = [0, 54], sizes = [8, 1], strides = [1, 1]} : vector<8x72xf32> to vector<8x1xf32>
    %742 = vector.shape_cast %741 : vector<8x1xf32> to vector<1x8x1xf32>
    %743 = vector.extract_strided_slice %698 {offsets = [0, 6, 0], sizes = [1, 1, 64], strides = [1, 1, 1]} : vector<1x8x64xf32> to vector<1x1x64xf32>
    %744 = vector.broadcast %742 : vector<1x8x1xf32> to vector<1x8x64xf32>
    %745 = vector.broadcast %743 : vector<1x1x64xf32> to vector<1x8x64xf32>
    %746 = arith.mulf %744, %745 : vector<1x8x64xf32>
    %747 = arith.addf %740, %746 : vector<1x8x64xf32>
    %748 = vector.extract_strided_slice %328 {offsets = [0, 55], sizes = [8, 1], strides = [1, 1]} : vector<8x72xf32> to vector<8x1xf32>
    %749 = vector.shape_cast %748 : vector<8x1xf32> to vector<1x8x1xf32>
    %750 = vector.extract_strided_slice %698 {offsets = [0, 7, 0], sizes = [1, 1, 64], strides = [1, 1, 1]} : vector<1x8x64xf32> to vector<1x1x64xf32>
    %751 = vector.broadcast %749 : vector<1x8x1xf32> to vector<1x8x64xf32>
    %752 = vector.broadcast %750 : vector<1x1x64xf32> to vector<1x8x64xf32>
    %753 = arith.mulf %751, %752 : vector<1x8x64xf32>
    %754 = arith.addf %747, %753 : vector<1x8x64xf32>
    %755 = vector.extract_strided_slice %327 {offsets = [0, 0, 8], sizes = [1, 8, 56], strides = [1, 1, 1]} : vector<1x8x64xf32> to vector<1x8x56xf32>
    %756 = vector.extract_strided_slice %327 {offsets = [0, 0, 0], sizes = [1, 8, 8], strides = [1, 1, 1]} : vector<1x8x64xf32> to vector<1x8x8xf32>
    %757 = tpu.concatenate %755, %756 in 2 : vector<1x8x56xf32>, vector<1x8x8xf32> -> vector<1x8x64xf32>
    %758 = vector.broadcast %25 : vector<1x1x64xf32> to vector<1x8x64xf32>
    %759 = arith.mulf %757, %758 : vector<1x8x64xf32>
    %760 = vector.extract_strided_slice %328 {offsets = [0, 56], sizes = [8, 1], strides = [1, 1]} : vector<8x72xf32> to vector<8x1xf32>
    %761 = vector.shape_cast %760 : vector<8x1xf32> to vector<1x8x1xf32>
    %762 = vector.extract_strided_slice %759 {offsets = [0, 0, 0], sizes = [1, 1, 64], strides = [1, 1, 1]} : vector<1x8x64xf32> to vector<1x1x64xf32>
    %763 = vector.broadcast %761 : vector<1x8x1xf32> to vector<1x8x64xf32>
    %764 = vector.broadcast %762 : vector<1x1x64xf32> to vector<1x8x64xf32>
    %765 = arith.mulf %763, %764 : vector<1x8x64xf32>
    %766 = arith.addf %754, %765 : vector<1x8x64xf32>
    %767 = vector.extract_strided_slice %328 {offsets = [0, 57], sizes = [8, 1], strides = [1, 1]} : vector<8x72xf32> to vector<8x1xf32>
    %768 = vector.shape_cast %767 : vector<8x1xf32> to vector<1x8x1xf32>
    %769 = vector.extract_strided_slice %759 {offsets = [0, 1, 0], sizes = [1, 1, 64], strides = [1, 1, 1]} : vector<1x8x64xf32> to vector<1x1x64xf32>
    %770 = vector.broadcast %768 : vector<1x8x1xf32> to vector<1x8x64xf32>
    %771 = vector.broadcast %769 : vector<1x1x64xf32> to vector<1x8x64xf32>
    %772 = arith.mulf %770, %771 : vector<1x8x64xf32>
    %773 = arith.addf %766, %772 : vector<1x8x64xf32>
    %774 = vector.extract_strided_slice %328 {offsets = [0, 58], sizes = [8, 1], strides = [1, 1]} : vector<8x72xf32> to vector<8x1xf32>
    %775 = vector.shape_cast %774 : vector<8x1xf32> to vector<1x8x1xf32>
    %776 = vector.extract_strided_slice %759 {offsets = [0, 2, 0], sizes = [1, 1, 64], strides = [1, 1, 1]} : vector<1x8x64xf32> to vector<1x1x64xf32>
    %777 = vector.broadcast %775 : vector<1x8x1xf32> to vector<1x8x64xf32>
    %778 = vector.broadcast %776 : vector<1x1x64xf32> to vector<1x8x64xf32>
    %779 = arith.mulf %777, %778 : vector<1x8x64xf32>
    %780 = arith.addf %773, %779 : vector<1x8x64xf32>
    %781 = vector.extract_strided_slice %328 {offsets = [0, 59], sizes = [8, 1], strides = [1, 1]} : vector<8x72xf32> to vector<8x1xf32>
    %782 = vector.shape_cast %781 : vector<8x1xf32> to vector<1x8x1xf32>
    %783 = vector.extract_strided_slice %759 {offsets = [0, 3, 0], sizes = [1, 1, 64], strides = [1, 1, 1]} : vector<1x8x64xf32> to vector<1x1x64xf32>
    %784 = vector.broadcast %782 : vector<1x8x1xf32> to vector<1x8x64xf32>
    %785 = vector.broadcast %783 : vector<1x1x64xf32> to vector<1x8x64xf32>
    %786 = arith.mulf %784, %785 : vector<1x8x64xf32>
    %787 = arith.addf %780, %786 : vector<1x8x64xf32>
    %788 = vector.extract_strided_slice %328 {offsets = [0, 60], sizes = [8, 1], strides = [1, 1]} : vector<8x72xf32> to vector<8x1xf32>
    %789 = vector.shape_cast %788 : vector<8x1xf32> to vector<1x8x1xf32>
    %790 = vector.extract_strided_slice %759 {offsets = [0, 4, 0], sizes = [1, 1, 64], strides = [1, 1, 1]} : vector<1x8x64xf32> to vector<1x1x64xf32>
    %791 = vector.broadcast %789 : vector<1x8x1xf32> to vector<1x8x64xf32>
    %792 = vector.broadcast %790 : vector<1x1x64xf32> to vector<1x8x64xf32>
    %793 = arith.mulf %791, %792 : vector<1x8x64xf32>
    %794 = arith.addf %787, %793 : vector<1x8x64xf32>
    %795 = vector.extract_strided_slice %328 {offsets = [0, 61], sizes = [8, 1], strides = [1, 1]} : vector<8x72xf32> to vector<8x1xf32>
    %796 = vector.shape_cast %795 : vector<8x1xf32> to vector<1x8x1xf32>
    %797 = vector.extract_strided_slice %759 {offsets = [0, 5, 0], sizes = [1, 1, 64], strides = [1, 1, 1]} : vector<1x8x64xf32> to vector<1x1x64xf32>
    %798 = vector.broadcast %796 : vector<1x8x1xf32> to vector<1x8x64xf32>
    %799 = vector.broadcast %797 : vector<1x1x64xf32> to vector<1x8x64xf32>
    %800 = arith.mulf %798, %799 : vector<1x8x64xf32>
    %801 = arith.addf %794, %800 : vector<1x8x64xf32>
    %802 = vector.extract_strided_slice %328 {offsets = [0, 62], sizes = [8, 1], strides = [1, 1]} : vector<8x72xf32> to vector<8x1xf32>
    %803 = vector.shape_cast %802 : vector<8x1xf32> to vector<1x8x1xf32>
    %804 = vector.extract_strided_slice %759 {offsets = [0, 6, 0], sizes = [1, 1, 64], strides = [1, 1, 1]} : vector<1x8x64xf32> to vector<1x1x64xf32>
    %805 = vector.broadcast %803 : vector<1x8x1xf32> to vector<1x8x64xf32>
    %806 = vector.broadcast %804 : vector<1x1x64xf32> to vector<1x8x64xf32>
    %807 = arith.mulf %805, %806 : vector<1x8x64xf32>
    %808 = arith.addf %801, %807 : vector<1x8x64xf32>
    %809 = vector.extract_strided_slice %328 {offsets = [0, 63], sizes = [8, 1], strides = [1, 1]} : vector<8x72xf32> to vector<8x1xf32>
    %810 = vector.shape_cast %809 : vector<8x1xf32> to vector<1x8x1xf32>
    %811 = vector.extract_strided_slice %759 {offsets = [0, 7, 0], sizes = [1, 1, 64], strides = [1, 1, 1]} : vector<1x8x64xf32> to vector<1x1x64xf32>
    %812 = vector.broadcast %810 : vector<1x8x1xf32> to vector<1x8x64xf32>
    %813 = vector.broadcast %811 : vector<1x1x64xf32> to vector<1x8x64xf32>
    %814 = arith.mulf %812, %813 : vector<1x8x64xf32>
    %815 = arith.addf %808, %814 : vector<1x8x64xf32>
    %816 = vector.extract_strided_slice %327 {offsets = [0, 0, 9], sizes = [1, 8, 55], strides = [1, 1, 1]} : vector<1x8x64xf32> to vector<1x8x55xf32>
    %817 = vector.extract_strided_slice %327 {offsets = [0, 0, 0], sizes = [1, 8, 9], strides = [1, 1, 1]} : vector<1x8x64xf32> to vector<1x8x9xf32>
    %818 = tpu.concatenate %816, %817 in 2 : vector<1x8x55xf32>, vector<1x8x9xf32> -> vector<1x8x64xf32>
    %819 = vector.broadcast %28 : vector<1x1x64xf32> to vector<1x8x64xf32>
    %820 = arith.mulf %818, %819 : vector<1x8x64xf32>
    %821 = vector.extract_strided_slice %328 {offsets = [0, 64], sizes = [8, 1], strides = [1, 1]} : vector<8x72xf32> to vector<8x1xf32>
    %822 = vector.shape_cast %821 : vector<8x1xf32> to vector<1x8x1xf32>
    %823 = vector.extract_strided_slice %820 {offsets = [0, 0, 0], sizes = [1, 1, 64], strides = [1, 1, 1]} : vector<1x8x64xf32> to vector<1x1x64xf32>
    %824 = vector.broadcast %822 : vector<1x8x1xf32> to vector<1x8x64xf32>
    %825 = vector.broadcast %823 : vector<1x1x64xf32> to vector<1x8x64xf32>
    %826 = arith.mulf %824, %825 : vector<1x8x64xf32>
    %827 = arith.addf %815, %826 : vector<1x8x64xf32>
    %828 = vector.extract_strided_slice %328 {offsets = [0, 65], sizes = [8, 1], strides = [1, 1]} : vector<8x72xf32> to vector<8x1xf32>
    %829 = vector.shape_cast %828 : vector<8x1xf32> to vector<1x8x1xf32>
    %830 = vector.extract_strided_slice %820 {offsets = [0, 1, 0], sizes = [1, 1, 64], strides = [1, 1, 1]} : vector<1x8x64xf32> to vector<1x1x64xf32>
    %831 = vector.broadcast %829 : vector<1x8x1xf32> to vector<1x8x64xf32>
    %832 = vector.broadcast %830 : vector<1x1x64xf32> to vector<1x8x64xf32>
    %833 = arith.mulf %831, %832 : vector<1x8x64xf32>
    %834 = arith.addf %827, %833 : vector<1x8x64xf32>
    %835 = vector.extract_strided_slice %328 {offsets = [0, 66], sizes = [8, 1], strides = [1, 1]} : vector<8x72xf32> to vector<8x1xf32>
    %836 = vector.shape_cast %835 : vector<8x1xf32> to vector<1x8x1xf32>
    %837 = vector.extract_strided_slice %820 {offsets = [0, 2, 0], sizes = [1, 1, 64], strides = [1, 1, 1]} : vector<1x8x64xf32> to vector<1x1x64xf32>
    %838 = vector.broadcast %836 : vector<1x8x1xf32> to vector<1x8x64xf32>
    %839 = vector.broadcast %837 : vector<1x1x64xf32> to vector<1x8x64xf32>
    %840 = arith.mulf %838, %839 : vector<1x8x64xf32>
    %841 = arith.addf %834, %840 : vector<1x8x64xf32>
    %842 = vector.extract_strided_slice %328 {offsets = [0, 67], sizes = [8, 1], strides = [1, 1]} : vector<8x72xf32> to vector<8x1xf32>
    %843 = vector.shape_cast %842 : vector<8x1xf32> to vector<1x8x1xf32>
    %844 = vector.extract_strided_slice %820 {offsets = [0, 3, 0], sizes = [1, 1, 64], strides = [1, 1, 1]} : vector<1x8x64xf32> to vector<1x1x64xf32>
    %845 = vector.broadcast %843 : vector<1x8x1xf32> to vector<1x8x64xf32>
    %846 = vector.broadcast %844 : vector<1x1x64xf32> to vector<1x8x64xf32>
    %847 = arith.mulf %845, %846 : vector<1x8x64xf32>
    %848 = arith.addf %841, %847 : vector<1x8x64xf32>
    %849 = vector.extract_strided_slice %328 {offsets = [0, 68], sizes = [8, 1], strides = [1, 1]} : vector<8x72xf32> to vector<8x1xf32>
    %850 = vector.shape_cast %849 : vector<8x1xf32> to vector<1x8x1xf32>
    %851 = vector.extract_strided_slice %820 {offsets = [0, 4, 0], sizes = [1, 1, 64], strides = [1, 1, 1]} : vector<1x8x64xf32> to vector<1x1x64xf32>
    %852 = vector.broadcast %850 : vector<1x8x1xf32> to vector<1x8x64xf32>
    %853 = vector.broadcast %851 : vector<1x1x64xf32> to vector<1x8x64xf32>
    %854 = arith.mulf %852, %853 : vector<1x8x64xf32>
    %855 = arith.addf %848, %854 : vector<1x8x64xf32>
    %856 = vector.extract_strided_slice %328 {offsets = [0, 69], sizes = [8, 1], strides = [1, 1]} : vector<8x72xf32> to vector<8x1xf32>
    %857 = vector.shape_cast %856 : vector<8x1xf32> to vector<1x8x1xf32>
    %858 = vector.extract_strided_slice %820 {offsets = [0, 5, 0], sizes = [1, 1, 64], strides = [1, 1, 1]} : vector<1x8x64xf32> to vector<1x1x64xf32>
    %859 = vector.broadcast %857 : vector<1x8x1xf32> to vector<1x8x64xf32>
    %860 = vector.broadcast %858 : vector<1x1x64xf32> to vector<1x8x64xf32>
    %861 = arith.mulf %859, %860 : vector<1x8x64xf32>
    %862 = arith.addf %855, %861 : vector<1x8x64xf32>
    %863 = vector.extract_strided_slice %328 {offsets = [0, 70], sizes = [8, 1], strides = [1, 1]} : vector<8x72xf32> to vector<8x1xf32>
    %864 = vector.shape_cast %863 : vector<8x1xf32> to vector<1x8x1xf32>
    %865 = vector.extract_strided_slice %820 {offsets = [0, 6, 0], sizes = [1, 1, 64], strides = [1, 1, 1]} : vector<1x8x64xf32> to vector<1x1x64xf32>
    %866 = vector.broadcast %864 : vector<1x8x1xf32> to vector<1x8x64xf32>
    %867 = vector.broadcast %865 : vector<1x1x64xf32> to vector<1x8x64xf32>
    %868 = arith.mulf %866, %867 : vector<1x8x64xf32>
    %869 = arith.addf %862, %868 : vector<1x8x64xf32>
    %870 = vector.extract_strided_slice %328 {offsets = [0, 71], sizes = [8, 1], strides = [1, 1]} : vector<8x72xf32> to vector<8x1xf32>
    %871 = vector.shape_cast %870 : vector<8x1xf32> to vector<1x8x1xf32>
    %872 = vector.extract_strided_slice %820 {offsets = [0, 7, 0], sizes = [1, 1, 64], strides = [1, 1, 1]} : vector<1x8x64xf32> to vector<1x1x64xf32>
    %873 = vector.broadcast %871 : vector<1x8x1xf32> to vector<1x8x64xf32>
    %874 = vector.broadcast %872 : vector<1x1x64xf32> to vector<1x8x64xf32>
    %875 = arith.mulf %873, %874 : vector<1x8x64xf32>
    %876 = arith.addf %869, %875 : vector<1x8x64xf32>
    %c0_15 = arith.constant 0 : index
    %c0_16 = arith.constant 0 : index
    %c0_17 = arith.constant 0 : index
    %877 = vector.load %arg3[%c0_15, %c0_16, %c0_17] : memref<1x8x64xf32, #tpu.memory_space<vmem>>, vector<1x8x64xf32>
    %878 = arith.subf %876, %877 : vector<1x8x64xf32>
    %879 = arith.mulf %878, %878 : vector<1x8x64xf32>
    %880 = vector.shape_cast %879 : vector<1x8x64xf32> to vector<1x1x8x64xf32>
    %cst_18 = arith.constant dense<0.000000e+00> : vector<1xf32>
    %881 = vector.multi_reduction <add>, %880, %cst_18 [1, 2, 3] : vector<1x1x8x64xf32> to vector<1xf32>
    %882 = vector.shape_cast %881 : vector<1xf32> to vector<1x1x1x1xf32>
    %883 = vector.extract %882[0, 0, 0, 0] : f32 from vector<1x1x1x1xf32>
    %884 = vector.broadcast %883 : f32 to vector<1x8x128xf32>
    %c0_19 = arith.constant 0 : index
    %c0_20 = arith.constant 0 : index
    %c0_21 = arith.constant 0 : index
    %885 = vector.load %arg9[%c0_19, %c0_20, %c0_21] : memref<1x8x128xf32, #tpu.memory_space<vmem>>, vector<1x8x128xf32>
    tpu.vector_store %arg9[%c0_19, %c0_20, %c0_21], %884 {strides = array<i32>} : memref<1x8x128xf32, #tpu.memory_space<vmem>>, vector<1x8x128xf32>,
    return
  }
  func.func @transform_0(%arg0: i32) -> (i32, i32, i32) {
    %c0_i32 = arith.constant 0 : i32
    %c0_i32_0 = arith.constant 0 : i32
    %c0_i32_1 = arith.constant 0 : i32
    return %arg0, %c0_i32, %c0_i32_0 : i32, i32, i32
  }
  func.func @transform_1(%arg0: i32) -> (i32, i32, i32) {
    %c0_i32 = arith.constant 0 : i32
    %c0_i32_0 = arith.constant 0 : i32
    %c0_i32_1 = arith.constant 0 : i32
    return %arg0, %c0_i32, %c0_i32_0 : i32, i32, i32
  }
  func.func @transform_2(%arg0: i32) -> (i32, i32, i32) {
    %c0_i32 = arith.constant 0 : i32
    %c0_i32_0 = arith.constant 0 : i32
    %c0_i32_1 = arith.constant 0 : i32
    return %arg0, %c0_i32, %c0_i32_0 : i32, i32, i32
  }
  func.func @transform_3(%arg0: i32) -> (i32, i32) {
    %c0_i32 = arith.constant 0 : i32
    %c0_i32_0 = arith.constant 0 : i32
    %c0_i32_1 = arith.constant 0 : i32
    return %c0_i32, %c0_i32_0 : i32, i32
  }
  func.func @transform_4(%arg0: i32) -> (i32, i32) {
    %c0_i32 = arith.constant 0 : i32
    %c0_i32_0 = arith.constant 0 : i32
    %c0_i32_1 = arith.constant 0 : i32
    return %c0_i32, %c0_i32_0 : i32, i32
  }
  func.func @transform_5(%arg0: i32) -> (i32, i32) {
    %c0_i32 = arith.constant 0 : i32
    %c0_i32_0 = arith.constant 0 : i32
    %c0_i32_1 = arith.constant 0 : i32
    return %c0_i32, %c0_i32_0 : i32, i32
  }
  func.func @transform_6(%arg0: i32) -> (i32, i32) {
    %c0_i32 = arith.constant 0 : i32
    %c0_i32_0 = arith.constant 0 : i32
    %c0_i32_1 = arith.constant 0 : i32
    return %c0_i32, %c0_i32_0 : i32, i32
  }
  func.func @transform_7(%arg0: i32) -> (i32, i32) {
    %c0_i32 = arith.constant 0 : i32
    %c0_i32_0 = arith.constant 0 : i32
    %c0_i32_1 = arith.constant 0 : i32
    return %c0_i32, %c0_i32_0 : i32, i32
  }
  func.func @transform_8(%arg0: i32) -> (i32, i32, i32) {
    %c0_i32 = arith.constant 0 : i32
    %c0_i32_0 = arith.constant 0 : i32
    %c0_i32_1 = arith.constant 0 : i32
    return %arg0, %c0_i32, %c0_i32_0 : i32, i32, i32
  }
}

</mosaic_0001>

<bundles_post_ra>
// kernel: tpu_custom_call.1
= control target key start
LH: loop header
LB: loop body
LE: loop exit
PB: predicated region body
PF: predicated region fallthrough
CT: control target
= control target key end

     0   :  { %13 = vsyncpa [#allocation3], 0  ;;  %s3080_s0 = inlined_call_operand.vmem [shape: f32[2,4,64], index: 0, kind: input, shape index: {}]   ;;  %s3081_s1 = inlined_call_operand.hbm [shape: f32[2,1,64], index: 1, kind: input, shape index: {}]   ;;  %s3082_s2 = inlined_call_operand.vmem [shape: f32[2,8,64], index: 2, kind: input, shape index: {}]   ;;  %s3083_s3 = inlined_call_operand.hbm [shape: f32[9,64], index: 3, kind: input, shape index: {}]   ;;  %s3084_s4 = inlined_call_operand.vmem [shape: f32[8,36], index: 4, kind: input, shape index: {}]   ;;  %s3085_s5 = inlined_call_operand.vmem [shape: f32[8,1], index: 5, kind: input, shape index: {}]   ;;  %s3086_s6 = inlined_call_operand.vmem [shape: f32[8,72], index: 6, kind: input, shape index: {}]   ;;  %s3087_s7 = inlined_call_operand.vmem [shape: f32[8,1], index: 7, kind: input, shape index: {}]   ;;  %s3088_s8 = inlined_call_operand.hbm [shape: f32[2,8,128], index: 8, kind: output, shape index: {}]  }
   0x1   :  { %15 = vsyncpa [#allocation3 + $0x1], 0 }
   0x2   :  { %16 = vsyncpa [#allocation6], 0 }
   0x3   :  { %17 = vsyncpa [#allocation4], 0 }
   0x4   :  { %19 = vsyncpa [#allocation4 + $0x1], 0  ;;  %s2321_s27 = smov 0   ;;  %s2323_s28 = smov 0  }
   0x5   :  { %s2325_s29 = smov 0   ;;  %s2327_s30 = smov 0  }
   0x6 LB: > { %s2342_s9 = sadd.s32 4294967295, %s2181_s30   ;;  %s1776_s10 = sadd.s32 4294967294, %s2181_s30   ;;  %s2181_s30 = sphi %s2327_s30, %s3120_s30   ;;  %s2177_s29 = sphi %s2325_s29, %s3123_s29   ;;  %s2173_s28 = sphi %s2323_s28, %s3122_s28   ;;  %s2169_s27 = sphi %s2321_s27, %s3121_s27  }
   0x7   : > { %p71_p0 = scmp.ne.s32.totalorder %s2173_s28, %s2169_s27  ;;  %p3089_p1 = scmp.eq.s32.totalorder %s2342_s9, 0 }
   0x8   : > { %p232_p3 = scmp.eq.s32.totalorder %s1776_s10, 1  ;;  %p1777_p5 = scmp.ge.s32.totalorder %s2181_s30, 1 }
   0x9   : > { %p2351_p4 = por %p3089_p1, %p71_p0  ;;  %p239_p7 = scmp.lt.s32.totalorder %s2181_s30, 3 }
   0xa   : > { %p2356_p6 = por %p232_p3, %p71_p0  ;;  %s2183_s14 = smov [#allocation5]  }
   0xb   : > { %s3100_s11 = scalar_select %p2351_p4, 1, 0 }
   0xc   : > { %s3101_s12 = scalar_select %p2356_p6, 1, 0 }
   0xd   : > { %p2361_p8 = pnand %p1777_p5, %p239_p7  ;;  %s251_s15 = sshll.u32 %s2183_s14, 4  ;;  %s2365_s15 = int_to_ptr.vmem [resolvable:$true] %s251_s15 }
   0xe   : > { %s2377_s17 = sadd.s32 1, %s2181_s30   ;;  %s58_s18 = sadd.s32 1, %s2177_s29 }
   0xf   : > { %s3102_s13 = scalar_select %p2361_p8, 1, 0 }
  0x10   : > { %p1802_p9 = pneg %p2361_p8  ;;  %3104 = sst [smem:[#allocation11_spill]] %s2377_s17 }
  0x11   : > { %s55_s19 = ssub.s32 %s2181_s30, %s2377_s17  ;;  %s2053_s22 = scalar_lea.hbm %s3083_s3, 256 }
  0x12   : > { %p2372_p11 = pnand %p1802_p9, %p3089_p1  ;;  %p2054_p12 = scmp.ne.s32.totalorder %s3083_s3, %s2053_s22 }
  0x13   : > { %p2060_p5 = scmp.lt.u32.totalorder %s2053_s22, %s3083_s3 }
  0x14   : > { %p2055_p13 = pneg %p2372_p11 }
  0x16   : > { %p2056_p0 = pnand %p2055_p13, %p2054_p12 }
  0x18   : > { %p2057_p3 = pneg %p2056_p0 }
  0x1a   : > { %p2062_p7 = pnand %p2060_p5, %p2057_p3 }
  0x1c   : > { %2065 = shalt.err (!%p2062_p7)
}
  0x1d   : > { %s2066_s10 = scalar_lea.vmem %s2365_s15, 256  ;;  %p2074_p2 = scmp.lt.s32.totalorder %s2365_s15, %s2365_s15 }
  0x1e   : > { %p2067_p9 = scmp.ne.s32.totalorder %s2365_s15, %s2066_s10  ;;  %p2075_p6 = scmp.lt.s32.totalorder %s2066_s10, %s2066_s10 }
  0x20   : > { %p2069_p10 = pnand %p2067_p9, %p2055_p13  ;;  %p2076_p4 = por %p2075_p6, %p2074_p2 }
  0x22   : > { %p2070_p1 = pneg %p2069_p10 }
  0x24   : > { %p2077_p8 = pnand %p2076_p4, %p2070_p1 }
  0x26   : > { %2080 = shalt.err (!%p2077_p8)
}
  0x27   : > { %s2184_s14 = smov 128   ;;  %s2185_s20 = smov 8  }
  0x28   : > { %1805 = dma.hbm_to_vmem [thread:$0]  (!%p2372_p11), %s3083_s3, 256, %s2365_s15, [#allocation6], %s2184_s14, %s2184_s14, %s2185_s20  }
  0x29   : > { %p56_p2 = scmp.eq.s32.totalorder %s55_s19, 0  ;;  %p65_p1 = scmp.ne.s32.totalorder %s2177_s29, %s2173_s28 }
  0x2a   : > { %p66_p4 = scmp.eq.s32.totalorder %s2181_s30, 0  ;;  %p1815_p6 = scmp.lt.s32.totalorder %s2181_s30, 2 }
  0x2b   : > { %s2408_s23 = scalar_select %p56_p2, %s2177_s29, %s58_s18  }
  0x2c   : > { %p67_p8 = por %p66_p4, %p65_p1  ;;  %p3105_p10 = scmp.eq.s32.totalorder %s2342_s9, 1 }
  0x2d   : > { %s284_s25 = sand.u32 1, %s2177_s29   ;;  %s1780_s26 = sshll.u32 %s2181_s30, 4 }
  0x2e   : > { %p2412_p12 = por %p3105_p10, %p65_p1  ;;  %s2421_s17 = scalar_lea.hbm %s3081_s1, %s1780_s26 }
  0x2f   : > { %s287_s15 = scalar_lea.vmem [#allocation2], %s284_s25  ;;  %p2425_p11 = pnand %p1815_p6, %p67_p8 }
  0x30   : > { %s294_s18 = sshll.u32 %s287_s15, 4  ;;  %s285_s14 = scalar_lea.sflag [#allocation3], %s284_s25  ;;  %s2423_s18 = int_to_ptr.vmem [resolvable:$true] %s294_s18 }
  0x31   : > { %s2081_s20 = scalar_lea.hbm %s2421_s17, 16  ;;  %p2083_p0 = pneg %p2425_p11 }
  0x32   : > { %p2082_p13 = scmp.ne.s32.totalorder %s2421_s17, %s2081_s20  ;;  %s2086_s26 = scalar_lea.hbm %s3081_s1, 32 }
  0x33   : > { %p2087_p7 = scmp.lt.u32.totalorder %s2421_s17, %s3081_s1  ;;  %p2088_p9 = scmp.lt.u32.totalorder %s2086_s26, %s2081_s20 }
  0x34   : > { %p2084_p3 = pnand %p2083_p0, %p2082_p13  ;;  %p2090_p1 = scmp.lt.u32.totalorder %s2081_s20, %s2421_s17 }
  0x35   : > { %p2089_p2 = por %p2088_p9, %p2087_p7 }
  0x36   : > { %p2085_p5 = pneg %p2084_p3 }
  0x37   : > { %p2091_p4 = por %p2090_p1, %p2089_p2 }
  0x39   : > { %p2092_p6 = pnand %p2091_p4, %p2085_p5 }
  0x3b   : > { %2095 = shalt.err (!%p2092_p6)
}
  0x3c   : > { %s2096_s25 = scalar_lea.vmem %s2423_s18, 16  ;;  %s2186_s15 = smov [#allocation2]  }
  0x3d   : > { %p2097_p8 = scmp.ne.s32.totalorder %s2423_s18, %s2096_s25  ;;  %s2101_s21 = sshll.u32 %s2186_s15, 4  ;;  %s2102_s21 = int_to_ptr.vmem [resolvable:$false] %s2101_s21 }
  0x3e   : > { %s2103_s22 = scalar_lea.vmem %s2102_s21, 32  ;;  %p2104_p3 = scmp.lt.s32.totalorder %s2423_s18, %s2102_s21 }
  0x3f   : > { %p2099_p10 = pnand %p2097_p8, %p2083_p0  ;;  %p2105_p7 = scmp.lt.s32.totalorder %s2103_s22, %s2096_s25 }
  0x41   : > { %p2100_p13 = pneg %p2099_p10  ;;  %p2106_p9 = por %p2105_p7, %p2104_p3 }
  0x43   : > { %p2107_p2 = pnand %p2106_p9, %p2100_p13 }
  0x45   : > { %2110 = shalt.err (!%p2107_p2)
}
  0x46   : > { %1809 = dma.hbm_to_vmem [thread:$0]  (!%p2425_p11), %s2421_s17, 16, %s2423_s18, %s285_s14  }
  0x47   : > { %p3108_p5 = scmp.ne.s32.totalorder %s3102_s13, 0 }
  0x48   : > { %s2457_s20 = sand.u32 (!%p3108_p5), 1, %s2173_s28   ;;  %p3109_p0 = scmp.ne.s32.totalorder (!%p3108_p5), %s3100_s11, 0 }
  0x49   : > { %310 = sbr.rel (%p3108_p5) target bundleno = 909 (0x38d), region = 52  ;;  %s313_s26 = scalar_lea.sflag (!%p3108_p5), [#allocation3], %s2457_s20 }
  0x4a   : > { %s315_s10 = scalar_lea.vmem (!%p3108_p5), [#allocation2], %s2457_s20 }
  0x50   : > { %2156 = dma.done.wait (%p3109_p0), %s313_s26, 16  }
  0x51   : > { %2158 = vsyncadd (%p3109_p0), %s313_s26, 4294967280  ;;  %p3110_p1 = scmp.eq.s32.totalorder %s2342_s9, 0 }
  0x53   : > { %2160 = dma.done.wait (%p3110_p1), [#allocation6], 256   ;;  %p3111_p11 = pmov %p3110_p1 }
  0x54   : > { %p359_p4 = scmp.lt.s32.totalorder %s2342_s9, 1  ;;  %v2187_v0 = vmov 0   ;;  %v2482_v1 = vld [vmem:[%s3084_s4] sm:$0xff]  ;;  %v2188_v6 = vmov 2   ;;  %s2189_s21 = smov 73   ;;  %v2190_v7 = vmov 1   ;;  %v394_v41 = vlaneseq }
  0x55   : > { %2162 = vsyncadd (%p3111_p11), [#allocation6], 4294967040  ;;  %1942 = vset.pattern.permute.xlu1 %v2187_v0  ;;  %1941 = vset.pattern.permute.xlu0 %v2187_v0  ;;  %v379_v2 = vld [vmem:[%s3085_s5] sm:$0xff]  ;;  %s2191_s22 = smov 9   ;;  %v2192_v8 = vmov 3   ;;  %s2193_s26 = smov 72  }
  0x56   : > { %s2473_s13 = scalar_select %p359_p4, %s2342_s9, 1  ;;  %401 = vperm.xlu1 %1942, %v2482_v1   ;;  %382 = vperm.xlu0 %1941, %v379_v2   ;;  %v1786_v4 = vld [vmem:[%s315_s10] ss:$0 sm:$0xff]  ;;  %v2194_v9 = vmov 4   ;;  %v2196_v10 = vmov 5   ;;  %v2197_v11 = vmov 7  }
  0x57   : > { %s2195_s10 = smov 8   ;;  %v2198_v12 = vmov 6   ;;  %v2200_v13 = vmov 10   ;;  %s2201_s11 = smov 71   ;;  %v2202_v14 = vmov 8   ;;  %v2204_v15 = vmov 13  }
  0x58   : > { %s1784_s17 = sshll.u32 %s2473_s13, 2  ;;  %s2203_s18 = smov 65   ;;  %v2205_v16 = vmov 9   ;;  %v2206_v17 = vmov 16   ;;  %v2207_v18 = vmov 11   ;;  %v2208_v19 = vmov 19  }
  0x59   : > { %s362_s19 = scalar_lea.vmem %s3080_s0, %s1784_s17  ;;  %s2199_s17 = smov 7   ;;  %v2209_v20 = vmov 12   ;;  %v2211_v21 = vmov 22   ;;  %v2213_v22 = vmov 14   ;;  %v2215_v23 = vmov 25   ;;  %v2566_v33 = vld [vmem:[%s3086_s6] sm:$0xff] }
  0x5a   : > { %v367_v3 = vld [vmem:[%s362_s19] sm:$0xf]  ;;  %1944 = vset.pattern.permute.xlu1 %v2188_v6  ;;  %1943 = vset.pattern.permute.xlu0 %v2190_v7  ;;  %s3095_s19 = smov 63   ;;  %s2212_s14 = smov 1   ;;  %v2216_v24 = vmov 15   ;;  %v2217_v25 = vmov 17  }
  0x5b   : > { %v2488_v5 = vmul.f32 %v1786_v4, %v367_v3  ;;  %421 = vperm.xlu1 %1944, %v2482_v1   ;;  %s3094_s16 = smov 121   ;;  %v2218_v26 = vmov 28   ;;  %v2219_v27 = vmov 18   ;;  %v2220_v28 = vmov 29   ;;  %s2223_s25 = smov 127   ;;  %v2610_v48 = vld [vmem:[#allocation5] sm:$0xff] }
  0x5c   : > { %v2221_v29 = vmov 20   ;;  %v2222_v30 = vmov 32   ;;  %v2224_v31 = vmov 21   ;;  %v2225_v32 = vmov 33   ;;  %s3096_s15 = smov 120   ;;  %v853_v56 = vld [vmem:[%s3087_s7] sm:$0xff] }
  0x5d   : > { %386 = vrot.lane.b32.xlu0 %v2488_v5, %s2189_s21  ;;  %v2226_v34 = vmov 23   ;;  %v2227_v35 = vmov 24   ;;  %v2229_v36 = vmov 26   ;;  %v2230_v37 = vmov 27  }
  0x5e   : > { %v2232_v38 = vmov 30   ;;  %v2234_v39 = vmov 31   ;;  %v2236_v42 = vmov 34   ;;  %v2603_v44 = vshrl.u32 %v394_v41, 7 }
  0x5f   : > { %389 = vrot.lane.b32.xlu1 %v2488_v5, %s2191_s22  ;;  %vm392_vm0 = vcmask 72704   ;;  %v2238_v53 = vmov 35   ;;  %vm446_vm1 = vcmask 64512   ;;  %vm499_vm2 = vcmask 56320  }
  0x60   : > { %1945 = vset.pattern.permute.xlu1 %v2192_v8  ;;  %v2608_v46 = vsub.s32 0, %v2603_v44  ;;  %v2627_v60 = vsub.s32 1, %v2603_v44  ;;  %v2633_v2 = vsub.s32 2, %v2603_v44  ;;  %vm552_vm3 = vcmask 7168  }
  0x61   : > { %411 = vperm.xlu0 %1943, %v2482_v1   ;;  %vm645_vm4 = vcmask 515072   ;;  %vm698_vm5 = vcmask 465920   ;;  %vm751_vm6 = vcmask 457728   ;;  %vm804_vm7 = vcmask 449536  }
  0x62   : > { %v2615_v50 = vrot.slane %v2610_v48, %v2608_v46  ;;  %v2637_v3 = vrot.slane %v2610_v48, %v2627_v60  ;;  %vm1648_vm8 = vcmask 523264  }
  0x63   : > { %431 = vperm.xlu1 %1945, %v2482_v1  }
  0x65   : > { %440 = vrot.lane.b32.xlu0 %v2488_v5, %s2193_s26 }
  0x66   : > { %1946 = vset.pattern.permute.xlu0 %v2194_v9 }
  0x67   : > { %443 = vrot.lane.b32.xlu1 %v2488_v5, %s2195_s10 }
  0x68   : > { %1947 = vset.pattern.permute.xlu1 %v2196_v10 }
  0x69   : > { %454 = vperm.xlu0 %1946, %v2482_v1  }
  0x6b   : > { %464 = vperm.xlu1 %1947, %v2482_v1  }
  0x6d   : > { %1949 = vset.pattern.permute.xlu0 %v2197_v11 }
  0x6e   : > { %484 = vperm.xlu0 %1949, %v2482_v1  }
  0x6f   : > { %1948 = vset.pattern.permute.xlu1 %v2198_v12 }
  0x70   : > { %474 = vperm.xlu1 %1948, %v2482_v1  }
  0x72   : > { %496 = vrot.lane.b32.xlu0 %v2488_v5, %s2199_s17 }
  0x73   : > { %1952 = vset.pattern.permute.xlu0 %v2200_v13 }
  0x74   : > { %493 = vrot.lane.b32.xlu1 %v2488_v5, %s2201_s11 }
  0x75   : > { %1950 = vset.pattern.permute.xlu1 %v2202_v14 }
  0x76   : > { %527 = vperm.xlu0 %1952, %v2482_v1  }
  0x78   : > { %507 = vperm.xlu1 %1950, %v2482_v1  }
  0x7a   : > { %546 = vrot.lane.b32.xlu0 %v2488_v5, %s2203_s18 }
  0x7b   : > { %1955 = vset.pattern.permute.xlu0 %v2204_v15 }
  0x7c   : > { %1951 = vset.pattern.permute.xlu1 %v2205_v16 }
  0x7d   : > { %517 = vperm.xlu1 %1951, %v2482_v1  }
  0x7e   : > { %570 = vperm.xlu0 %1955, %v2482_v1  }
  0x81   : > { %1953 = vset.pattern.permute.xlu1 %v2207_v18 }
  0x82   : > { %1958 = vset.pattern.permute.xlu0 %v2206_v17  ;;  %537 = vperm.xlu1 %1953, %v2482_v1  }
  0x83   : > { %600 = vperm.xlu0 %1958, %v2482_v1  }
  0x86   : > { %1954 = vset.pattern.permute.xlu1 %v2209_v20 }
  0x87   : > { %1961 = vset.pattern.permute.xlu0 %v2208_v19  ;;  %560 = vperm.xlu1 %1954, %v2482_v1  }
  0x88   : > { %630 = vperm.xlu0 %1961, %v2482_v1  }
  0x8b   : > { %549 = vrot.lane.b32.xlu1 %v2488_v5, %s2212_s14 }
  0x8c   : > { %642 = vrot.lane.b32.xlu0 %v2488_v5, %s3095_s19  ;;  %1956 = vset.pattern.permute.xlu1 %v2213_v22  ;;  %s3097_s19 = smov 56  }
  0x8d   : > { %1964 = vset.pattern.permute.xlu0 %v2211_v21 }
  0x8f   : > { %580 = vperm.xlu1 %1956, %v2482_v1  }
  0x90   : > { %673 = vperm.xlu0 %1964, %v2482_v1  }
  0x93   : > { %1957 = vset.pattern.permute.xlu1 %v2216_v24 }
  0x94   : > { %692 = vrot.lane.b32.xlu0 %v2488_v5, %s3094_s16  ;;  %590 = vperm.xlu1 %1957, %v2482_v1   ;;  %s2228_s16 = smov 57  }
  0x95   : > { %1967 = vset.pattern.permute.xlu0 %v2215_v23 }
  0x98   : > { %716 = vperm.xlu0 %1967, %v2482_v1   ;;  %1959 = vset.pattern.permute.xlu1 %v2217_v25 }
  0x99   : > { %610 = vperm.xlu1 %1959, %v2482_v1  }
  0x9c   : > { %1970 = vset.pattern.permute.xlu0 %v2218_v26 }
  0x9d   : > { %759 = vperm.xlu0 %1970, %v2482_v1   ;;  %1960 = vset.pattern.permute.xlu1 %v2219_v27 }
  0x9e   : > { %620 = vperm.xlu1 %1960, %v2482_v1  }
  0xa1   : > { %1971 = vset.pattern.permute.xlu0 %v2220_v28 }
  0xa2   : > { %769 = vperm.xlu0 %1971, %v2482_v1   ;;  %1962 = vset.pattern.permute.xlu1 %v2221_v29 }
  0xa3   : > { %653 = vperm.xlu1 %1962, %v2482_v1  }
  0xa6   : > { %1974 = vset.pattern.permute.xlu0 %v2222_v30 }
  0xa7   : > { %812 = vperm.xlu0 %1974, %v2482_v1   ;;  %639 = vrot.lane.b32.xlu1 %v2488_v5, %s2223_s25 }
  0xa8   : > { %1963 = vset.pattern.permute.xlu1 %v2224_v31 }
  0xab   : > { %1975 = vset.pattern.permute.xlu0 %v2225_v32  ;;  %663 = vperm.xlu1 %1963, %v2482_v1  }
  0xac   : > { %822 = vperm.xlu0 %1975, %v2482_v1  }
  0xaf   : > { %1965 = vset.pattern.permute.xlu1 %v2226_v34 }
  0xb0   : > { %1978 = vset.pattern.permute.xlu0 %v2187_v0  ;;  %683 = vperm.xlu1 %1965, %v2482_v1  }
  0xb1   : > { %870 = vperm.xlu0 %1978, %v2566_v33  }
  0xb4   : > { %1966 = vset.pattern.permute.xlu1 %v2227_v35 }
  0xb5   : > { %1981 = vset.pattern.permute.xlu0 %v2188_v6  ;;  %706 = vperm.xlu1 %1966, %v2482_v1  }
  0xb6   : > { %890 = vperm.xlu0 %1981, %v2566_v33  }
  0xb9   : > { %695 = vrot.lane.b32.xlu1 %v2488_v5, %s2228_s16 }
  0xba   : > { %1984 = vset.pattern.permute.xlu0 %v2196_v10  ;;  %1968 = vset.pattern.permute.xlu1 %v2229_v36  ;;  %v2643_v10 = vsub.s32 3, %v2603_v44 }
  0xbb   : > { %920 = vperm.xlu0 %1984, %v2566_v33  }
  0xbd   : > { %726 = vperm.xlu1 %1968, %v2482_v1  }
  0xbf   : > { %1987 = vset.pattern.permute.xlu0 %v2202_v14 }
  0xc0   : > { %958 = vperm.xlu0 %1987, %v2566_v33  }
  0xc1   : > { %1969 = vset.pattern.permute.xlu1 %v2230_v37 }
  0xc2   : > { %736 = vperm.xlu1 %1969, %v2482_v1  }
  0xc4   : > { %1988 = vset.pattern.permute.xlu0 %v2205_v16 }
  0xc5   : > { %968 = vperm.xlu0 %1988, %v2566_v33  }
  0xc6   : > { %745 = vrot.lane.b32.xlu1 %v2488_v5, %s3096_s15  ;;  %s3098_s15 = smov 119  }
  0xc7   : > { %1972 = vset.pattern.permute.xlu1 %v2232_v38 }
  0xc9   : > { %1991 = vset.pattern.permute.xlu0 %v2209_v20 }
  0xca   : > { %998 = vperm.xlu0 %1991, %v2566_v33   ;;  %748 = vrot.lane.b32.xlu1 %v2488_v5, %s3097_s19  ;;  %s3099_s19 = smov 55  }
  0xce   : > { %1994 = vset.pattern.permute.xlu0 %v2216_v24  ;;  %779 = vperm.xlu1 %1972, %v2482_v1  }
  0xcf   : > { %1028 = vperm.xlu0 %1994, %v2566_v33  }
  0xd2   : > { %1973 = vset.pattern.permute.xlu1 %v2234_v39 }
  0xd3   : > { %1997 = vset.pattern.permute.xlu0 %v2219_v27  ;;  %789 = vperm.xlu1 %1973, %v2482_v1  }
  0xd4   : > { %1066 = vperm.xlu0 %1997, %v2566_v33  }
  0xd5   : > { %v402_v40 = vpop.permute.xlu1 %401  ;;  %v383_v45 = vpop.permute.xlu0 %382 }
  0xd7   : > { %798 = vrot.lane.b32.xlu1 %v2488_v5, %s3098_s15 }
  0xd8   : > { %2000 = vset.pattern.permute.xlu0 %v2224_v31  ;;  %1976 = vset.pattern.permute.xlu1 %v2236_v42 }
  0xd9   : > { %1096 = vperm.xlu0 %2000, %v2566_v33   ;;  %v387_v49 = vpop.permute.xlu0 %386 }
  0xda   : > { %v422_v43 = vpop.permute.xlu1 %421 }
  0xdb   : > { %801 = vrot.lane.b32.xlu1 %v2488_v5, %s3099_s19  ;;  %s3117_s19 = smov 119  }
  0xdd   : > { %2003 = vset.pattern.permute.xlu0 %v2227_v35 }
  0xde   : > { %v390_v47 = vpop.permute.xlu1 %389 }
  0xdf   : > { %832 = vperm.xlu1 %1976, %v2482_v1   ;;  %v393_v52 = vsel %vm392_vm0, %v387_v49, %v390_v47 }
  0xe0   : > { %v398_v54 = vmul.f32 %v2615_v50, %v393_v52  ;;  %v412_v57 = vpop.permute.xlu0 %411 }
  0xe2   : > { %v432_v51 = vpop.permute.xlu1 %431  ;;  %v407_v58 = vrot.slane %v398_v54, %v2608_v46  ;;  %v427_v14 = vrot.slane %v398_v54, %v2633_v2 }
  0xe3   : > { %1977 = vset.pattern.permute.xlu1 %v2238_v53 }
  0xe4   : > { %842 = vperm.xlu1 %1977, %v2482_v1   ;;  %v408_v61 = vmul.f32 %v407_v58, %v402_v40  ;;  %v441_v62 = vpop.permute.xlu0 %440  ;;  %v417_v1 = vrot.slane %v398_v54, %v2627_v60  ;;  %v428_v31 = vmul.f32 %v427_v14, %v422_v43  ;;  %v2656_v43 = vrot.slane %v2610_v48, %v2633_v2 }
  0xe6   : > { %v444_v55 = vpop.permute.xlu1 %443 }
  0xe7   : > { %v447_v4 = vsel %vm446_vm1, %v441_v62, %v444_v55 }
  0xe8   : > { %1979 = vset.pattern.permute.xlu1 %v2187_v0  ;;  %v409_v0 = vadd.f32 %v408_v61, %v383_v45  ;;  %v455_v16 = vpop.permute.xlu0 %454  ;;  %v452_v24 = vmul.f32 %v2637_v3, %v447_v4 }
  0xe9   : > { %856 = vperm.xlu1 %1979, %v853_v56  }
  0xea   : > { %v465_v59 = vpop.permute.xlu1 %464  ;;  %v460_v40 = vrot.slane %v452_v24, %v2608_v46  ;;  %v490_v4 = vrot.slane %v452_v24, %v2643_v10 }
  0xec   : > { %v461_v52 = vmul.f32 %v460_v40, %v455_v16 }
  0xed   : > { %1980 = vset.pattern.permute.xlu1 %v2190_v7  ;;  %v418_v7 = vmul.f32 %v417_v1, %v412_v57  ;;  %v485_v41 = vpop.permute.xlu0 %484  ;;  %v480_v57 = vrot.slane %v452_v24, %v2633_v2 }
  0xee   : > { %880 = vperm.xlu1 %1980, %v2566_v33   ;;  %v491_v14 = vmul.f32 %v490_v4, %v485_v41 }
  0xef   : > { %v475_v63 = vpop.permute.xlu1 %474  ;;  %v419_v20 = vadd.f32 %v418_v7, %v409_v0 }
  0xf0   : > { %v481_v62 = vmul.f32 %v480_v57, %v475_v63 }
  0xf1   : > { %v429_v35 = vadd.f32 %v428_v31, %v419_v20  ;;  %v497_v55 = vpop.permute.xlu0 %496  ;;  %v2671_v20 = vrot.slane %v2610_v48, %v2643_v10 }
  0xf2   : > { %1982 = vset.pattern.permute.xlu1 %v2192_v8  ;;  %v437_v8 = vrot.slane %v398_v54, %v2643_v10 }
  0xf3   : > { %v494_v6 = vpop.permute.xlu1 %493  ;;  %900 = vperm.xlu1 %1982, %v2566_v33  }
  0xf4   : > { %v438_v45 = vmul.f32 %v437_v8, %v432_v51  ;;  %v500_v54 = vsel %vm499_vm2, %v494_v6, %v497_v55 }
  0xf5   : > { %v505_v58 = vmul.f32 %v2656_v43, %v500_v54  ;;  %v528_v1 = vpop.permute.xlu0 %527 }
  0xf6   : > { %v439_v49 = vadd.f32 %v438_v45, %v429_v35 }
  0xf7   : > { %v508_v27 = vpop.permute.xlu1 %507  ;;  %1983 = vset.pattern.permute.xlu1 %v2194_v9  ;;  %v470_v9 = vrot.slane %v452_v24, %v2627_v60  ;;  %v523_v63 = vrot.slane %v505_v58, %v2627_v60  ;;  %v533_v40 = vrot.slane %v505_v58, %v2633_v2 }
  0xf8   : > { %910 = vperm.xlu1 %1983, %v2566_v33   ;;  %v462_v51 = vadd.f32 %v461_v52, %v439_v49  ;;  %v543_v49 = vrot.slane %v505_v58, %v2643_v10 }
  0xf9   : > { %v534_v45 = vmul.f32 %v533_v40, %v528_v1 }
  0xfc   : > { %v518_v47 = vpop.permute.xlu1 %517  ;;  %1985 = vset.pattern.permute.xlu1 %v2198_v12  ;;  %v471_v12 = vmul.f32 %v470_v9, %v465_v59  ;;  %v547_v59 = vpop.permute.xlu0 %546 }
  0xfd   : > { %930 = vperm.xlu1 %1985, %v2566_v33   ;;  %v524_v31 = vmul.f32 %v523_v63, %v518_v47 }
  0xfe   : > { %v472_v61 = vadd.f32 %v471_v12, %v462_v51 }
 0x100   : > { %v482_v6 = vadd.f32 %v481_v62, %v472_v61  ;;  %v571_v12 = vpop.permute.xlu0 %570 }
 0x101   : > { %v538_v56 = vpop.permute.xlu1 %537  ;;  %1986 = vset.pattern.permute.xlu1 %v2197_v11  ;;  %v513_v11 = vrot.slane %v505_v58, %v2608_v46 }
 0x102   : > { %940 = vperm.xlu1 %1986, %v2566_v33   ;;  %v492_v24 = vadd.f32 %v491_v14, %v482_v6  ;;  %v544_v55 = vmul.f32 %v543_v49, %v538_v56 }
 0x103   : > { %v514_v16 = vmul.f32 %v513_v11, %v508_v27 }
 0x105   : > { %v515_v35 = vadd.f32 %v514_v16, %v492_v24 }
 0x106   : > { %v561_v0 = vpop.permute.xlu1 %560  ;;  %1989 = vset.pattern.permute.xlu1 %v2200_v13 }
 0x107   : > { %978 = vperm.xlu1 %1989, %v2566_v33   ;;  %v525_v27 = vadd.f32 %v524_v31, %v515_v35 }
 0x109   : > { %v535_v47 = vadd.f32 %v534_v45, %v525_v27 }
 0x10a   : > { %v550_v7 = vpop.permute.xlu1 %549 }
 0x10b   : > { %1990 = vset.pattern.permute.xlu1 %v2207_v18  ;;  %v553_v13 = vsel %vm552_vm3, %v547_v59, %v550_v7  ;;  %v545_v51 = vadd.f32 %v544_v55, %v535_v47  ;;  %v2693_v7 = vsub.s32 5, %v2603_v44 }
 0x10c   : > { %988 = vperm.xlu1 %1990, %v2566_v33   ;;  %v558_v18 = vmul.f32 %v2671_v20, %v553_v13  ;;  %v616_v13 = vrot.slane %v2488_v5, %v2627_v60 }
 0x10d   : > { %v2701_v24 = vrot.slane %v2610_v48, %v2693_v7 }
 0x10e   : > { %v581_v8 = vpop.permute.xlu1 %580  ;;  %v566_v52 = vrot.slane %v558_v18, %v2608_v46  ;;  %v586_v61 = vrot.slane %v558_v18, %v2633_v2  ;;  %v596_v6 = vrot.slane %v558_v18, %v2643_v10 }
 0x110   : > { %1992 = vset.pattern.permute.xlu1 %v2204_v15  ;;  %v567_v9 = vmul.f32 %v566_v52, %v561_v0  ;;  %v576_v15 = vrot.slane %v558_v18, %v2627_v60  ;;  %v587_v1 = vmul.f32 %v586_v61, %v581_v8 }
 0x111   : > { %1008 = vperm.xlu1 %1992, %v2566_v33  }
 0x112   : > { %v568_v57 = vadd.f32 %v567_v9, %v545_v51  ;;  %v577_v62 = vmul.f32 %v576_v15, %v571_v12  ;;  %v2715_v9 = vsub.s32 6, %v2603_v44 }
 0x113   : > { %v591_v41 = vpop.permute.xlu1 %590 }
 0x114   : > { %v578_v56 = vadd.f32 %v577_v62, %v568_v57  ;;  %v2722_v15 = vrot.slane %v2610_v48, %v2715_v9 }
 0x115   : > { %1993 = vset.pattern.permute.xlu1 %v2213_v22  ;;  %v601_v22 = vpop.permute.xlu0 %600 }
 0x116   : > { %1018 = vperm.xlu1 %1993, %v2566_v33   ;;  %v588_v11 = vadd.f32 %v587_v1, %v578_v56 }
 0x118   : > { %v611_v54 = vpop.permute.xlu1 %610 }
 0x119   : > { %v631_v0 = vpop.permute.xlu0 %630  ;;  %v617_v40 = vmul.f32 %v616_v13, %v611_v54 }
 0x11a   : > { %1995 = vset.pattern.permute.xlu1 %v2206_v17  ;;  %v606_v17 = vrot.slane %v2488_v5, %v2608_v46 }
 0x11b   : > { %1046 = vperm.xlu1 %1995, %v2566_v33  }
 0x11c   : > { %v607_v63 = vmul.f32 %v606_v17, %v601_v22 }
 0x11d   : > { %v621_v58 = vpop.permute.xlu1 %620  ;;  %v643_v14 = vpop.permute.xlu0 %642 }
 0x11f   : > { %1996 = vset.pattern.permute.xlu1 %v2217_v25  ;;  %v597_v25 = vmul.f32 %v596_v6, %v591_v41  ;;  %v636_v41 = vrot.slane %v2488_v5, %v2643_v10 }
 0x120   : > { %1056 = vperm.xlu1 %1996, %v2566_v33  }
 0x121   : > { %v598_v16 = vadd.f32 %v597_v25, %v588_v11  ;;  %v637_v47 = vmul.f32 %v636_v41, %v631_v0  ;;  %v674_v55 = vpop.permute.xlu0 %673 }
 0x122   : > { %v654_v4 = vpop.permute.xlu1 %653 }
 0x123   : > { %v608_v35 = vadd.f32 %v607_v63, %v598_v16 }
 0x124   : > { %1998 = vset.pattern.permute.xlu1 %v2208_v19  ;;  %v626_v19 = vrot.slane %v2488_v5, %v2633_v2 }
 0x125   : > { %1076 = vperm.xlu1 %1998, %v2566_v33   ;;  %v693_v12 = vpop.permute.xlu0 %692 }
 0x126   : > { %v640_v59 = vpop.permute.xlu1 %639  ;;  %v627_v27 = vmul.f32 %v626_v19, %v621_v58 }
 0x127   : > { %v646_v31 = vsel %vm645_vm4, %v640_v59, %v643_v14 }
 0x128   : > { %v651_v18 = vmul.f32 %v2701_v24, %v646_v31 }
 0x129   : > { %1999 = vset.pattern.permute.xlu1 %v2221_v29  ;;  %v618_v29 = vadd.f32 %v617_v40, %v608_v35  ;;  %v717_v63 = vpop.permute.xlu0 %716 }
 0x12a   : > { %v664_v8 = vpop.permute.xlu1 %663  ;;  %1086 = vperm.xlu1 %1999, %v2566_v33   ;;  %v659_v49 = vrot.slane %v651_v18, %v2608_v46  ;;  %v679_v62 = vrot.slane %v651_v18, %v2633_v2  ;;  %v689_v6 = vrot.slane %v651_v18, %v2643_v10 }
 0x12b   : > { %v628_v52 = vadd.f32 %v627_v27, %v618_v29 }
 0x12c   : > { %v660_v54 = vmul.f32 %v659_v49, %v654_v4  ;;  %v680_v0 = vmul.f32 %v679_v62, %v674_v55 }
 0x12d   : > { %v638_v5 = vadd.f32 %v637_v47, %v628_v52  ;;  %v760_v49 = vpop.permute.xlu0 %759 }
 0x12e   : > { %2001 = vset.pattern.permute.xlu1 %v2211_v21  ;;  %v669_v21 = vrot.slane %v651_v18, %v2627_v60 }
 0x12f   : > { %v684_v45 = vpop.permute.xlu1 %683  ;;  %1106 = vperm.xlu1 %2001, %v2566_v33   ;;  %v661_v57 = vadd.f32 %v660_v54, %v638_v5 }
 0x130   : > { %v690_v25 = vmul.f32 %v689_v6, %v684_v45 }
 0x133   : > { %2002 = vset.pattern.permute.xlu1 %v2226_v34  ;;  %v670_v34 = vmul.f32 %v669_v21, %v664_v8 }
 0x134   : > { %v707_v51 = vpop.permute.xlu1 %706  ;;  %1116 = vperm.xlu1 %2002, %v2566_v33  }
 0x135   : > { %v671_v56 = vadd.f32 %v670_v34, %v661_v57 }
 0x137   : > { %v681_v11 = vadd.f32 %v680_v0, %v671_v56  ;;  %v2745_v56 = vld [vmem:[#allocation5 + $0x8] ss:$0 sm:$0xff] }
 0x138   : > { %v696_v58 = vpop.permute.xlu1 %695  ;;  %2005 = vset.pattern.permute.xlu1 %v2229_v36  ;;  %v2731_v36 = vsub.s32 7, %v2603_v44 }
 0x139   : > { %v699_v61 = vsel %vm698_vm5, %v693_v12, %v696_v58  ;;  %v691_v14 = vadd.f32 %v690_v25, %v681_v11  ;;  %v770_v12 = vpop.permute.xlu0 %769 }
 0x13a   : > { %v704_v22 = vmul.f32 %v2722_v15, %v699_v61  ;;  %v2736_v19 = vrot.slane %v2610_v48, %v2731_v36 }
 0x13c   : > { %v727_v1 = vpop.permute.xlu1 %726  ;;  %v712_v4 = vrot.slane %v704_v22, %v2608_v46  ;;  %v722_v16 = vrot.slane %v704_v22, %v2627_v60  ;;  %v732_v8 = vrot.slane %v704_v22, %v2633_v2  ;;  %v742_v55 = vrot.slane %v704_v22, %v2643_v10 }
 0x13e   : > { %v713_v59 = vmul.f32 %v712_v4, %v707_v51  ;;  %v723_v35 = vmul.f32 %v722_v16, %v717_v63  ;;  %v733_v45 = vmul.f32 %v732_v8, %v727_v1  ;;  %v813_v1 = vpop.permute.xlu0 %812 }
 0x140   : > { %v714_v31 = vadd.f32 %v713_v59, %v691_v14 }
 0x141   : > { %v737_v17 = vpop.permute.xlu1 %736 }
 0x142   : > { %v724_v18 = vadd.f32 %v723_v35, %v714_v31  ;;  %v743_v54 = vmul.f32 %v742_v55, %v737_v17  ;;  %v823_v63 = vpop.permute.xlu0 %822 }
 0x144   : > { %v734_v47 = vadd.f32 %v733_v45, %v724_v18 }
 0x145   : > { %v746_v13 = vpop.permute.xlu1 %745 }
 0x146   : > { %v744_v51 = vadd.f32 %v743_v54, %v734_v47  ;;  %v2239_v54 = vmov 37  }
 0x149   : > { %v749_v40 = vpop.permute.xlu1 %748 }
 0x14a   : > { %v752_v27 = vsel %vm751_vm6, %v746_v13, %v749_v40 }
 0x14b   : > { %v757_v41 = vmul.f32 %v2736_v19, %v752_v27 }
 0x14d   : > { %v765_v29 = vrot.slane %v757_v41, %v2608_v46  ;;  %v780_v52 = vpop.permute.xlu1 %779  ;;  %v775_v5 = vrot.slane %v757_v41, %v2627_v60  ;;  %v785_v58 = vrot.slane %v757_v41, %v2633_v2  ;;  %v795_v6 = vrot.slane %v757_v41, %v2643_v10 }
 0x14f   : > { %v766_v48 = vmul.f32 %v765_v29, %v760_v49  ;;  %v776_v61 = vmul.f32 %v775_v5, %v770_v12  ;;  %v786_v0 = vmul.f32 %v785_v58, %v780_v52  ;;  %v2244_v5 = vmov 36   ;;  %v2818_v12 = vpop.permute.xlu0 %870 }
 0x151   : > { %v767_v57 = vadd.f32 %v766_v48, %v744_v51  ;;  %v2240_v48 = vmov 40  }
 0x152   : > { %v790_v21 = vpop.permute.xlu1 %789 }
 0x153   : > { %v777_v62 = vadd.f32 %v776_v61, %v767_v57  ;;  %v796_v25 = vmul.f32 %v795_v6, %v790_v21  ;;  %v2247_v57 = vmov 53   ;;  %v2825_v61 = vpop.permute.xlu0 %890 }
 0x155   : > { %v787_v11 = vadd.f32 %v786_v0, %v777_v62  ;;  %v2249_v62 = vmov 56  }
 0x156   : > { %v799_v34 = vpop.permute.xlu1 %798 }
 0x157   : > { %v797_v13 = vadd.f32 %v796_v25, %v787_v11  ;;  %v2831_v0 = vpop.permute.xlu0 %920 }
 0x15a   : > { %v802_v4 = vpop.permute.xlu1 %801 }
 0x15b   : > { %v805_v22 = vsel %vm804_vm7, %v799_v34, %v802_v4  ;;  %v2248_v34 = vmov 39   ;;  %v2250_v4 = vmov 42   ;;  %v2840_v6 = vpop.permute.xlu0 %958 }
 0x15c   : > { %v810_v17 = vmul.f32 %v2745_v56, %v805_v22  ;;  %v2251_v22 = vmov 57  }
 0x15e   : > { %v818_v59 = vrot.slane %v810_v17, %v2608_v46  ;;  %v833_v14 = vpop.permute.xlu1 %832  ;;  %v828_v16 = vrot.slane %v810_v17, %v2627_v60  ;;  %v838_v8 = vrot.slane %v810_v17, %v2633_v2  ;;  %v848_v41 = vrot.slane %v810_v17, %v2643_v10 }
 0x15f   : > { %v2252_v17 = vmov 60  }
 0x160   : > { %v819_v31 = vmul.f32 %v818_v59, %v813_v1  ;;  %v829_v40 = vmul.f32 %v828_v16, %v823_v63  ;;  %v839_v27 = vmul.f32 %v838_v8, %v833_v14  ;;  %v2846_v59 = vpop.permute.xlu0 %968  ;;  %v2253_v14 = vmov 63  }
 0x161   : > { %v2254_v16 = vmov 43   ;;  %v2255_v63 = vmov 45   ;;  %v2256_v8 = vmov 66  }
 0x162   : > { %v820_v35 = vadd.f32 %v819_v31, %v797_v13 }
 0x163   : > { %v843_v18 = vpop.permute.xlu1 %842 }
 0x164   : > { %v830_v45 = vadd.f32 %v829_v40, %v820_v35  ;;  %v849_v49 = vmul.f32 %v848_v41, %v843_v18  ;;  %v2854_v31 = vpop.permute.xlu0 %998  ;;  %v2257_v35 = vmov 46  }
 0x166   : > { %v840_v29 = vadd.f32 %v839_v27, %v830_v45  ;;  %v2258_v27 = vmov 69   ;;  %v2259_v45 = vmov 48  }
 0x168   : > { %v850_v52 = vadd.f32 %v849_v49, %v840_v29  ;;  %v2775_v55 = vpop.permute.xlu1 %856  ;;  %v2861_v18 = vpop.permute.xlu0 %1028  ;;  %v2260_v49 = vmov 71  }
 0x16a   : > { %v2754_v47 = vmax.f32 %v850_v52, 0.0  ;;  %v2261_v52 = vmov 49  }
 0x16c   : > { %863 = vrot.lane.b32.xlu0 %v2754_v47, %s2191_s22  ;;  %860 = vrot.lane.b32.xlu1 %v2754_v47, %s2189_s21  ;;  %s3112_s21 = smov 63   ;;  %s3113_s22 = smov 55   ;;  %v2867_v29 = vpop.permute.xlu0 %1066 }
 0x170   : > { %1040 = vrot.lane.b32.xlu0 %v2754_v47, %s2199_s17  ;;  %949 = vrot.lane.b32.xlu1 %v2754_v47, %s2193_s26  ;;  %s3114_s26 = smov 121   ;;  %s3116_s17 = smov 56  }
 0x174   : > { %1134 = vperm.xlu0 %2003, %v2566_v33   ;;  %952 = vrot.lane.b32.xlu1 %v2754_v47, %s2195_s10  ;;  %s3115_s10 = smov 120  }
 0x178   : > { %2004 = vset.pattern.permute.xlu0 %v2215_v23  ;;  %1037 = vrot.lane.b32.xlu1 %v2754_v47, %s2201_s11  ;;  %v2782_v23 = vpop.permute.xlu1 %880 }
 0x179   : > { %1144 = vperm.xlu0 %2004, %v2566_v33  }
 0x17c   : > { %1125 = vrot.lane.b32.xlu1 %v2754_v47, %s2203_s18 }
 0x17d   : > { %2007 = vset.pattern.permute.xlu0 %v2218_v26  ;;  %v2788_v26 = vpop.permute.xlu1 %900 }
 0x17e   : > { %1174 = vperm.xlu0 %2007, %v2566_v33  }
 0x180   : > { %1128 = vrot.lane.b32.xlu1 %v2754_v47, %s2212_s14  ;;  %s1785_s14 = sshll.u32 %s2473_s13, 3  ;;  %s1783_s13 = sshll.u32 %s2457_s20, 3 }
 0x181   : > { %s366_s15 = scalar_lea.vmem %s3082_s2, %s1785_s14 }
 0x182   : > { %2010 = vset.pattern.permute.xlu0 %v2234_v39  ;;  %v2793_v39 = vpop.permute.xlu1 %910 }
 0x183   : > { %1204 = vperm.xlu0 %2010, %v2566_v33  }
 0x184   : > { %1154 = vperm.xlu1 %2005, %v2566_v33  }
 0x187   : > { %2013 = vset.pattern.permute.xlu0 %v2236_v42  ;;  %v2798_v42 = vpop.permute.xlu1 %930 }
 0x188   : > { %1234 = vperm.xlu0 %2013, %v2566_v33   ;;  %2006 = vset.pattern.permute.xlu1 %v2230_v37  ;;  %v2241_v37 = vmov 41  }
 0x189   : > { %1164 = vperm.xlu1 %2006, %v2566_v33  }
 0x18b   : > { %v2805_v51 = vpop.permute.xlu1 %940 }
 0x18c   : > { %2016 = vset.pattern.permute.xlu0 %v2239_v54 }
 0x18d   : > { %1264 = vperm.xlu0 %2016, %v2566_v33   ;;  %2008 = vset.pattern.permute.xlu1 %v2220_v28  ;;  %v2242_v28 = vmov 44  }
 0x18e   : > { %1184 = vperm.xlu1 %2008, %v2566_v33  }
 0x191   : > { %2019 = vset.pattern.permute.xlu0 %v2240_v48  ;;  %v2874_v48 = vpop.permute.xlu0 %1096 }
 0x192   : > { %1302 = vperm.xlu0 %2019, %v2566_v33   ;;  %2009 = vset.pattern.permute.xlu1 %v2232_v38  ;;  %v2243_v38 = vmov 47  }
 0x193   : > { %1194 = vperm.xlu1 %2009, %v2566_v33  }
 0x196   : > { %2020 = vset.pattern.permute.xlu0 %v2241_v37  ;;  %v2262_v37 = vmov 51  }
 0x197   : > { %1312 = vperm.xlu0 %2020, %v2566_v33   ;;  %2011 = vset.pattern.permute.xlu1 %v2222_v30  ;;  %v2811_v30 = vpop.permute.xlu1 %978 }
 0x198   : > { %1214 = vperm.xlu1 %2011, %v2566_v33  }
 0x19b   : > { %2023 = vset.pattern.permute.xlu0 %v2242_v28  ;;  %v2816_v21 = vpop.permute.xlu1 %988 }
 0x19c   : > { %1342 = vperm.xlu0 %2023, %v2566_v33   ;;  %2012 = vset.pattern.permute.xlu1 %v2225_v32  ;;  %v2245_v32 = vmov 50  }
 0x19d   : > { %1224 = vperm.xlu1 %2012, %v2566_v33  }
 0x19f   : > { %v2823_v58 = vpop.permute.xlu1 %1008 }
 0x1a0   : > { %2026 = vset.pattern.permute.xlu0 %v2243_v38 }
 0x1a1   : > { %1372 = vperm.xlu0 %2026, %v2566_v33   ;;  %2014 = vset.pattern.permute.xlu1 %v2238_v53  ;;  %v2246_v53 = vmov 38  }
 0x1a2   : > { %1244 = vperm.xlu1 %2014, %v2566_v33  }
 0x1a3   : > { %v2829_v1 = vpop.permute.xlu1 %1018 }
 0x1a5   : > { %1384 = vrot.lane.b32.xlu0 %v2754_v47, %s2228_s16 }
 0x1a6   : > { %2015 = vset.pattern.permute.xlu1 %v2244_v5  ;;  %2029 = vset.pattern.permute.xlu0 %v2245_v32 }
 0x1a7   : > { %1254 = vperm.xlu1 %2015, %v2566_v33   ;;  %v2838_v11 = vpop.permute.xlu1 %1046 }
 0x1a9   : > { %1410 = vperm.xlu0 %2029, %v2566_v33  }
 0x1ab   : > { %2017 = vset.pattern.permute.xlu1 %v2246_v53  ;;  %v2844_v25 = vpop.permute.xlu1 %1056 }
 0x1ac   : > { %1274 = vperm.xlu1 %2017, %v2566_v33  }
 0x1ad   : > { %2032 = vset.pattern.permute.xlu0 %v2247_v57 }
 0x1ae   : > { %1440 = vperm.xlu0 %2032, %v2566_v33  }
 0x1af   : > { %v2852_v13 = vpop.permute.xlu1 %1076 }
 0x1b0   : > { %2018 = vset.pattern.permute.xlu1 %v2248_v34  ;;  %v2263_v34 = vmov 52  }
 0x1b1   : > { %1284 = vperm.xlu1 %2018, %v2566_v33  }
 0x1b2   : > { %2035 = vset.pattern.permute.xlu0 %v2249_v62 }
 0x1b3   : > { %1478 = vperm.xlu0 %2035, %v2566_v33   ;;  %v2859_v40 = vpop.permute.xlu1 %1086 }
 0x1b5   : > { %1293 = vrot.lane.b32.xlu1 %v2754_v47, %s2223_s25 }
 0x1b6   : > { %2021 = vset.pattern.permute.xlu1 %v2250_v4 }
 0x1b7   : > { %2036 = vset.pattern.permute.xlu0 %v2251_v22  ;;  %v2865_v41 = vpop.permute.xlu1 %1106 }
 0x1b8   : > { %1488 = vperm.xlu0 %2036, %v2566_v33  }
 0x1b9   : > { %1296 = vrot.lane.b32.xlu1 %v2754_v47, %s3112_s21  ;;  %s358_s21 = scalar_lea.vmem [#allocation7], %s1783_s13 }
 0x1bb   : > { %v2872_v54 = vpop.permute.xlu1 %1116 }
 0x1bc   : > { %2039 = vset.pattern.permute.xlu0 %v2252_v17  ;;  %v2886_v17 = vsub.s32 4, %v2603_v44 }
 0x1bd   : > { %1518 = vperm.xlu0 %2039, %v2566_v33   ;;  %1322 = vperm.xlu1 %2021, %v2566_v33  }
 0x1c1   : > { %2042 = vset.pattern.permute.xlu0 %v2253_v14  ;;  %2022 = vset.pattern.permute.xlu1 %v2254_v16 }
 0x1c2   : > { %1548 = vperm.xlu0 %2042, %v2566_v33   ;;  %1332 = vperm.xlu1 %2022, %v2566_v33  }
 0x1c6   : > { %1560 = vrot.lane.b32.xlu0 %v2754_v47, %s3113_s22  ;;  %2024 = vset.pattern.permute.xlu1 %v2255_v63  ;;  %s1675_s22 = sshll.u32 %s358_s21, 4  ;;  %s3033_s22 = int_to_ptr.vmem [resolvable:$true] %s1675_s22 }
 0x1c7   : > { %1352 = vperm.xlu1 %2024, %v2566_v33   ;;  %2045 = vset.pattern.permute.xlu0 %v2256_v8  ;;  %v2264_v8 = vmov 54   ;;  %s2111_s14 = scalar_lea.vmem %s3033_s22, 128 }
 0x1c8   : > { %p2112_p6 = scmp.ne.s32.totalorder %s3033_s22, %s2111_s14 }
 0x1ca   : > { %1586 = vperm.xlu0 %2045, %v2566_v33   ;;  %p2113_p8 = pnand %p2112_p6, %p2412_p12 }
 0x1cb   : > { %2025 = vset.pattern.permute.xlu1 %v2257_v35 }
 0x1cc   : > { %1362 = vperm.xlu1 %2025, %v2566_v33   ;;  %p2114_p10 = pneg %p2113_p8 }
 0x1ce   : > { %2048 = vset.pattern.permute.xlu0 %v2258_v27 }
 0x1cf   : > { %1616 = vperm.xlu0 %2048, %v2566_v33  }
 0x1d0   : > { %2027 = vset.pattern.permute.xlu1 %v2259_v45 }
 0x1d1   : > { %1390 = vperm.xlu1 %2027, %v2566_v33  }
 0x1d3   : > { %2051 = vset.pattern.permute.xlu0 %v2260_v49 }
 0x1d5   : > { %1381 = vrot.lane.b32.xlu1 %v2754_v47, %s3114_s26  ;;  %s1789_s26 = sshll.u32 %s2342_s9, 7  ;;  %s2275_s9 = smov [#allocation7]  }
 0x1d6   : > { %2028 = vset.pattern.permute.xlu1 %v2261_v52  ;;  %s3038_s18 = scalar_lea.hbm %s3088_s8, %s1789_s26  ;;  %s2115_s25 = sshll.u32 %s2275_s9, 4  ;;  %s2116_s25 = int_to_ptr.vmem [resolvable:$false] %s2115_s25 }
 0x1d7   : > { %s2117_s16 = scalar_lea.vmem %s2116_s25, 256  ;;  %p2118_p13 = scmp.lt.s32.totalorder %s3033_s22, %s2116_s25 }
 0x1d8   : > { %p2119_p3 = scmp.lt.s32.totalorder %s2117_s16, %s2111_s14 }
 0x1d9   : > { %1400 = vperm.xlu1 %2028, %v2566_v33  }
 0x1da   : > { %p2120_p7 = por %p2119_p3, %p2118_p13 }
 0x1dc   : > { %p2121_p9 = pnand %p2120_p7, %p2114_p10 }
 0x1dd   : > { %2030 = vset.pattern.permute.xlu1 %v2262_v37 }
 0x1de   : > { %v864_v28 = vpop.permute.xlu0 %863  ;;  %1420 = vperm.xlu1 %2030, %v2566_v33   ;;  %v861_v38 = vpop.permute.xlu1 %860 }
 0x1df   : > { %v866_v5 = vsel %vm392_vm0, %v861_v38, %v864_v28 }
 0x1e0   : > { %v867_v32 = vmul.f32 %v866_v5, %v2615_v50  ;;  %v2265_v5 = vmov 55  }
 0x1e2   : > { %v876_v53 = vrot.slane %v867_v32, %v2608_v46  ;;  %v886_v57 = vrot.slane %v867_v32, %v2627_v60  ;;  %2031 = vset.pattern.permute.xlu1 %v2263_v34  ;;  %v950_v62 = vpop.permute.xlu1 %949  ;;  %v896_v22 = vrot.slane %v867_v32, %v2633_v2  ;;  %v906_v16 = vrot.slane %v867_v32, %v2643_v10 }
 0x1e3   : > { %1430 = vperm.xlu1 %2031, %v2566_v33   ;;  %v916_v45 = vrot.slane %v867_v32, %v2886_v17  ;;  %v936_v28 = vrot.slane %v867_v32, %v2715_v9 }
 0x1e4   : > { %v877_v4 = vmul.f32 %v876_v53, %v2818_v12  ;;  %v887_v50 = vmul.f32 %v886_v57, %v2782_v23  ;;  %v897_v27 = vmul.f32 %v896_v22, %v2825_v61  ;;  %v907_v52 = vmul.f32 %v906_v16, %v2788_v26 }
 0x1e5   : > { %v917_v37 = vmul.f32 %v916_v45, %v2793_v39  ;;  %v946_v57 = vrot.slane %v867_v32, %v2731_v36  ;;  %v937_v26 = vmul.f32 %v936_v28, %v2798_v42  ;;  %v2266_v22 = vmov 58  }
 0x1e6   : > { %v878_v14 = vadd.f32 %v877_v4, %v2775_v55  ;;  %v953_v63 = vpop.permute.xlu1 %952  ;;  %v926_v55 = vrot.slane %v867_v32, %v2693_v7 }
 0x1e7   : > { %2033 = vset.pattern.permute.xlu1 %v2264_v8  ;;  %v955_v12 = vsel %vm446_vm1, %v950_v62, %v953_v63  ;;  %v1041_v8 = vpop.permute.xlu0 %1040 }
 0x1e8   : > { %v888_v35 = vadd.f32 %v887_v50, %v878_v14  ;;  %1450 = vperm.xlu1 %2033, %v2566_v33   ;;  %v956_v38 = vmul.f32 %v955_v12, %v2637_v3  ;;  %v927_v53 = vmul.f32 %v926_v55, %v2831_v0  ;;  %v947_v3 = vmul.f32 %v946_v57, %v2805_v51 }
 0x1ea   : > { %v898_v44 = vadd.f32 %v897_v27, %v888_v35  ;;  %v964_v62 = vrot.slane %v956_v38, %v2608_v46  ;;  %v974_v4 = vrot.slane %v956_v38, %v2627_v60  ;;  %v1038_v14 = vpop.permute.xlu1 %1037  ;;  %v984_v32 = vrot.slane %v956_v38, %v2633_v2 }
 0x1eb   : > { %v994_v63 = vrot.slane %v956_v38, %v2643_v10  ;;  %v1004_v27 = vrot.slane %v956_v38, %v2886_v17  ;;  %v1043_v45 = vsel %vm499_vm2, %v1038_v14, %v1041_v8  ;;  %v2269_v14 = vmov 62  }
 0x1ec   : > { %v908_v23 = vadd.f32 %v907_v52, %v898_v44  ;;  %2034 = vset.pattern.permute.xlu1 %v2265_v5  ;;  %v965_v0 = vmul.f32 %v964_v62, %v2840_v6  ;;  %v975_v16 = vmul.f32 %v974_v4, %v2846_v59  ;;  %v985_v35 = vmul.f32 %v984_v32, %v2811_v30 }
 0x1ed   : > { %1460 = vperm.xlu1 %2034, %v2566_v33   ;;  %v995_v44 = vmul.f32 %v994_v63, %v2816_v21  ;;  %v1014_v52 = vrot.slane %v956_v38, %v2693_v7  ;;  %v1044_v59 = vmul.f32 %v1043_v45, %v2656_v43  ;;  %v2267_v30 = vmov 59  }
 0x1ee   : > { %v918_v61 = vadd.f32 %v917_v37, %v908_v23  ;;  %v1126_v6 = vpop.permute.xlu1 %1125  ;;  %v1005_v23 = vmul.f32 %v1004_v27, %v2854_v31  ;;  %v1024_v37 = vrot.slane %v956_v38, %v2715_v9  ;;  %v2268_v62 = vmov 61  }
 0x1ef   : > { %v1015_v5 = vmul.f32 %v1014_v52, %v2823_v58  ;;  %v1052_v43 = vrot.slane %v1044_v59, %v2608_v46  ;;  %v1092_v32 = vrot.slane %v1044_v59, %v2886_v17 }
 0x1f0   : > { %v928_v34 = vadd.f32 %v927_v53, %v918_v61  ;;  %v1034_v61 = vrot.slane %v956_v38, %v2731_v36  ;;  %v1025_v57 = vmul.f32 %v1024_v37, %v2829_v1 }
 0x1f1   : > { %1469 = vrot.lane.b32.xlu1 %v2754_v47, %s3115_s10  ;;  %v1053_v38 = vmul.f32 %v1052_v43, %v2838_v11  ;;  %v1093_v8 = vmul.f32 %v1092_v32, %v2859_v40 }
 0x1f2   : > { %v938_v39 = vadd.f32 %v937_v26, %v928_v34  ;;  %2037 = vset.pattern.permute.xlu1 %v2266_v22  ;;  %v1129_v53 = vpop.permute.xlu1 %1128  ;;  %v1035_v31 = vmul.f32 %v1034_v61, %v2861_v18  ;;  %v1062_v26 = vrot.slane %v1044_v59, %v2627_v60  ;;  %v1082_v22 = vrot.slane %v1044_v59, %v2643_v10 }
 0x1f3   : > { %v1135_v27 = vpop.permute.xlu0 %1134 }
 0x1f4   : > { %v948_v50 = vadd.f32 %v947_v3, %v938_v39  ;;  %v1072_v3 = vrot.slane %v1044_v59, %v2633_v2  ;;  %v1063_v1 = vmul.f32 %v1062_v26, %v2844_v25 }
 0x1f5   : > { %1472 = vrot.lane.b32.xlu1 %v2754_v47, %s3116_s17 }
 0x1f6   : > { %v966_v42 = vadd.f32 %v965_v0, %v948_v50  ;;  %v1073_v0 = vmul.f32 %v1072_v3, %v2867_v29  ;;  %v1131_v50 = vsel %vm552_vm3, %v1126_v6, %v1129_v53 }
 0x1f7   : > { %v1132_v63 = vmul.f32 %v1131_v50, %v2671_v20 }
 0x1f8   : > { %v976_v51 = vadd.f32 %v975_v16, %v966_v42  ;;  %v1083_v42 = vmul.f32 %v1082_v22, %v2852_v13  ;;  %v1102_v16 = vrot.slane %v1044_v59, %v2693_v7  ;;  %v1122_v13 = vrot.slane %v1044_v59, %v2731_v36 }
 0x1f9   : > { %1498 = vperm.xlu1 %2037, %v2566_v33   ;;  %v1140_v20 = vrot.slane %v1132_v63, %v2608_v46  ;;  %v1160_v61 = vrot.slane %v1132_v63, %v2633_v2  ;;  %v1170_v43 = vrot.slane %v1132_v63, %v2643_v10  ;;  %v1190_v3 = vrot.slane %v1132_v63, %v2693_v7 }
 0x1fa   : > { %v986_v12 = vadd.f32 %v985_v35, %v976_v51  ;;  %v1112_v51 = vrot.slane %v1044_v59, %v2715_v9  ;;  %v2270_v35 = vmov 64   ;;  %v1103_v6 = vmul.f32 %v1102_v16, %v2874_v48 }
 0x1fb   : > { %v1220_v16 = vrot.slane %v2754_v47, %v2608_v46 }
 0x1fc   : > { %v996_v55 = vadd.f32 %v995_v44, %v986_v12  ;;  %v1113_v52 = vmul.f32 %v1112_v51, %v2865_v41 }
 0x1fd   : > { %2038 = vset.pattern.permute.xlu1 %v2267_v30  ;;  %v2271_v30 = vmov 65  }
 0x1fe   : > { %v1006_v28 = vadd.f32 %v1005_v23, %v996_v55  ;;  %1508 = vperm.xlu1 %2038, %v2566_v33   ;;  %v1123_v55 = vmul.f32 %v1122_v13, %v2872_v54  ;;  %v1150_v23 = vrot.slane %v1132_v63, %v2627_v60 }
 0x200   : > { %v1016_v21 = vadd.f32 %v1015_v5, %v1006_v28  ;;  %v1145_v28 = vpop.permute.xlu0 %1144  ;;  %v1141_v5 = vmul.f32 %v1140_v20, %v1135_v27  ;;  %v1230_v27 = vrot.slane %v2754_v47, %v2627_v60 }
 0x201   : > { %v1151_v41 = vmul.f32 %v1150_v23, %v1145_v28 }
 0x202   : > { %v1026_v34 = vadd.f32 %v1025_v57, %v1016_v21  ;;  %2040 = vset.pattern.permute.xlu1 %v2268_v62 }
 0x203   : > { %1528 = vperm.xlu1 %2040, %v2566_v33   ;;  %v1155_v58 = vpop.permute.xlu1 %1154  ;;  %v2941_v33 = vld [vmem:[%s3086_s6] sm:$0xff] }
 0x204   : > { %v1036_v39 = vadd.f32 %v1035_v31, %v1026_v34  ;;  %v1161_v57 = vmul.f32 %v1160_v61, %v1155_v58  ;;  %v1175_v54 = vpop.permute.xlu0 %1174  ;;  %v2272_v34 = vmov 67   ;;  %v1180_v31 = vrot.slane %v1132_v63, %v2886_v17 }
 0x205   : > { %v1200_v58 = vrot.slane %v1132_v63, %v2715_v9 }
 0x206   : > { %v1054_v4 = vadd.f32 %v1053_v38, %v1036_v39  ;;  %v1181_v39 = vmul.f32 %v1180_v31, %v1175_v54 }
 0x207   : > { %2041 = vset.pattern.permute.xlu1 %v2269_v14  ;;  %v2273_v14 = vmov 68  }
 0x208   : > { %v1064_v18 = vadd.f32 %v1063_v1, %v1054_v4  ;;  %1538 = vperm.xlu1 %2041, %v2941_v33   ;;  %v1165_v11 = vpop.permute.xlu1 %1164 }
 0x209   : > { %v1171_v62 = vmul.f32 %v1170_v43, %v1165_v11 }
 0x20a   : > { %v1074_v25 = vadd.f32 %v1073_v0, %v1064_v18  ;;  %v1205_v18 = vpop.permute.xlu0 %1204  ;;  %v1210_v0 = vrot.slane %v1132_v63, %v2731_v36 }
 0x20c   : > { %v1084_v29 = vadd.f32 %v1083_v42, %v1074_v25  ;;  %2043 = vset.pattern.permute.xlu1 %v2270_v35  ;;  %v1211_v25 = vmul.f32 %v1210_v0, %v1205_v18 }
 0x20d   : > { %1566 = vperm.xlu1 %2043, %v2941_v33   ;;  %v1185_v45 = vpop.permute.xlu1 %1184 }
 0x20e   : > { %v1094_v12 = vadd.f32 %v1093_v8, %v1084_v29  ;;  %v1191_v22 = vmul.f32 %v1190_v3, %v1185_v45  ;;  %v2274_v29 = vmov 70  }
 0x210   : > { %v1104_v44 = vadd.f32 %v1103_v6, %v1094_v12  ;;  %v1235_v12 = vpop.permute.xlu0 %1234  ;;  %v1240_v6 = vrot.slane %v2754_v47, %v2633_v2 }
 0x211   : > { %1557 = vrot.lane.b32.xlu1 %v2754_v47, %s3117_s19  ;;  %s1662_s19 = scalar_lea.sflag [#allocation4], %s2457_s20 }
 0x212   : > { %v1114_v40 = vadd.f32 %v1113_v52, %v1104_v44  ;;  %v1195_v37 = vpop.permute.xlu1 %1194  ;;  %2044 = vset.pattern.permute.xlu1 %v2271_v30  ;;  %v1241_v52 = vmul.f32 %v1240_v6, %v1235_v12  ;;  %v1260_v30 = vrot.slane %v2754_v47, %v2886_v17 }
 0x213   : > { %v1201_v11 = vmul.f32 %v1200_v58, %v1195_v37 }
 0x214   : > { %v1124_v48 = vadd.f32 %v1123_v55, %v1114_v40  ;;  %v1250_v40 = vrot.slane %v2754_v47, %v2643_v10 }
 0x215   : > { %1576 = vperm.xlu1 %2044, %v2941_v33  }
 0x216   : > { %v1142_v59 = vadd.f32 %v1141_v5, %v1124_v48  ;;  %v1265_v48 = vpop.permute.xlu0 %1264 }
 0x217   : > { %v1215_v53 = vpop.permute.xlu1 %1214 }
 0x218   : > { %v1152_v21 = vadd.f32 %v1151_v41, %v1142_v59  ;;  %v1221_v51 = vmul.f32 %v1220_v16, %v1215_v53 }
 0x219   : > { %2046 = vset.pattern.permute.xlu1 %v2272_v34  ;;  %v1290_v34 = vrot.slane %v2754_v47, %v2731_v36 }
 0x21a   : > { %v1162_v26 = vadd.f32 %v1161_v57, %v1152_v21  ;;  %1596 = vperm.xlu1 %2046, %v2941_v33   ;;  %v1280_v21 = vrot.slane %v2754_v47, %v2715_v9  ;;  %v1303_v43 = vpop.permute.xlu0 %1302 }
 0x21c   : > { %v1172_v38 = vadd.f32 %v1171_v62, %v1162_v26  ;;  %v1225_v4 = vpop.permute.xlu1 %1224 }
 0x21d   : > { %v1231_v63 = vmul.f32 %v1230_v27, %v1225_v4 }
 0x21e   : > { %v1182_v1 = vadd.f32 %v1181_v39, %v1172_v38  ;;  %2047 = vset.pattern.permute.xlu1 %v2273_v14  ;;  %v1313_v4 = vpop.permute.xlu0 %1312 }
 0x21f   : > { %1606 = vperm.xlu1 %2047, %v2941_v33  }
 0x220   : > { %v1192_v32 = vadd.f32 %v1191_v22, %v1182_v1 }
 0x221   : > { %v1245_v50 = vpop.permute.xlu1 %1244 }
 0x222   : > { %v1202_v42 = vadd.f32 %v1201_v11, %v1192_v32  ;;  %v1251_v55 = vmul.f32 %v1250_v40, %v1245_v50  ;;  %v1343_v0 = vpop.permute.xlu0 %1342 }
 0x223   : > { %2049 = vset.pattern.permute.xlu1 %v2274_v29 }
 0x224   : > { %v1212_v8 = vadd.f32 %v1211_v25, %v1202_v42  ;;  %1626 = vperm.xlu1 %2049, %v2941_v33  }
 0x226   : > { %v1222_v35 = vadd.f32 %v1221_v51, %v1212_v8  ;;  %v1255_v45 = vpop.permute.xlu1 %1254  ;;  %v1373_v42 = vpop.permute.xlu0 %1372 }
 0x228   : > { %2050 = vset.pattern.permute.xlu1 %v2260_v49  ;;  %v1232_v13 = vadd.f32 %v1231_v63, %v1222_v35  ;;  %v1261_v49 = vmul.f32 %v1260_v30, %v1255_v45 }
 0x229   : > { %1636 = vperm.xlu1 %2050, %v2941_v33   ;;  %v1270_v33 = vrot.slane %v2754_v47, %v2693_v7 }
 0x22a   : > { %v1242_v20 = vadd.f32 %v1241_v52, %v1232_v13  ;;  %v1385_v45 = vpop.permute.xlu0 %1384 }
 0x22b   : > { %v1275_v44 = vpop.permute.xlu1 %1274  ;;  %v1271_v59 = vmul.f32 %v1270_v33, %v1265_v48 }
 0x22c   : > { %v1252_v37 = vadd.f32 %v1251_v55, %v1242_v20  ;;  %v1281_v54 = vmul.f32 %v1280_v21, %v1275_v44 }
 0x22e   : > { %v1262_v5 = vadd.f32 %v1261_v49, %v1252_v37 }
 0x230   : > { %v1285_v23 = vpop.permute.xlu1 %1284  ;;  %v1272_v53 = vadd.f32 %v1271_v59, %v1262_v5 }
 0x231   : > { %v1291_v39 = vmul.f32 %v1290_v34, %v1285_v23 }
 0x232   : > { %v1282_v62 = vadd.f32 %v1281_v54, %v1272_v53 }
 0x234   : > { %v1294_v28 = vpop.permute.xlu1 %1293  ;;  %v1292_v1 = vadd.f32 %v1291_v39, %v1282_v62 }
 0x238   : > { %v1297_v41 = vpop.permute.xlu1 %1296 }
 0x239   : > { %v1299_v61 = vsel %vm645_vm4, %v1294_v28, %v1297_v41 }
 0x23a   : > { %v1300_v57 = vmul.f32 %v1299_v61, %v2701_v24 }
 0x23c   : > { %v1308_v31 = vrot.slane %v1300_v57, %v2608_v46  ;;  %v1323_v26 = vpop.permute.xlu1 %1322  ;;  %v1318_v22 = vrot.slane %v1300_v57, %v2627_v60  ;;  %v1328_v24 = vrot.slane %v1300_v57, %v2633_v2  ;;  %v1338_v25 = vrot.slane %v1300_v57, %v2643_v10 }
 0x23d   : > { %v1348_v29 = vrot.slane %v1300_v57, %v2886_v17  ;;  %v1358_v27 = vrot.slane %v1300_v57, %v2693_v7  ;;  %v1368_v6 = vrot.slane %v1300_v57, %v2715_v9  ;;  %v1378_v55 = vrot.slane %v1300_v57, %v2731_v36 }
 0x23e   : > { %v1309_v38 = vmul.f32 %v1308_v31, %v1303_v43  ;;  %v1319_v14 = vmul.f32 %v1318_v22, %v1313_v4  ;;  %v1329_v11 = vmul.f32 %v1328_v24, %v1323_v26 }
 0x23f   : > { %v1349_v35 = vmul.f32 %v1348_v29, %v1343_v0  ;;  %v1379_v49 = vmul.f32 %v1378_v55, %v1373_v42 }
 0x240   : > { %v1310_v58 = vadd.f32 %v1309_v38, %v1292_v1 }
 0x241   : > { %v1333_v3 = vpop.permute.xlu1 %1332 }
 0x242   : > { %v1320_v32 = vadd.f32 %v1319_v14, %v1310_v58  ;;  %v1339_v16 = vmul.f32 %v1338_v25, %v1333_v3 }
 0x244   : > { %v1330_v50 = vadd.f32 %v1329_v11, %v1320_v32 }
 0x246   : > { %v1353_v18 = vpop.permute.xlu1 %1352  ;;  %v1340_v8 = vadd.f32 %v1339_v16, %v1330_v50 }
 0x247   : > { %v1359_v12 = vmul.f32 %v1358_v27, %v1353_v18 }
 0x248   : > { %v1350_v63 = vadd.f32 %v1349_v35, %v1340_v8 }
 0x24a   : > { %v1360_v40 = vadd.f32 %v1359_v12, %v1350_v63 }
 0x24b   : > { %v1363_v47 = vpop.permute.xlu1 %1362 }
 0x24c   : > { %v1369_v52 = vmul.f32 %v1368_v6, %v1363_v47 }
 0x24e   : > { %v1370_v30 = vadd.f32 %v1369_v52, %v1360_v40 }
 0x250   : > { %v1391_v51 = vpop.permute.xlu1 %1390  ;;  %v1380_v33 = vadd.f32 %v1379_v49, %v1370_v30 }
 0x254   : > { %v1382_v13 = vpop.permute.xlu1 %1381 }
 0x255   : > { %v1387_v44 = vsel %vm698_vm5, %v1382_v13, %v1385_v45 }
 0x256   : > { %v1388_v20 = vmul.f32 %v1387_v44, %v2722_v15  ;;  %v1411_v15 = vpop.permute.xlu0 %1410 }
 0x258   : > { %v1396_v23 = vrot.slane %v1388_v20, %v2608_v46  ;;  %v1401_v37 = vpop.permute.xlu1 %1400  ;;  %v1406_v5 = vrot.slane %v1388_v20, %v2627_v60  ;;  %v1416_v61 = vrot.slane %v1388_v20, %v2633_v2  ;;  %v1426_v57 = vrot.slane %v1388_v20, %v2643_v10 }
 0x259   : > { %v1436_v26 = vrot.slane %v1388_v20, %v2886_v17  ;;  %v1446_v3 = vrot.slane %v1388_v20, %v2693_v7  ;;  %v1456_v14 = vrot.slane %v1388_v20, %v2715_v9  ;;  %v1466_v0 = vrot.slane %v1388_v20, %v2731_v36 }
 0x25a   : > { %v1397_v28 = vmul.f32 %v1396_v23, %v1391_v51  ;;  %v1407_v41 = vmul.f32 %v1406_v5, %v1401_v37  ;;  %v1417_v43 = vmul.f32 %v1416_v61, %v1411_v15  ;;  %v1441_v22 = vpop.permute.xlu0 %1440 }
 0x25b   : > { %v1447_v58 = vmul.f32 %v1446_v3, %v1441_v22 }
 0x25c   : > { %v1398_v59 = vadd.f32 %v1397_v28, %v1380_v33 }
 0x25d   : > { %v1421_v48 = vpop.permute.xlu1 %1420 }
 0x25e   : > { %v1408_v21 = vadd.f32 %v1407_v41, %v1398_v59  ;;  %v1427_v31 = vmul.f32 %v1426_v57, %v1421_v48  ;;  %v1479_v25 = vpop.permute.xlu0 %1478 }
 0x260   : > { %v1418_v34 = vadd.f32 %v1417_v43, %v1408_v21 }
 0x262   : > { %v1431_v53 = vpop.permute.xlu1 %1430  ;;  %v1428_v62 = vadd.f32 %v1427_v31, %v1418_v34  ;;  %v1489_v45 = vpop.permute.xlu0 %1488 }
 0x263   : > { %v1437_v39 = vmul.f32 %v1436_v26, %v1431_v53 }
 0x265   : > { %v1438_v4 = vadd.f32 %v1437_v39, %v1428_v62 }
 0x266   : > { %v1519_v20 = vpop.permute.xlu0 %1518 }
 0x267   : > { %v1451_v54 = vpop.permute.xlu1 %1450  ;;  %v1448_v24 = vadd.f32 %v1447_v58, %v1438_v4 }
 0x268   : > { %v1457_v18 = vmul.f32 %v1456_v14, %v1451_v54 }
 0x26a   : > { %v1458_v42 = vadd.f32 %v1457_v18, %v1448_v24  ;;  %v1549_v49 = vpop.permute.xlu0 %1548 }
 0x26c   : > { %v1461_v38 = vpop.permute.xlu1 %1460 }
 0x26d   : > { %v1467_v47 = vmul.f32 %v1466_v0, %v1461_v38 }
 0x26e   : > { %v1561_v53 = vpop.permute.xlu0 %1560 }
 0x26f   : > { %v1468_v8 = vadd.f32 %v1467_v47, %v1458_v42 }
 0x270   : > { %v1470_v1 = vpop.permute.xlu1 %1469 }
 0x272   : > { %v1587_v58 = vpop.permute.xlu0 %1586 }
 0x274   : > { %v1473_v32 = vpop.permute.xlu1 %1472 }
 0x275   : > { %v1475_v11 = vsel %vm751_vm6, %v1470_v1, %v1473_v32 }
 0x276   : > { %v1476_v50 = vmul.f32 %v1475_v11, %v2736_v19 }
 0x278   : > { %v1484_v16 = vrot.slane %v1476_v50, %v2608_v46  ;;  %v1499_v29 = vpop.permute.xlu1 %1498  ;;  %v1494_v35 = vrot.slane %v1476_v50, %v2627_v60  ;;  %v1504_v6 = vrot.slane %v1476_v50, %v2633_v2  ;;  %v1514_v40 = vrot.slane %v1476_v50, %v2643_v10 }
 0x279   : > { %v1524_v23 = vrot.slane %v1476_v50, %v2886_v17  ;;  %v1534_v48 = vrot.slane %v1476_v50, %v2693_v7  ;;  %v1544_v59 = vrot.slane %v1476_v50, %v2715_v9  ;;  %v1554_v15 = vrot.slane %v1476_v50, %v2731_v36 }
 0x27a   : > { %v1485_v51 = vmul.f32 %v1484_v16, %v1479_v25  ;;  %v1495_v12 = vmul.f32 %v1494_v35, %v1489_v45  ;;  %v1505_v44 = vmul.f32 %v1504_v6, %v1499_v29 }
 0x27b   : > { %v1525_v28 = vmul.f32 %v1524_v23, %v1519_v20  ;;  %v1555_v31 = vmul.f32 %v1554_v15, %v1549_v49 }
 0x27c   : > { %v1486_v27 = vadd.f32 %v1485_v51, %v1468_v8 }
 0x27d   : > { %v1509_v63 = vpop.permute.xlu1 %1508 }
 0x27e   : > { %v1496_v13 = vadd.f32 %v1495_v12, %v1486_v27  ;;  %v1515_v55 = vmul.f32 %v1514_v40, %v1509_v63 }
 0x280   : > { %v1506_v19 = vadd.f32 %v1505_v44, %v1496_v13 }
 0x282   : > { %v1529_v52 = vpop.permute.xlu1 %1528  ;;  %v1516_v30 = vadd.f32 %v1515_v55, %v1506_v19 }
 0x283   : > { %v1535_v5 = vmul.f32 %v1534_v48, %v1529_v52 }
 0x284   : > { %v1526_v33 = vadd.f32 %v1525_v28, %v1516_v30 }
 0x286   : > { %v1536_v21 = vadd.f32 %v1535_v5, %v1526_v33 }
 0x287   : > { %v1539_v37 = vpop.permute.xlu1 %1538 }
 0x288   : > { %v1545_v61 = vmul.f32 %v1544_v59, %v1539_v37 }
 0x28a   : > { %v1546_v57 = vadd.f32 %v1545_v61, %v1536_v21 }
 0x28c   : > { %v1567_v41 = vpop.permute.xlu1 %1566  ;;  %v1556_v38 = vadd.f32 %v1555_v31, %v1546_v57 }
 0x290   : > { %v1558_v43 = vpop.permute.xlu1 %1557 }
 0x291   : > { %v1563_v54 = vsel %vm804_vm7, %v1558_v43, %v1561_v53 }
 0x292   : > { %v1564_v34 = vmul.f32 %v2745_v56, %v1563_v54 }
 0x294   : > { %v1572_v26 = vrot.slane %v1564_v34, %v2608_v46  ;;  %v1582_v62 = vrot.slane %v1564_v34, %v2627_v60  ;;  %v1577_v39 = vpop.permute.xlu1 %1576  ;;  %v1592_v3 = vrot.slane %v1564_v34, %v2633_v2  ;;  %v1602_v0 = vrot.slane %v1564_v34, %v2643_v10  ;;  %v1617_v2 = vpop.permute.xlu0 %1616 }
 0x295   : > { %v1612_v46 = vrot.slane %v1564_v34, %v2886_v17  ;;  %v1622_v47 = vrot.slane %v1564_v34, %v2693_v7  ;;  %v1632_v16 = vrot.slane %v1564_v34, %v2715_v9  ;;  %v1642_v10 = vrot.slane %v1564_v34, %v2731_v36  ;;  %v1645_v7 = vld [vmem:[%s366_s15] sm:$0xff] }
 0x296   : > { %v1573_v4 = vmul.f32 %v1572_v26, %v1567_v41  ;;  %v1583_v22 = vmul.f32 %v1582_v62, %v1577_v39  ;;  %v1593_v24 = vmul.f32 %v1592_v3, %v1587_v58 }
 0x297   : > { %v1623_v42 = vmul.f32 %v1622_v47, %v1617_v2 }
 0x298   : > { %v1574_v1 = vadd.f32 %v1573_v4, %v1556_v38 }
 0x299   : > { %v1597_v14 = vpop.permute.xlu1 %1596 }
 0x29a   : > { %v1584_v18 = vadd.f32 %v1583_v22, %v1574_v1  ;;  %v1603_v32 = vmul.f32 %v1602_v0, %v1597_v14 }
 0x29c   : > { %v1594_v56 = vadd.f32 %v1593_v24, %v1584_v18 }
 0x29e   : > { %v1604_v11 = vadd.f32 %v1603_v32, %v1594_v56  ;;  %v1607_v60 = vpop.permute.xlu1 %1606 }
 0x29f   : > { %v1613_v50 = vmul.f32 %v1612_v46, %v1607_v60 }
 0x2a1   : > { %v1614_v25 = vadd.f32 %v1613_v50, %v1604_v11 }
 0x2a3   : > { %v1627_v29 = vpop.permute.xlu1 %1626  ;;  %v1624_v8 = vadd.f32 %v1623_v42, %v1614_v25 }
 0x2a4   : > { %v1633_v51 = vmul.f32 %v1632_v16, %v1627_v29 }
 0x2a6   : > { %v1634_v35 = vadd.f32 %v1633_v51, %v1624_v8 }
 0x2a8   : > { %v1637_v17 = vpop.permute.xlu1 %1636 }
 0x2a9   : > { %v1643_v27 = vmul.f32 %v1642_v10, %v1637_v17 }
 0x2ab   : > { %v1644_v45 = vadd.f32 %v1643_v27, %v1634_v35 }
 0x2ad   : > { %v1646_v63 = vsub.f32 %v1644_v45, %v1645_v7 }
 0x2af   : > { %v1647_v9 = vmul.f32 %v1646_v63, %v1646_v63 }
 0x2b1   : > { %v1649_v12 = vsel %vm1648_vm8, %v1647_v9, 0.0 }
 0x2b2   : > { %1650 = vadd.xlane.f32.xlu0 %v1649_v12 }
 0x33f   : > { %v1651_v6 = vpop.xlane.xlu0 %1650 }
 0x340   : > { %v1652_v13 = vrot.slane %v1651_v6, 4 }
 0x342   : > { %v1653_v36 = vadd.f32 %v1652_v13, %v1651_v6 }
 0x344   : > { %v1654_v44 = vrot.slane %v1653_v36, 2 }
 0x346   : > { %v1655_v52 = vadd.f32 %v1654_v44, %v1653_v36 }
 0x348   : > { %v1656_v20 = vrot.slane %v1655_v52, 1 }
 0x34a   : > { %v1657_v19 = vadd.f32 %v1656_v20, %v1655_v52 }
 0x34c   : > { %1792 = vpush %v1657_v19 }
 0x37d   : > { %s1793_s10 = spop %1792 }
 0x37e   : > { %v1659_v40 = vstv %s1793_s10 }
 0x37f   : > { %1660 = vst [vmem:[%s358_s21] sm:$0xff] %v1659_v40 }
 0x380   : > { %2124 = shalt.err (!%p2121_p9)
}
 0x381   : > { %s2125_s20 = scalar_lea.hbm %s3038_s18, 128  ;;  %s2129_s21 = scalar_lea.hbm %s3088_s8, 256 }
 0x382   : > { %p2126_p2 = scmp.ne.s32.totalorder %s3038_s18, %s2125_s20  ;;  %p2130_p1 = scmp.lt.u32.totalorder %s3038_s18, %s3088_s8 }
 0x383   : > { %p2131_p11 = scmp.lt.u32.totalorder %s2129_s21, %s2125_s20  ;;  %p2133_p6 = scmp.lt.u32.totalorder %s2125_s20, %s3038_s18 }
 0x384   : > { %p2127_p5 = pnand %p2126_p2, %p2412_p12 }
 0x385   : > { %p2132_p4 = por %p2131_p11, %p2130_p1 }
 0x386   : > { %p2128_p0 = pneg %p2127_p5 }
 0x387   : > { %p2134_p8 = por %p2133_p6, %p2132_p4 }
 0x389   : > { %p2135_p10 = pnand %p2134_p8, %p2128_p0 }
 0x38b   : > { %2138 = shalt.err (!%p2135_p10)
}
 0x38c   : > { %1800 = dma.vmem_to_hbm [thread:$0]  (%p2412_p12), %s3033_s22, 128, %s3038_s18, %s1662_s19  }
 0x38d PF: > { %s1687_s17 = sand.u32 1, %s2169_s27   ;;  %p3118_p13 = scmp.ne.s32.totalorder %s3101_s12, 0 }
 0x38e   : > { %p3119_p3 = scmp.ge.s32.totalorder %s2181_s30, 2  ;;  %s1688_s11 = scalar_lea.sflag [#allocation4], %s1687_s17 }
 0x390   : > { %p1811_p7 = pnand %p3119_p3, %p3118_p13 }
 0x392   : > { %2164 = dma.done.wait (!%p1811_p7), %s1688_s11, 128  }
 0x393   : > { %2166 = vsyncadd (!%p1811_p7), %s1688_s11, 4294967168  ;;  %s3120_s30 = sld [smem:[#allocation11_spill]]  ;;  %s3121_s27 = smov %s2173_s28 }
 0x394   : > { %s3122_s28 = smov %s2177_s29  ;;  %s3123_s29 = smov %s2408_s23 }
 0x399   : > { %p22_p9 = scmp.ge.s32.totalorder %s3120_s30, 4  }
 0x39b   :  { %24 = sbr.rel (!%p22_p9) target bundleno = 6 (0x6), region = 107 }
 0x3a2   :  { %1693 = vsyncpa [#allocation3], 1 }
 0x3a3   :  { %1695 = vsyncpa [#allocation3 + $0x1], 1 }
 0x3a4   :  { %1696 = vsyncpa [#allocation6], 1 }
 0x3a5   :  { %1697 = vsyncpa [#allocation4], 1 }
 0x3a6   :  { %1699 = vsyncpa [#allocation4 + $0x1], 1 }

</bundles_post_ra>
